<compile_context>
chip_gen: v7x
topology: tpu7x:2x2x1
jax: 0.10.0
libtpu: 0.0.40
codegen_flags: <defaults>
</compile_context>

<pallas_src>
import functools

import jax
import jax.numpy as jnp
import numpy as np
from jax import lax
from jax.experimental import pallas as pl
from jax.experimental.pallas import tpu as pltpu


# ----------------------------- Pallas kernel --------------------------------

def _cond_score_kernel(sc_ref, emb_ref, freq_ref,
                       w1sc_ref, w1e_ref, b1_ref,
                       w2_ref, b2_ref, w3_ref,
                       out_ref, *, n_freq, act_layer, compute_dtype):
    cd = compute_dtype
    f32 = jnp.float32
    F = n_freq
    tn = sc_ref.shape[1]

    # Packed scalar rows: row 0 = t, row 1 = p, row 2 = pred + b3 (folded in wrapper).
    t_row = sc_ref[0:1, :]                                   # (1, TN)
    p_row = sc_ref[1:2, :]                                   # (1, TN)
    pred_row = sc_ref[2:3, :]                                # (1, TN)

    # Fused frequency encoding, single VPU multiply:
    #   coord_slab rows 0..F-1 = t, rows F..2F-1 = p (sublane broadcasts only)
    coord_slab = jnp.concatenate(
        [jnp.broadcast_to(t_row, (F, tn)),
         jnp.broadcast_to(p_row, (F, tn))], axis=0)          # (2F, TN)
    phases = freq_ref[...] * coord_slab                      # (2F, TN)

    # One trig slab for a single fused layer-1 GEMM (8-aligned sublane concat).
    trig = jnp.concatenate([jnp.sin(phases), jnp.cos(phases)], axis=0)   # (4F, TN), f32

    # Layer 1: fused sin|cos GEMM + embedding GEMM contracting over E directly on the
    # batch-major (TN, E) block (no wrapper transpose, no in-kernel cast of the
    # HBM-streamed embedding / weights).
    h = (jnp.dot(w1sc_ref[...], trig.astype(cd), preferred_element_type=f32)
         + lax.dot_general(w1e_ref[...], emb_ref[...],
                           dimension_numbers=(((1,), (1,)), ((), ())),
                           preferred_element_type=f32)
         + b1_ref[...])                                      # (H, TN), f32
    h = jnp.maximum(h, 0.0)

    # Layer 2 (hidden ReLU)
    h = jnp.dot(w2_ref[...], h.astype(cd), preferred_element_type=f32) + b2_ref[...]
    h = jnp.maximum(h, 0.0)                                  # (H, TN)

    # Output layer (output_dim = 1), then `.view(-1) + pred` (+ b3, already folded).
    score = (jnp.dot(w3_ref[...], h.astype(cd), preferred_element_type=f32)
             + pred_row)                                     # (1, TN), lane-dense

    if act_layer == 'Sigmoid':
        out = pl.reciprocal(1.0 + jnp.exp(-score), approx=False)
    else:
        # 'None' -> identity.  'Softmax' over the flattened batch is a global
        # reduction across tiles and is applied in the wrapper.
        out = score

    out_ref[...] = out.astype(out_ref.dtype)


# ----------------------------- wrapper ---------------------------------------

def conditional_score_net(coord, embedding, pred, params, *, n_freq, act_layer,
                          tile_n=1024, compute_dtype=jnp.bfloat16):
    """Pallas-backed ConditionalScoreNet.forward.

    coord: (N, 2), embedding: (N, E) batch-major, pred: (N,).  Returns (N,).
    params in PyTorch layout: w1 (4F+E, H), b1 (H,), w2 (H, H), b2 (H,), w3 (H, 1), b3 (1,).
    compute_dtype: MXU operand dtype (bf16 default; f32 accumulation always).
    """
    N = coord.shape[0]
    E = embedding.shape[1]
    w1, b1, w2, b2, w3, b3 = params
    d_in, H = w1.shape
    F = n_freq
    assert d_in == 4 * F + E
    assert w3.shape == (H, 1)
    assert tile_n % 128 == 0, "tile_n must be a multiple of 128 (lane width)"
    assert N % tile_n == 0, "batch must be divisible by tile_n"
    # TODO(synk): support N % tile_n != 0 via padding + masking (mask padded rows before
    # the wrapper-level global Softmax).

    cd = compute_dtype
    f32 = jnp.float32

    # ---- one-off layout plumbing (outside the kernel) ------------------------
    freqs = (2.0 ** np.arange(F, dtype=np.float32)) * np.pi
    freq_col = jnp.asarray(np.tile(freqs, 2).reshape(2 * F, 1))           # (2F, 1) f32

    # Split + fuse w1 so layer 1 is two GEMMs (sin|cos fused, embedding) with no concat.
    # Row ordering matches the blocked [sin_t | cos_t | sin_p | cos_p | emb] reference.
    # TODO(synk): real tcnn FrequencyEncoding interleaves sin/cos per frequency; verify
    # the row ordering against a real checkpoint before loading trained weights.
    w1_sincos = jnp.concatenate(
        [w1[0:F], w1[2 * F:3 * F],          # sin_t, sin_p
         w1[F:2 * F], w1[3 * F:4 * F]],     # cos_t, cos_p
        axis=0).T.astype(cd)                                              # (H, 4F)
    w1_emb = w1[4 * F:].T.astype(cd)                                      # (H, E)
    w2_t = w2.T.astype(cd)                                                # (H, H)
    w3_t = w3.T.astype(cd)                                                # (1, H)
    b1_c = b1.reshape(H, 1).astype(f32)
    b2_c = b2.reshape(H, 1).astype(f32)

    # Pack t, p, pred (+ b3 folded) into one (3, N) f32 slab -> one DMA per step.
    scalar_rows = jnp.stack(
        [coord[:, 0], coord[:, 1], pred + b3[0]], axis=0).astype(f32)     # (3, N)

    # Embedding stays batch-major; single one-off cast to the streaming dtype.
    emb = embedding.astype(cd)                                            # (N, E)

    grid = (N // tile_n,)
    lane_blk = lambda i: (0, i)     # tile the batch (lane) axis
    batch_blk = lambda i: (i, 0)    # tile the batch (sublane) axis of the embedding
    resident = lambda i: (0, 0)     # constant block index -> stays in VMEM across grid

    kernel = functools.partial(_cond_score_kernel, n_freq=F,
                               act_layer=act_layer, compute_dtype=cd)

    out_row = pl.pallas_call(
        kernel,
        out_shape=jax.ShapeDtypeStruct((1, N), jnp.float32),
        grid_spec=pltpu.PrefetchScalarGridSpec(
            num_scalar_prefetch=0,
            grid=grid,
            in_specs=[
                pl.BlockSpec((3, tile_n), lane_blk),      # packed t / p / pred rows
                pl.BlockSpec((tile_n, E), batch_blk),     # embedding (batch-major)
                pl.BlockSpec((2 * F, 1), resident),       # frequency column
                pl.BlockSpec((H, 4 * F), resident),       # w1 sin|cos (fused)
                pl.BlockSpec((H, E), resident),           # w1 embedding part
                pl.BlockSpec((H, 1), resident),           # b1
                pl.BlockSpec((H, H), resident),           # w2
                pl.BlockSpec((H, 1), resident),           # b2
                pl.BlockSpec((1, H), resident),           # w3
            ],
            out_specs=pl.BlockSpec((1, tile_n), lane_blk),
        ),
        compiler_params=pltpu.CompilerParams(
            dimension_semantics=("parallel",),
            vmem_limit_bytes=32 * 1024 * 1024),
    )(scalar_rows, emb, freq_col, w1_sincos, w1_emb, b1_c, w2_t, b2_c, w3_t)

    out = out_row.reshape(N)                 # .view(-1) semantics
    if act_layer == 'Softmax':
        # nn.Softmax(dim=-1) on the flattened (N,) vector == softmax over the whole
        # batch: a global reduction across tiles, applied outside the kernel.
        out = jax.nn.softmax(out, axis=-1)
    return out


# ----------------------------- pure-JAX reference ----------------------------

def reference_forward(coord, embedding, pred, params, *, n_freq, act_layer):
    w1, b1, w2, b2, w3, b3 = params
    hp = jax.lax.Precision.HIGHEST
    freqs = (2.0 ** jnp.arange(n_freq, dtype=jnp.float32)) * jnp.pi

    def enc(x):                                   # x: (N, 1)
        xf = x * freqs[None, :]
        return jnp.concatenate([jnp.sin(xf), jnp.cos(xf)], axis=-1)

    t_enc = enc(coord[:, 0:1])
    p_enc = enc(coord[:, 1:2])
    feat = jnp.concatenate([t_enc, p_enc, embedding], axis=-1)
    h = jnp.maximum(jnp.dot(feat, w1, precision=hp) + b1, 0.0)
    h = jnp.maximum(jnp.dot(h, w2, precision=hp) + b2, 0.0)
    out = (jnp.dot(h, w3, precision=hp) + b3).reshape(-1) + pred
    if act_layer == 'Sigmoid':
        return jax.nn.sigmoid(out)
    if act_layer == 'Softmax':
        return jax.nn.softmax(out, axis=-1)
    return out


# ----------------------------------- main ------------------------------------

if __name__ == "__main__":
    N = 2048          # batch -> grid = N // tile_n = 2 (>= 2 & even: shards across v7x TCs)
    E = 32            # embedding_size (512 in the real module; small demo)
    F = 4             # encoder n_frequencies -> each 1-D encoder outputs 2F dims
    H = 64            # mlp hidden width (tcnn n_neurons)
    unique_labels = np.arange(10, dtype=np.int64)    # RegressionNet -> output_dim = 1
    ACT = 'Sigmoid'                                  # act_layer
    d_in = 4 * F + E

    key = jax.random.PRNGKey(0)
    k_coord, k_emb, k_pred, k1, k2, k3, kb = jax.random.split(key, 7)

    coord = jax.random.uniform(k_coord, (N, 2), dtype=jnp.float32)       # (t, pred_coord)
    embedding = jax.random.normal(k_emb, (N, E), dtype=jnp.float32)
    pred = jax.random.uniform(k_pred, (N,), dtype=jnp.float32)           # base predictions

    # Deterministic synthetic MLP parameters (tcnn FullyFusedMLP is bias-free;
    # small deterministic biases added for generality).
    w1 = jax.random.normal(k1, (d_in, H), dtype=jnp.float32) * (1.0 / np.sqrt(d_in))
    w2 = jax.random.normal(k2, (H, H), dtype=jnp.float32) * (1.0 / np.sqrt(H))
    w3 = jax.random.normal(k3, (H, 1), dtype=jnp.float32) * (1.0 / np.sqrt(H))
    b_all = jax.random.normal(kb, (2 * H + 1,), dtype=jnp.float32) * 0.01
    b1 = b_all[:H]
    b2 = b_all[H:2 * H]
    b3 = b_all[2 * H:]
    params = (w1, b1, w2, b2, w3, b3)

    ref = reference_forward(coord, embedding, pred, params, n_freq=F, act_layer=ACT)

    # --- Sigmoid score path, f32 operands (bit-tight correctness check) ---
    out_f32 = conditional_score_net(coord, embedding, pred, params,
                                    n_freq=F, act_layer=ACT, tile_n=1024,
                                    compute_dtype=jnp.float32)
    out_f32 = jax.block_until_ready(out_f32)
    np.testing.assert_allclose(np.asarray(out_f32), np.asarray(ref), rtol=3e-4, atol=2e-5)
    assert out_f32.shape == (N,)

    # --- Sigmoid score path, bf16-streamed operands (production / perf path) ---
    out_bf16 = conditional_score_net(coord, embedding, pred, params,
                                     n_freq=F, act_layer=ACT, tile_n=1024,
                                     compute_dtype=jnp.bfloat16)
    out_bf16 = jax.block_until_ready(out_bf16)
    np.testing.assert_allclose(np.asarray(out_bf16), np.asarray(ref), rtol=5e-2, atol=2e-2)

    # --- 'Softmax' act path (kernel emits scores; global batch softmax in wrapper) ---
    out_sm = conditional_score_net(coord, embedding, pred, params,
                                   n_freq=F, act_layer='Softmax', tile_n=1024,
                                   compute_dtype=jnp.float32)
    out_sm = jax.block_until_ready(out_sm)
    ref_sm = reference_forward(coord, embedding, pred, params, n_freq=F, act_layer='Softmax')
    np.testing.assert_allclose(np.asarray(out_sm), np.asarray(ref_sm), rtol=3e-4, atol=1e-8)
    np.testing.assert_allclose(float(np.asarray(out_sm).sum()), 1.0, rtol=1e-4)

    print("KERNEL_OK")
</pallas_src>

<mosaic_0001>
module attributes {stable_mosaic.version = 11 : i64} {
  func.func @_cond_score_kernel(%arg0: i32, %arg1: memref<3x1024xf32, #tpu.memory_space<vmem>>, %arg2: memref<1024x32xf32, #tpu.memory_space<vmem>>, %arg3: memref<8x1xf32, #tpu.memory_space<vmem>>, %arg4: memref<64x16xf32, #tpu.memory_space<vmem>>, %arg5: memref<64x32xf32, #tpu.memory_space<vmem>>, %arg6: memref<64x1xf32, #tpu.memory_space<vmem>>, %arg7: memref<64x64xf32, #tpu.memory_space<vmem>>, %arg8: memref<64x1xf32, #tpu.memory_space<vmem>>, %arg9: memref<1x64xf32, #tpu.memory_space<vmem>>, %arg10: memref<1x1024xf32, #tpu.memory_space<vmem>>) attributes {dimension_semantics = [#tpu.dimension_semantics<parallel>], iteration_bounds = array<i64: 2>, scalar_prefetch = 0 : i64, scratch_operands = 0 : i64, tpu.core_type = #tpu.core_type<tc>, window_params = [{transform_indices = @transform_0, window_bounds = array<i64: 3, 1024>}, {transform_indices = @transform_1, window_bounds = array<i64: 1024, 32>}, {pipeline_mode = #tpu.pipeline_mode<synchronous>, transform_indices = @transform_2, window_bounds = array<i64: 8, 1>}, {pipeline_mode = #tpu.pipeline_mode<synchronous>, transform_indices = @transform_3, window_bounds = array<i64: 64, 16>}, {pipeline_mode = #tpu.pipeline_mode<synchronous>, transform_indices = @transform_4, window_bounds = array<i64: 64, 32>}, {pipeline_mode = #tpu.pipeline_mode<synchronous>, transform_indices = @transform_5, window_bounds = array<i64: 64, 1>}, {pipeline_mode = #tpu.pipeline_mode<synchronous>, transform_indices = @transform_6, window_bounds = array<i64: 64, 64>}, {pipeline_mode = #tpu.pipeline_mode<synchronous>, transform_indices = @transform_7, window_bounds = array<i64: 64, 1>}, {pipeline_mode = #tpu.pipeline_mode<synchronous>, transform_indices = @transform_8, window_bounds = array<i64: 1, 64>}, {transform_indices = @transform_9, window_bounds = array<i64: 1, 1024>}]} {
    %c0 = arith.constant 0 : index
    %c0_0 = arith.constant 0 : index
    %0 = vector.load %arg1[%c0, %c0_0] : memref<3x1024xf32, #tpu.memory_space<vmem>>, vector<1x1024xf32>
    %c1 = arith.constant 1 : index
    %c0_1 = arith.constant 0 : index
    %1 = vector.load %arg1[%c1, %c0_1] : memref<3x1024xf32, #tpu.memory_space<vmem>>, vector<1x1024xf32>
    %c2 = arith.constant 2 : index
    %c0_2 = arith.constant 0 : index
    %2 = vector.load %arg1[%c2, %c0_2] : memref<3x1024xf32, #tpu.memory_space<vmem>>, vector<1x1024xf32>
    %3 = vector.shape_cast %0 : vector<1x1024xf32> to vector<1x1024xf32>
    %4 = vector.broadcast %3 : vector<1x1024xf32> to vector<4x1024xf32>
    %5 = vector.shape_cast %1 : vector<1x1024xf32> to vector<1x1024xf32>
    %6 = vector.broadcast %5 : vector<1x1024xf32> to vector<4x1024xf32>
    %7 = tpu.concatenate %4, %6 in 0 : vector<4x1024xf32>, vector<4x1024xf32> -> vector<8x1024xf32>
    %c0_3 = arith.constant 0 : index
    %c0_4 = arith.constant 0 : index
    %8 = vector.load %arg3[%c0_3, %c0_4] : memref<8x1xf32, #tpu.memory_space<vmem>>, vector<8x1xf32>
    %9 = vector.broadcast %8 : vector<8x1xf32> to vector<8x1024xf32>
    %10 = arith.mulf %9, %7 : vector<8x1024xf32>
    %11 = math.sin %10 : vector<8x1024xf32>
    %12 = math.cos %10 : vector<8x1024xf32>
    %13 = tpu.concatenate %11, %12 in 0 : vector<8x1024xf32>, vector<8x1024xf32> -> vector<16x1024xf32>
    %c0_5 = arith.constant 0 : index
    %c0_6 = arith.constant 0 : index
    %14 = vector.load %arg4[%c0_5, %c0_6] : memref<64x16xf32, #tpu.memory_space<vmem>>, vector<64x16xf32>
    %cst = arith.constant dense<0.000000e+00> : vector<64x1024xf32>
    %15 = tpu.matmul %14, %13, %cst {dimension_numbers = #tpu.dot_dimension_numbers<[1], [0], [0], [1], [0, 0, 1, 1], [], []>} : vector<64x16xf32>, vector<16x1024xf32>, vector<64x1024xf32> -> vector<64x1024xf32>
    %c0_7 = arith.constant 0 : index
    %c0_8 = arith.constant 0 : index
    %16 = vector.load %arg5[%c0_7, %c0_8] : memref<64x32xf32, #tpu.memory_space<vmem>>, vector<64x32xf32>
    %c0_9 = arith.constant 0 : index
    %c0_10 = arith.constant 0 : index
    %17 = vector.load %arg2[%c0_9, %c0_10] : memref<1024x32xf32, #tpu.memory_space<vmem>>, vector<1024x32xf32>
    %cst_11 = arith.constant dense<0.000000e+00> : vector<64x1024xf32>
    %18 = tpu.matmul %16, %17, %cst_11 {dimension_numbers = #tpu.dot_dimension_numbers<[1], [1], [0], [0], [0, 0, 1, 0], [], []>} : vector<64x32xf32>, vector<1024x32xf32>, vector<64x1024xf32> -> vector<64x1024xf32>
    %19 = arith.addf %15, %18 : vector<64x1024xf32>
    %c0_12 = arith.constant 0 : index
    %c0_13 = arith.constant 0 : index
    %20 = vector.load %arg6[%c0_12, %c0_13] : memref<64x1xf32, #tpu.memory_space<vmem>>, vector<64x1xf32>
    %21 = vector.broadcast %20 : vector<64x1xf32> to vector<64x1024xf32>
    %22 = arith.addf %19, %21 : vector<64x1024xf32>
    %cst_14 = arith.constant 0.000000e+00 : f32
    %23 = vector.broadcast %cst_14 : f32 to vector<64x1024xf32>
    %24 = arith.maximumf %22, %23 : vector<64x1024xf32>
    %c0_15 = arith.constant 0 : index
    %c0_16 = arith.constant 0 : index
    %25 = vector.load %arg7[%c0_15, %c0_16] : memref<64x64xf32, #tpu.memory_space<vmem>>, vector<64x64xf32>
    %cst_17 = arith.constant dense<0.000000e+00> : vector<64x1024xf32>
    %26 = tpu.matmul %25, %24, %cst_17 {dimension_numbers = #tpu.dot_dimension_numbers<[1], [0], [0], [1], [0, 0, 1, 1], [], []>} : vector<64x64xf32>, vector<64x1024xf32>, vector<64x1024xf32> -> vector<64x1024xf32>
    %c0_18 = arith.constant 0 : index
    %c0_19 = arith.constant 0 : index
    %27 = vector.load %arg8[%c0_18, %c0_19] : memref<64x1xf32, #tpu.memory_space<vmem>>, vector<64x1xf32>
    %28 = vector.broadcast %27 : vector<64x1xf32> to vector<64x1024xf32>
    %29 = arith.addf %26, %28 : vector<64x1024xf32>
    %cst_20 = arith.constant 0.000000e+00 : f32
    %30 = vector.broadcast %cst_20 : f32 to vector<64x1024xf32>
    %31 = arith.maximumf %29, %30 : vector<64x1024xf32>
    %c0_21 = arith.constant 0 : index
    %c0_22 = arith.constant 0 : index
    %32 = vector.load %arg9[%c0_21, %c0_22] : memref<1x64xf32, #tpu.memory_space<vmem>>, vector<1x64xf32>
    %cst_23 = arith.constant dense<0.000000e+00> : vector<1x1024xf32>
    %33 = tpu.matmul %32, %31, %cst_23 {dimension_numbers = #tpu.dot_dimension_numbers<[1], [0], [0], [1], [0, 0, 1, 1], [], []>} : vector<1x64xf32>, vector<64x1024xf32>, vector<1x1024xf32> -> vector<1x1024xf32>
    %34 = arith.addf %33, %2 : vector<1x1024xf32>
    %cst_24 = arith.constant 0.000000e+00 : f32
    %35 = vector.broadcast %cst_24 : f32 to vector<1x1024xf32>
    %36 = arith.subf %35, %34 : vector<1x1024xf32>
    %37 = math.exp %36 : vector<1x1024xf32>
    %cst_25 = arith.constant 1.000000e+00 : f32
    %38 = vector.broadcast %cst_25 : f32 to vector<1x1024xf32>
    %39 = arith.addf %38, %37 : vector<1x1024xf32>
    %40 = tpu.reciprocal %39 : vector<1x1024xf32> -> vector<1x1024xf32>
    %c0_26 = arith.constant 0 : index
    %c0_27 = arith.constant 0 : index
    %41 = vector.load %arg10[%c0_26, %c0_27] : memref<1x1024xf32, #tpu.memory_space<vmem>>, vector<1x1024xf32>
    tpu.vector_store %arg10[%c0_26, %c0_27], %40 {strides = array<i32>} : memref<1x1024xf32, #tpu.memory_space<vmem>>, vector<1x1024xf32>,
    return
  }
  func.func @transform_0(%arg0: i32) -> (i32, i32) {
    %c0_i32 = arith.constant 0 : i32
    %c0_i32_0 = arith.constant 0 : i32
    return %c0_i32, %arg0 : i32, i32
  }
  func.func @transform_1(%arg0: i32) -> (i32, i32) {
    %c0_i32 = arith.constant 0 : i32
    %c0_i32_0 = arith.constant 0 : i32
    return %arg0, %c0_i32 : i32, i32
  }
  func.func @transform_2(%arg0: i32) -> (i32, i32) {
    %c0_i32 = arith.constant 0 : i32
    %c0_i32_0 = arith.constant 0 : i32
    %c0_i32_1 = arith.constant 0 : i32
    return %c0_i32, %c0_i32_0 : i32, i32
  }
  func.func @transform_3(%arg0: i32) -> (i32, i32) {
    %c0_i32 = arith.constant 0 : i32
    %c0_i32_0 = arith.constant 0 : i32
    %c0_i32_1 = arith.constant 0 : i32
    return %c0_i32, %c0_i32_0 : i32, i32
  }
  func.func @transform_4(%arg0: i32) -> (i32, i32) {
    %c0_i32 = arith.constant 0 : i32
    %c0_i32_0 = arith.constant 0 : i32
    %c0_i32_1 = arith.constant 0 : i32
    return %c0_i32, %c0_i32_0 : i32, i32
  }
  func.func @transform_5(%arg0: i32) -> (i32, i32) {
    %c0_i32 = arith.constant 0 : i32
    %c0_i32_0 = arith.constant 0 : i32
    %c0_i32_1 = arith.constant 0 : i32
    return %c0_i32, %c0_i32_0 : i32, i32
  }
  func.func @transform_6(%arg0: i32) -> (i32, i32) {
    %c0_i32 = arith.constant 0 : i32
    %c0_i32_0 = arith.constant 0 : i32
    %c0_i32_1 = arith.constant 0 : i32
    return %c0_i32, %c0_i32_0 : i32, i32
  }
  func.func @transform_7(%arg0: i32) -> (i32, i32) {
    %c0_i32 = arith.constant 0 : i32
    %c0_i32_0 = arith.constant 0 : i32
    %c0_i32_1 = arith.constant 0 : i32
    return %c0_i32, %c0_i32_0 : i32, i32
  }
  func.func @transform_8(%arg0: i32) -> (i32, i32) {
    %c0_i32 = arith.constant 0 : i32
    %c0_i32_0 = arith.constant 0 : i32
    %c0_i32_1 = arith.constant 0 : i32
    return %c0_i32, %c0_i32_0 : i32, i32
  }
  func.func @transform_9(%arg0: i32) -> (i32, i32) {
    %c0_i32 = arith.constant 0 : i32
    %c0_i32_0 = arith.constant 0 : i32
    return %c0_i32, %arg0 : i32, i32
  }
}

</mosaic_0001>

<bundles_post_ra>
// kernel: tpu_custom_call.1
= control target key start
LH: loop header
LB: loop body
LE: loop exit
PB: predicated region body
PF: predicated region fallthrough
CT: control target
= control target key end

     0   :  { %14 = vsyncpa [#allocation3], 0  ;;  %s8053_s0 = inlined_call_operand.vmem [shape: f32[3,2048], index: 0, kind: input, shape index: {}]   ;;  %s8054_s1 = inlined_call_operand.vmem [shape: f32[2048,32], index: 1, kind: input, shape index: {}]   ;;  %s8055_s2 = inlined_call_operand.vmem [shape: f32[8,1], index: 2, kind: input, shape index: {}]   ;;  %s8056_s3 = inlined_call_operand.vmem [shape: f32[64,16], index: 3, kind: input, shape index: {}]   ;;  %s8057_s4 = inlined_call_operand.vmem [shape: f32[64,32], index: 4, kind: input, shape index: {}]   ;;  %s8058_s5 = inlined_call_operand.vmem [shape: f32[64,1], index: 5, kind: input, shape index: {}]   ;;  %s8059_s6 = inlined_call_operand.vmem [shape: f32[64,64], index: 6, kind: input, shape index: {}]   ;;  %s8060_s7 = inlined_call_operand.vmem [shape: f32[64,1], index: 7, kind: input, shape index: {}]   ;;  %s8061_s8 = inlined_call_operand.vmem [shape: f32[1,64], index: 8, kind: input, shape index: {}]   ;;  %s8062_s9 = inlined_call_operand.hbm [shape: f32[1,2048], index: 9, kind: output, shape index: {}]  }
   0x1   :  { %16 = vsyncpa [#allocation3 + $0x1], 0  ;;  %s6062_s30 = smov 0   ;;  %s6064_s10 = smov 0  }
   0x2   :  { %s6066_s11 = smov 0   ;;  %s6068_s12 = smov 0  }
   0x3 LB: > { %s6083_s13 = sadd.s32 4294967295, %s6000_s12   ;;  %s4891_s14 = sadd.s32 4294967294, %s6000_s12   ;;  %s6000_s12 = sphi %s6068_s12, %s8084_s12   ;;  %s5996_s11 = sphi %s6066_s11, %s8083_s11   ;;  %s5992_s10 = sphi %s6064_s10, %s8082_s10   ;;  %s5988_s30 = sphi %s6062_s30, %s8081_s30  }
   0x4   : > { %s6087_s15 = sadd.s32 1, %s6000_s12   ;;  %s228_s16 = sadd.s32 1, %s5996_s11 }
   0x5   : > { %s225_s17 = ssub.s32 %s6000_s12, %s6087_s15  ;;  %p238_p0 = scmp.ne.s32.totalorder %s5996_s11, %s5992_s10 }
   0x6   : > { %p226_p1 = scmp.eq.s32.totalorder %s225_s17, 0  ;;  %p239_p2 = scmp.eq.s32.totalorder %s6083_s13, 1 }
   0x7   : > { %p244_p3 = scmp.ne.s32.totalorder %s5992_s10, %s5988_s30  ;;  %p245_p4 = scmp.eq.s32.totalorder %s4891_s14, 1 }
   0x8   : > { %s6098_s18 = scalar_select %p226_p1, %s5996_s11, %s228_s16  }
   0x9   : > { %p6100_p5 = por %p239_p2, %p238_p0  ;;  %p6104_p6 = por %p245_p4, %p244_p3 }
   0xa   : > { %p4894_p7 = scmp.ge.s32.totalorder %s6000_s12, 1  ;;  %p302_p8 = scmp.lt.s32.totalorder %s6000_s12, 3 }
   0xc   : > { %p303_p9 = pnand %p4894_p7, %p302_p8 }
   0xd   : > { %v452_v0 = vld [vmem:[%s8055_s2] sm:$0xff] (!%p303_p9)  ;;  %s6114_s23 = sshll.u32 (!%p303_p9), %s6083_s13, 7  ;;  %v6002_v1 = vmov (!%p303_p9), 0   ;;  %vm2266_vm0 = vcmask (!%p303_p9), 261120   ;;  %v3607_v4 = vld [vmem:[%s8058_s5 + $0x18] sm:$0xff] (!%p303_p9)  ;;  %v3609_v22 = vld [vmem:[%s8058_s5 + $0x28] sm:$0xff] (!%p303_p9) }
   0xe   : > { %306 = sbr.rel (%p303_p9) target bundleno = 1173 (0x495), region = 56  ;;  %5872 = vset.pattern.permute.xlu0 (!%p303_p9), %v6002_v1  ;;  %p350_p10 = scmp.lt.s32.totalorder (!%p303_p9), %s6114_s23, 255  ;;  %5873 = vset.pattern.permute.xlu1 (!%p303_p9), %v6002_v1  ;;  %v3604_v2 = vld [vmem:[%s8058_s5] sm:$0xff] (!%p303_p9)  ;;  %vm6140_vm1 = vmpackc.low (!%p303_p9), %vm2266_vm0, %vm2266_vm0  ;;  %v3611_v33 = vld [vmem:[%s8058_s5 + $0x38] sm:$0xff] (!%p303_p9)  ;;  %vm443_vm2 = vcmask (!%p303_p9), 1043456  }
   0xf   : > { %455 = vperm.xlu0 (!%p303_p9), %5872, %v452_v0   ;;  %v6124_v3 = vld [vmem:[%s8057_s4] sm:$0xff] (!%p303_p9)  ;;  %v3789_v38 = vld [vmem:[%s8060_s7 + $0x8] sm:$0xff] (!%p303_p9)  ;;  %v3791_v47 = vld [vmem:[%s8060_s7 + $0x18] sm:$0xff] (!%p303_p9)  ;;  %s4896_s14 = sshll.u32 (!%p303_p9), %s6083_s13, 3 }
  0x10   : > { %5232 = vmatprep.mubr.msk.f32.mxu0 (!%p303_p9), %vm2266_vm0, %v6124_v3  ;;  %5280 = vmatprep.mubr.msk.f32.mxu1 (!%p303_p9), %vm2266_vm0, %v6124_v3  ;;  %v3793_v52 = vld [vmem:[%s8060_s7 + $0x28] sm:$0xff] (!%p303_p9)  ;;  %v3795_v61 = vld [vmem:[%s8060_s7 + $0x38] sm:$0xff] (!%p303_p9)  ;;  %p344_p11 = scmp.lt.s32.totalorder (!%p303_p9), %s4896_s14, 15 }
  0x13   : > { %3614 = vperm.xlu0 (!%p303_p9), %5872, %v3604_v2  }
  0x15   : > { %s351_s26 = scalar_select %p350_p10, %s6114_s23, 255 }
  0x16   : > { %s8086_s14 = smov (!%p344_p11, %s4896_s14), 15 }
  0x17   : > { %s4899_s29 = sshll.u32 %s351_s26, 3  ;;  %3629 = vperm.xlu0 %5872, %v3607_v4   ;;  %s4897_s13 = sshll.u32 %s8086_s14, 2 }
  0x18   : > { %s6136_s22 = scalar_lea.vmem %s8054_s1, %s4899_s29  ;;  %s6500_s21 = scalar_lea.vmem %s8053_s0, %s4897_s13 }
  0x19   : > { %v2154_v6 = vld [vmem:[%s6136_s22 + $0x80] sm:$0xff]  ;;  %v2155_v7 = vld [vmem:[%s6136_s22 + $0x88] sm:$0xff]  ;;  %v2156_v17 = vld [vmem:[%s6136_s22 + $0x90] sm:$0xff]  ;;  %s6011_s26 = smov [#allocation2]  }
  0x1a   : > { %v2186_v8 = vld [vmem:[%s6136_s22 + $0x180] sm:$0xff]  ;;  %v5392_v9 = vpack.c.bf16 %v2155_v7, %v2154_v6  ;;  %v2187_v10 = vld [vmem:[%s6136_s22 + $0x188] sm:$0xff]  ;;  %v2157_v19 = vld [vmem:[%s6136_s22 + $0x98] sm:$0xff]  ;;  %s5942_s27 = sshll.u32 %s6011_s26, 4  ;;  %s5943_s27 = int_to_ptr.vmem [resolvable:$false] %s5942_s27 }
  0x1b   : > { %v2138_v11 = vld [vmem:[%s6136_s22] sm:$0xff]  ;;  %v2139_v12 = vld [vmem:[%s6136_s22 + $0x8] sm:$0xff]  ;;  %v5440_v13 = vpack.c.bf16 %v2187_v10, %v2186_v8  ;;  %v2188_v20 = vld [vmem:[%s6136_s22 + $0x190] sm:$0xff]  ;;  %v5398_v23 = vpack.c.bf16 %v2157_v19, %v2156_v17  ;;  %3639 = vperm.xlu0 %5872, %v3609_v22   ;;  %s5944_s28 = scalar_lea.vmem %s5943_s27, 256 }
  0x1c   : > { %v5395_v14 = vpack.c.bf16 %v2139_v12, %v2138_v11  ;;  %v2170_v15 = vld [vmem:[%s6136_s22 + $0x100] sm:$0xff]  ;;  %v2171_v16 = vld [vmem:[%s6136_s22 + $0x108] sm:$0xff]  ;;  %5394 = vmatprep.subr.msk.bf16.mxu0 %vm6140_vm1, %v5392_v9  ;;  %v2189_v21 = vld [vmem:[%s6136_s22 + $0x198] sm:$0xff] }
  0x1d   : > { %v5443_v18 = vpack.c.bf16 %v2171_v16, %v2170_v15  ;;  %5442 = vmatprep.subr.msk.bf16.mxu1 %vm6140_vm1, %v5440_v13  ;;  %v5446_v24 = vpack.c.bf16 %v2189_v21, %v2188_v20  ;;  %v2140_v25 = vld [vmem:[%s6136_s22 + $0x10] sm:$0xff]  ;;  %v2141_v26 = vld [vmem:[%s6136_s22 + $0x18] sm:$0xff]  ;;  %v2158_v29 = vld [vmem:[%s6136_s22 + $0xa0] sm:$0xff] }
  0x1e   : > { %5397 = vmatpush3.bf16.xpose.msk.msra.mxu0 %vm6140_vm1, %v5395_v14  ;;  %v2172_v27 = vld [vmem:[%s6136_s22 + $0x110] sm:$0xff]  ;;  %v2173_v28 = vld [vmem:[%s6136_s22 + $0x118] sm:$0xff]  ;;  %v2159_v30 = vld [vmem:[%s6136_s22 + $0xa8] sm:$0xff]  ;;  %v5401_v34 = vpack.c.bf16 %v2141_v26, %v2140_v25 }
  0x1f   : > { %5445 = vmatpush3.bf16.xpose.msk.msra.mxu1 %vm6140_vm1, %v5443_v18  ;;  %5400 = vmatprep.subr.msk.bf16.mxu0 %vm6140_vm1, %v5398_v23  ;;  %v2190_v31 = vld [vmem:[%s6136_s22 + $0x1a0] sm:$0xff]  ;;  %v2191_v32 = vld [vmem:[%s6136_s22 + $0x1a8] sm:$0xff]  ;;  %v5449_v35 = vpack.c.bf16 %v2173_v28, %v2172_v27  ;;  %v5404_v36 = vpack.c.bf16 %v2159_v30, %v2158_v29  ;;  %v2160_v43 = vld [vmem:[%s6136_s22 + $0xb0] sm:$0xff] }
  0x20   : > { %5448 = vmatprep.subr.msk.bf16.mxu1 %vm6140_vm1, %v5446_v24  ;;  %v5452_v37 = vpack.c.bf16 %v2191_v32, %v2190_v31  ;;  %3649 = vperm.xlu0 %5872, %v3611_v33   ;;  %v2142_v39 = vld [vmem:[%s6136_s22 + $0x20] sm:$0xff]  ;;  %v2143_v40 = vld [vmem:[%s6136_s22 + $0x28] sm:$0xff]  ;;  %v2161_v44 = vld [vmem:[%s6136_s22 + $0xb8] sm:$0xff] }
  0x21   : > { %v2174_v41 = vld [vmem:[%s6136_s22 + $0x120] sm:$0xff]  ;;  %v2175_v42 = vld [vmem:[%s6136_s22 + $0x128] sm:$0xff]  ;;  %v2192_v45 = vld [vmem:[%s6136_s22 + $0x1b0] sm:$0xff]  ;;  %v5407_v48 = vpack.c.bf16 %v2143_v40, %v2142_v39  ;;  %v5410_v50 = vpack.c.bf16 %v2161_v44, %v2160_v43 }
  0x22   : > { %v2193_v46 = vld [vmem:[%s6136_s22 + $0x1b8] sm:$0xff]  ;;  %v5455_v49 = vpack.c.bf16 %v2175_v42, %v2174_v41  ;;  %v2144_v53 = vld [vmem:[%s6136_s22 + $0x30] sm:$0xff]  ;;  %v2162_v57 = vld [vmem:[%s6136_s22 + $0xc0] sm:$0xff] }
  0x23   : > { %v5458_v51 = vpack.c.bf16 %v2193_v46, %v2192_v45  ;;  %v2145_v54 = vld [vmem:[%s6136_s22 + $0x38] sm:$0xff]  ;;  %v2176_v55 = vld [vmem:[%s6136_s22 + $0x130] sm:$0xff]  ;;  %v2163_v58 = vld [vmem:[%s6136_s22 + $0xc8] sm:$0xff] }
  0x24   : > { %3803 = vperm.xlu0 %5872, %v3789_v38   ;;  %v2177_v56 = vld [vmem:[%s6136_s22 + $0x138] sm:$0xff]  ;;  %v2194_v59 = vld [vmem:[%s6136_s22 + $0x1c0] sm:$0xff]  ;;  %v2195_v60 = vld [vmem:[%s6136_s22 + $0x1c8] sm:$0xff]  ;;  %v5413_v62 = vpack.c.bf16 %v2145_v54, %v2144_v53  ;;  %v5416_v0 = vpack.c.bf16 %v2163_v58, %v2162_v57 }
  0x25   : > { %v5461_v63 = vpack.c.bf16 %v2177_v56, %v2176_v55  ;;  %v5464_v1 = vpack.c.bf16 %v2195_v60, %v2194_v59  ;;  %v2146_v2 = vld [vmem:[%s6136_s22 + $0x40] sm:$0xff]  ;;  %v2147_v4 = vld [vmem:[%s6136_s22 + $0x48] sm:$0xff]  ;;  %v2164_v8 = vld [vmem:[%s6136_s22 + $0xd0] sm:$0xff] }
  0x26   : > { %5403 = vmatpush3.bf16.xpose.msk.msra.mxu0 %vm6140_vm1, %v5401_v34  ;;  %v2178_v6 = vld [vmem:[%s6136_s22 + $0x140] sm:$0xff]  ;;  %v2179_v7 = vld [vmem:[%s6136_s22 + $0x148] sm:$0xff]  ;;  %v2165_v9 = vld [vmem:[%s6136_s22 + $0xd8] sm:$0xff]  ;;  %v5419_v12 = vpack.c.bf16 %v2147_v4, %v2146_v2 }
  0x27   : > { %5451 = vmatpush3.bf16.xpose.msk.msra.mxu1 %vm6140_vm1, %v5449_v35  ;;  %5406 = vmatprep.subr.msk.bf16.mxu0 %vm6140_vm1, %v5404_v36  ;;  %v2196_v10 = vld [vmem:[%s6136_s22 + $0x1d0] sm:$0xff]  ;;  %v2197_v11 = vld [vmem:[%s6136_s22 + $0x1d8] sm:$0xff]  ;;  %v5467_v13 = vpack.c.bf16 %v2179_v7, %v2178_v6  ;;  %v5422_v14 = vpack.c.bf16 %v2165_v9, %v2164_v8  ;;  %v2166_v20 = vld [vmem:[%s6136_s22 + $0xe0] sm:$0xff] }
  0x28   : > { %5454 = vmatprep.subr.msk.bf16.mxu1 %vm6140_vm1, %v5452_v37  ;;  %3813 = vperm.xlu0 %5872, %v3791_v47   ;;  %v5470_v15 = vpack.c.bf16 %v2197_v11, %v2196_v10  ;;  %v2148_v16 = vld [vmem:[%s6136_s22 + $0x50] sm:$0xff]  ;;  %v2149_v17 = vld [vmem:[%s6136_s22 + $0x58] sm:$0xff]  ;;  %v2167_v21 = vld [vmem:[%s6136_s22 + $0xe8] sm:$0xff] }
  0x29   : > { %v2180_v18 = vld [vmem:[%s6136_s22 + $0x150] sm:$0xff]  ;;  %v2181_v19 = vld [vmem:[%s6136_s22 + $0x158] sm:$0xff]  ;;  %v2198_v22 = vld [vmem:[%s6136_s22 + $0x1e0] sm:$0xff]  ;;  %v5425_v24 = vpack.c.bf16 %v2149_v17, %v2148_v16  ;;  %v5428_v26 = vpack.c.bf16 %v2167_v21, %v2166_v20 }
  0x2a   : > { %v2199_v23 = vld [vmem:[%s6136_s22 + $0x1e8] sm:$0xff]  ;;  %v5473_v25 = vpack.c.bf16 %v2181_v19, %v2180_v18  ;;  %v2150_v28 = vld [vmem:[%s6136_s22 + $0x60] sm:$0xff]  ;;  %v2168_v32 = vld [vmem:[%s6136_s22 + $0xf0] sm:$0xff] }
  0x2b   : > { %v5476_v27 = vpack.c.bf16 %v2199_v23, %v2198_v22  ;;  %v2151_v29 = vld [vmem:[%s6136_s22 + $0x68] sm:$0xff]  ;;  %v2182_v30 = vld [vmem:[%s6136_s22 + $0x160] sm:$0xff]  ;;  %v2169_v33 = vld [vmem:[%s6136_s22 + $0xf8] sm:$0xff] }
  0x2c   : > { %3823 = vperm.xlu0 %5872, %v3793_v52   ;;  %v2183_v31 = vld [vmem:[%s6136_s22 + $0x168] sm:$0xff]  ;;  %v2200_v34 = vld [vmem:[%s6136_s22 + $0x1f0] sm:$0xff]  ;;  %v2201_v35 = vld [vmem:[%s6136_s22 + $0x1f8] sm:$0xff]  ;;  %v5431_v36 = vpack.c.bf16 %v2151_v29, %v2150_v28  ;;  %v5434_v38 = vpack.c.bf16 %v2169_v33, %v2168_v32 }
  0x2d   : > { %v5479_v37 = vpack.c.bf16 %v2183_v31, %v2182_v30  ;;  %v5482_v39 = vpack.c.bf16 %v2201_v35, %v2200_v34  ;;  %v2152_v40 = vld [vmem:[%s6136_s22 + $0x70] sm:$0xff]  ;;  %v2153_v41 = vld [vmem:[%s6136_s22 + $0x78] sm:$0xff]  ;;  %v2218_v44 = vld [vmem:[%s6136_s22 + $0x280] sm:$0xff] }
  0x2e   : > { %5409 = vmatpush3.bf16.xpose.msk.msra.mxu0 %vm6140_vm1, %v5407_v48  ;;  %v2184_v42 = vld [vmem:[%s6136_s22 + $0x170] sm:$0xff]  ;;  %v2185_v43 = vld [vmem:[%s6136_s22 + $0x178] sm:$0xff]  ;;  %v2219_v45 = vld [vmem:[%s6136_s22 + $0x288] sm:$0xff]  ;;  %v5437_v48 = vpack.c.bf16 %v2153_v41, %v2152_v40 }
  0x2f   : > { %5457 = vmatpush3.bf16.xpose.msk.msra.mxu1 %vm6140_vm1, %v5455_v49  ;;  %5412 = vmatprep.subr.msk.bf16.mxu0 %vm6140_vm1, %v5410_v50  ;;  %v2250_v46 = vld [vmem:[%s6136_s22 + $0x380] sm:$0xff]  ;;  %v2251_v47 = vld [vmem:[%s6136_s22 + $0x388] sm:$0xff]  ;;  %v5485_v49 = vpack.c.bf16 %v2185_v43, %v2184_v42  ;;  %v5488_v50 = vpack.c.bf16 %v2219_v45, %v2218_v44  ;;  %v2220_v56 = vld [vmem:[%s6136_s22 + $0x290] sm:$0xff] }
  0x30   : > { %5460 = vmatprep.subr.msk.bf16.mxu1 %vm6140_vm1, %v5458_v51  ;;  %3833 = vperm.xlu0 %5872, %v3795_v61   ;;  %v5536_v51 = vpack.c.bf16 %v2251_v47, %v2250_v46  ;;  %v2202_v52 = vld [vmem:[%s6136_s22 + $0x200] sm:$0xff]  ;;  %v2203_v53 = vld [vmem:[%s6136_s22 + $0x208] sm:$0xff]  ;;  %v2221_v57 = vld [vmem:[%s6136_s22 + $0x298] sm:$0xff] }
  0x31   : > { %v2234_v54 = vld [vmem:[%s6136_s22 + $0x300] sm:$0xff]  ;;  %v2235_v55 = vld [vmem:[%s6136_s22 + $0x308] sm:$0xff]  ;;  %v2252_v58 = vld [vmem:[%s6136_s22 + $0x390] sm:$0xff]  ;;  %v5491_v60 = vpack.c.bf16 %v2203_v53, %v2202_v52 }
  0x32   : > { %v2253_v59 = vld [vmem:[%s6136_s22 + $0x398] sm:$0xff]  ;;  %v5539_v61 = vpack.c.bf16 %v2235_v55, %v2234_v54  ;;  %v2236_v4 = vld [vmem:[%s6136_s22 + $0x310] sm:$0xff]  ;;  %v2222_v8 = vld [vmem:[%s6136_s22 + $0x2a0] sm:$0xff] }
  0x33   : > { %v2205_v2 = vld [vmem:[%s6136_s22 + $0x218] sm:$0xff]  ;;  %v6327_v6 = vld [vmem:[%s8057_s4 + $0x10] sm:$0xff]  ;;  %v2223_v9 = vld [vmem:[%s6136_s22 + $0x2a8] sm:$0xff] }
  0x34   : > { %v2237_v7 = vld [vmem:[%s6136_s22 + $0x318] sm:$0xff]  ;;  %v2254_v10 = vld [vmem:[%s6136_s22 + $0x3a0] sm:$0xff]  ;;  %v2255_v11 = vld [vmem:[%s6136_s22 + $0x3a8] sm:$0xff] }
  0x35   : > { %v6353_v16 = vld [vmem:[%s8057_s4 + $0x18] sm:$0xff]  ;;  %v2206_v17 = vld [vmem:[%s6136_s22 + $0x220] sm:$0xff]  ;;  %v2207_v18 = vld [vmem:[%s6136_s22 + $0x228] sm:$0xff] }
  0x36   : > { %5415 = vmatpush3.bf16.xpose.msk.msra.mxu0 %vm6140_vm1, %v5413_v62  ;;  %v5494_v62 = vpack.c.bf16 %v2221_v57, %v2220_v56  ;;  %v2238_v19 = vld [vmem:[%s6136_s22 + $0x320] sm:$0xff]  ;;  %v2239_v21 = vld [vmem:[%s6136_s22 + $0x328] sm:$0xff]  ;;  %v2224_v22 = vld [vmem:[%s6136_s22 + $0x2b0] sm:$0xff] }
  0x37   : > { %5463 = vmatpush3.bf16.xpose.msk.msra.mxu1 %vm6140_vm1, %v5461_v63  ;;  %5418 = vmatprep.subr.msk.bf16.mxu0 %vm6140_vm1, %v5416_v0  ;;  %v5542_v63 = vpack.c.bf16 %v2253_v59, %v2252_v58  ;;  %v6311_v0 = vld [vmem:[%s8057_s4 + $0x8] sm:$0xff]  ;;  %v6369_v20 = vld [vmem:[%s8057_s4 + $0x20] sm:$0xff]  ;;  %v2225_v23 = vld [vmem:[%s6136_s22 + $0x2b8] sm:$0xff] }
  0x38   : > { %5466 = vmatprep.subr.msk.bf16.mxu1 %vm6140_vm1, %v5464_v1  ;;  %v2204_v1 = vld [vmem:[%s6136_s22 + $0x210] sm:$0xff]  ;;  %v5506_v28 = vpack.c.bf16 %v2225_v23, %v2224_v22  ;;  %v6395_v30 = vld [vmem:[%s8057_s4 + $0x28] sm:$0xff]  ;;  %v2209_v32 = vld [vmem:[%s6136_s22 + $0x238] sm:$0xff] }
  0x39   : > { %v2208_v31 = vld [vmem:[%s6136_s22 + $0x230] sm:$0xff]  ;;  %v2241_v35 = vld [vmem:[%s6136_s22 + $0x338] sm:$0xff]  ;;  %v2210_v45 = vld [vmem:[%s6136_s22 + $0x240] sm:$0xff] }
  0x3a   : > { %v2240_v33 = vld [vmem:[%s6136_s22 + $0x330] sm:$0xff]  ;;  %v5509_v40 = vpack.c.bf16 %v2209_v32, %v2208_v31  ;;  %v6437_v44 = vld [vmem:[%s8057_s4 + $0x38] sm:$0xff]  ;;  %v2211_v46 = vld [vmem:[%s6136_s22 + $0x248] sm:$0xff] }
  0x3b   : > { %v6411_v34 = vld [vmem:[%s8057_s4 + $0x30] sm:$0xff]  ;;  %v5557_v41 = vpack.c.bf16 %v2241_v35, %v2240_v33  ;;  %v2242_v47 = vld [vmem:[%s6136_s22 + $0x340] sm:$0xff]  ;;  %v2261_v52 = vld [vmem:[%s6136_s22 + $0x3d8] sm:$0xff]  ;;  %v5515_v53 = vpack.c.bf16 %v2211_v46, %v2210_v45 }
  0x3c   : > { %v2212_v57 = vld [vmem:[%s6136_s22 + $0x250] sm:$0xff]  ;;  %v2213_v58 = vld [vmem:[%s6136_s22 + $0x258] sm:$0xff] }
  0x3d   : > { %v2244_v59 = vld [vmem:[%s6136_s22 + $0x350] sm:$0xff]  ;;  %v2217_v35 = vld [vmem:[%s6136_s22 + $0x278] sm:$0xff] }
  0x3e   : > { %5421 = vmatpush3.bf16.xpose.msk.msra.mxu0 %vm6140_vm1, %v5419_v12  ;;  %v5497_v12 = vpack.c.bf16 %v2205_v2, %v2204_v1  ;;  %v2263_v1 = vld [vmem:[%s6136_s22 + $0x3e8] sm:$0xff]  ;;  %v362_v2 = vlaneseq  ;;  %v2216_v33 = vld [vmem:[%s6136_s22 + $0x270] sm:$0xff] }
  0x3f   : > { %5469 = vmatpush3.bf16.xpose.msk.msra.mxu1 %vm6140_vm1, %v5467_v13  ;;  %5424 = vmatprep.subr.msk.bf16.mxu0 %vm6140_vm1, %v5422_v14  ;;  %v5545_v13 = vpack.c.bf16 %v2237_v7, %v2236_v4  ;;  %v5500_v14 = vpack.c.bf16 %v2223_v9, %v2222_v8  ;;  %v5521_v4 = vpack.c.bf16 %v2213_v58, %v2212_v57  ;;  %v6513_v23 = vld [vmem:[%s6500_s21] ss:$4 sm:$0xff] }
  0x40   : > { %5472 = vmatprep.subr.msk.bf16.mxu1 %vm6140_vm1, %v5470_v15  ;;  %v5548_v15 = vpack.c.bf16 %v2255_v11, %v2254_v10  ;;  %v6486_v10 = vshrl.u32 %v362_v2, 7  ;;  %v2214_v11 = vld [vmem:[%s6136_s22 + $0x260] sm:$0xff] }
  0x42   : > { %v6575_v57 = vsub.s32 6, %v6486_v10  ;;  %v6589_v2 = vsub.s32 7, %v6486_v10 }
  0x46   : > { %5427 = vmatpush3.bf16.xpose.msk.msra.mxu0 %vm6140_vm1, %v5425_v24  ;;  %v2256_v24 = vld [vmem:[%s6136_s22 + $0x3b0] sm:$0xff] }
  0x47   : > { %5475 = vmatpush3.bf16.xpose.msk.msra.mxu1 %vm6140_vm1, %v5473_v25  ;;  %5430 = vmatprep.subr.msk.bf16.mxu0 %vm6140_vm1, %v5428_v26  ;;  %v2257_v25 = vld [vmem:[%s6136_s22 + $0x3b8] sm:$0xff]  ;;  %v5503_v26 = vpack.c.bf16 %v2207_v18, %v2206_v17  ;;  %v2264_v18 = vld [vmem:[%s6136_s22 + $0x3f0] sm:$0xff] }
  0x48   : > { %5478 = vmatprep.subr.msk.bf16.mxu1 %vm6140_vm1, %v5476_v27  ;;  %v5551_v27 = vpack.c.bf16 %v2239_v21, %v2238_v19  ;;  %v5554_v29 = vpack.c.bf16 %v2257_v25, %v2256_v24  ;;  %v2233_v17 = vld [vmem:[%s6136_s22 + $0x2f8] sm:$0xff]  ;;  %v6510_v21 = vsub.s32 0, %v6486_v10 }
  0x49   : > { %v2265_v19 = vld [vmem:[%s6136_s22 + $0x3f8] sm:$0xff] }
  0x4a   : > { %v6516_v24 = vld [vmem:[%s6500_s21 + $0x1] ss:$4 sm:$0xff]  ;;  %v365_v31 = vrot.slane %v6513_v23, %v6510_v21 }
  0x4b   : > { %v406_v32 = vrot.slane %v6516_v24, %v6510_v21 }
  0x4e   : > { %5433 = vmatpush3.bf16.xpose.msk.msra.mxu0 %vm6140_vm1, %v5431_v36  ;;  %v2226_v36 = vld [vmem:[%s6136_s22 + $0x2c0] sm:$0xff] }
  0x4f   : > { %5481 = vmatpush3.bf16.xpose.msk.msra.mxu1 %vm6140_vm1, %v5479_v37  ;;  %5436 = vmatprep.subr.msk.bf16.mxu0 %vm6140_vm1, %v5434_v38  ;;  %v2227_v37 = vld [vmem:[%s6136_s22 + $0x2c8] sm:$0xff]  ;;  %v2258_v38 = vld [vmem:[%s6136_s22 + $0x3c0] sm:$0xff] }
  0x50   : > { %5484 = vmatprep.subr.msk.bf16.mxu1 %vm6140_vm1, %v5482_v39  ;;  %v2259_v39 = vld [vmem:[%s6136_s22 + $0x3c8] sm:$0xff]  ;;  %v5512_v42 = vpack.c.bf16 %v2227_v37, %v2226_v36 }
  0x51   : > { %v5560_v43 = vpack.c.bf16 %v2259_v39, %v2258_v38  ;;  %v2248_v38 = vld [vmem:[%s6136_s22 + $0x370] sm:$0xff]  ;;  %v2249_v39 = vld [vmem:[%s6136_s22 + $0x378] sm:$0xff] }
  0x52   : > { %v5581_v45 = vpack.c.bf16 %v2249_v39, %v2248_v38 }
  0x56   : > { %5439 = vmatpush3.bf16.xpose.msk.msra.mxu0 %vm6140_vm1, %v5437_v48  ;;  %v2243_v48 = vld [vmem:[%s6136_s22 + $0x348] sm:$0xff] }
  0x57   : > { %5487 = vmatpush3.bf16.xpose.msk.msra.mxu1 %vm6140_vm1, %v5485_v49  ;;  %5490 = vmatprep.subr.msk.bf16.mxu0 %vm6140_vm1, %v5488_v50  ;;  %v2228_v49 = vld [vmem:[%s6136_s22 + $0x2d0] sm:$0xff]  ;;  %v2229_v50 = vld [vmem:[%s6136_s22 + $0x2d8] sm:$0xff]  ;;  %v5563_v54 = vpack.c.bf16 %v2243_v48, %v2242_v47 }
  0x58   : > { %5538 = vmatprep.subr.msk.bf16.mxu1 %vm6140_vm1, %v5536_v51  ;;  %v2260_v51 = vld [vmem:[%s6136_s22 + $0x3d0] sm:$0xff]  ;;  %v5518_v55 = vpack.c.bf16 %v2229_v50, %v2228_v49 }
  0x59   : > { %v5566_v56 = vpack.c.bf16 %v2261_v52, %v2260_v51  ;;  %v6562_v51 = vsub.s32 2, %v6486_v10 }
  0x5b   : > { %v414_v5 = vrot.slane %v6516_v24, %v6562_v51 }
  0x5d   : > { %5233 = vmatmul.mubr.msk.f32.vlgmr.msra.gmra.mrb[0].mxu0 %vm2266_vm0, %v6124_v3 }
  0x5e   : > { %5281 = vmatmul.mubr.msk.f32.vlgmr.msra.gmra.mrb[0].mxu1 %vm2266_vm0, %v6124_v3  ;;  %5493 = vmatpush3.bf16.xpose.msk.msra.mxu0 %vm6140_vm1, %v5491_v60  ;;  %v2245_v60 = vld [vmem:[%s6136_s22 + $0x358] sm:$0xff] }
  0x5f   : > { %5541 = vmatpush3.bf16.xpose.msk.msra.mxu1 %vm6140_vm1, %v5539_v61  ;;  %5496 = vmatprep.subr.msk.bf16.mxu0 %vm6140_vm1, %v5494_v62  ;;  %v2230_v61 = vld [vmem:[%s6136_s22 + $0x2e0] sm:$0xff]  ;;  %v2231_v62 = vld [vmem:[%s6136_s22 + $0x2e8] sm:$0xff]  ;;  %v5569_v7 = vpack.c.bf16 %v2245_v60, %v2244_v59  ;;  %v373_v60 = vrot.slane %v6513_v23, %v6562_v51 }
  0x60   : > { %5544 = vmatprep.subr.msk.bf16.mxu1 %vm6140_vm1, %v5542_v63  ;;  %5234 = vmatprep.mubr.msk.f32.mxu0 %vm2266_vm0, %v6311_v0  ;;  %v2262_v63 = vld [vmem:[%s6136_s22 + $0x3e0] sm:$0xff]  ;;  %v5524_v8 = vpack.c.bf16 %v2231_v62, %v2230_v61 }
  0x61   : > { %5282 = vmatprep.mubr.msk.f32.mxu1 %vm2266_vm0, %v6311_v0  ;;  %5235 = vmatmul.mubr.msk.f32.gmra.mrb[2].mxu0 %vm2266_vm0, %v6311_v0  ;;  %v5572_v9 = vpack.c.bf16 %v2263_v1, %v2262_v63  ;;  %v6584_v1 = vsub.s32 5, %v6486_v10 }
  0x62   : > { %5283 = vmatmul.mubr.msk.f32.gmra.mrb[2].mxu1 %vm2266_vm0, %v6311_v0  ;;  %5236 = vmatprep.mubr.msk.f32.mxu0 %vm2266_vm0, %v6327_v6 }
  0x63   : > { %5284 = vmatprep.mubr.msk.f32.mxu1 %vm2266_vm0, %v6327_v6 }
  0x65   : > { %5237 = vmatmul.mubr.msk.f32.gmra.mrb[4].mxu0 %vm2266_vm0, %v6327_v6 }
  0x66   : > { %5499 = vmatpush3.bf16.xpose.msk.msra.mxu0 %vm6140_vm1, %v5497_v12  ;;  %5285 = vmatmul.mubr.msk.f32.gmra.mrb[4].mxu1 %vm2266_vm0, %v6327_v6  ;;  %v2215_v12 = vld [vmem:[%s6136_s22 + $0x268] sm:$0xff] }
  0x67   : > { %5547 = vmatpush3.bf16.xpose.msk.msra.mxu1 %vm6140_vm1, %v5545_v13  ;;  %5502 = vmatprep.subr.msk.bf16.mxu0 %vm6140_vm1, %v5500_v14  ;;  %v2246_v13 = vld [vmem:[%s6136_s22 + $0x360] sm:$0xff]  ;;  %v2247_v14 = vld [vmem:[%s6136_s22 + $0x368] sm:$0xff]  ;;  %v5527_v22 = vpack.c.bf16 %v2215_v12, %v2214_v11  ;;  %v430_v11 = vrot.slane %v6516_v24, %v6575_v57  ;;  %v446_v12 = vsel %vm443_vm2, %v373_v60, %v414_v5 }
  0x68   : > { %5550 = vmatprep.subr.msk.bf16.mxu1 %vm6140_vm1, %v5548_v15  ;;  %5238 = vmatprep.mubr.msk.f32.mxu0 %vm2266_vm0, %v6353_v16  ;;  %v2232_v15 = vld [vmem:[%s6136_s22 + $0x2f0] sm:$0xff]  ;;  %v5575_v25 = vpack.c.bf16 %v2247_v14, %v2246_v13  ;;  %s8011_s22 = scalar_lea.hbm %s8062_s9, %s6114_s23 }
  0x69   : > { %5286 = vmatprep.mubr.msk.f32.mxu1 %vm2266_vm0, %v6353_v16  ;;  %5239 = vmatmul.mubr.msk.f32.gmra.mrb[6].mxu0 %vm2266_vm0, %v6353_v16 }
  0x6a   : > { %5287 = vmatmul.mubr.msk.f32.gmra.mrb[6].mxu1 %vm2266_vm0, %v6353_v16  ;;  %5240 = vmatprep.mubr.msk.f32.mxu0 %vm2266_vm0, %v6369_v20 }
  0x6b   : > { %5288 = vmatprep.mubr.msk.f32.mxu1 %vm2266_vm0, %v6369_v20 }
  0x6d   : > { %5241 = vmatmul.mubr.msk.f32.gmra.mrb[8].mxu0 %vm2266_vm0, %v6369_v20 }
  0x6e   : > { %5505 = vmatpush3.bf16.xpose.msk.msra.mxu0 %vm6140_vm1, %v5503_v26  ;;  %5289 = vmatmul.mubr.msk.f32.gmra.mrb[8].mxu1 %vm2266_vm0, %v6369_v20  ;;  %v5530_v26 = vpack.c.bf16 %v2233_v17, %v2232_v15  ;;  %v426_v17 = vrot.slane %v6516_v24, %v6584_v1 }
  0x6f   : > { %5553 = vmatpush3.bf16.xpose.msk.msra.mxu1 %vm6140_vm1, %v5551_v27  ;;  %5508 = vmatprep.subr.msk.bf16.mxu0 %vm6140_vm1, %v5506_v28  ;;  %v6519_v27 = vsub.s32 1, %v6486_v10  ;;  %v5578_v28 = vpack.c.bf16 %v2265_v19, %v2264_v18  ;;  %v393_v18 = vrot.slane %v6513_v23, %v6589_v2  ;;  %v434_v19 = vrot.slane %v6516_v24, %v6589_v2 }
  0x70   : > { %5556 = vmatprep.subr.msk.bf16.mxu1 %vm6140_vm1, %v5554_v29  ;;  %5242 = vmatprep.mubr.msk.f32.mxu0 %vm2266_vm0, %v6395_v30  ;;  %v6522_v29 = vsub.s32 3, %v6486_v10 }
  0x71   : > { %5290 = vmatprep.mubr.msk.f32.mxu1 %vm2266_vm0, %v6395_v30  ;;  %5243 = vmatmul.mubr.msk.f32.gmra.mrb[10].mxu0 %vm2266_vm0, %v6395_v30  ;;  %v369_v36 = vrot.slane %v6513_v23, %v6519_v27  ;;  %v410_v37 = vrot.slane %v6516_v24, %v6519_v27 }
  0x72   : > { %5291 = vmatmul.mubr.msk.f32.gmra.mrb[10].mxu1 %vm2266_vm0, %v6395_v30  ;;  %5244 = vmatprep.mubr.msk.f32.mxu0 %vm2266_vm0, %v6411_v34 }
  0x73   : > { %5292 = vmatprep.mubr.msk.f32.mxu1 %vm2266_vm0, %v6411_v34  ;;  %v445_v46 = vsel %vm443_vm2, %v369_v36, %v410_v37 }
  0x75   : > { %5245 = vmatmul.mubr.msk.f32.gmra.mrb[12].mxu0 %vm2266_vm0, %v6411_v34 }
  0x76   : > { %5511 = vmatpush3.bf16.xpose.msk.msra.mxu0 %vm6140_vm1, %v5509_v40  ;;  %5293 = vmatmul.mubr.msk.f32.gmra.mrb[12].mxu1 %vm2266_vm0, %v6411_v34  ;;  %v377_v40 = vrot.slane %v6513_v23, %v6522_v29 }
  0x77   : > { %5559 = vmatpush3.bf16.xpose.msk.msra.mxu1 %vm6140_vm1, %v5557_v41  ;;  %5514 = vmatprep.subr.msk.bf16.mxu0 %vm6140_vm1, %v5512_v42  ;;  %v418_v41 = vrot.slane %v6516_v24, %v6522_v29  ;;  %v444_v42 = vsel %vm443_vm2, %v365_v31, %v406_v32 }
  0x78   : > { %5562 = vmatprep.subr.msk.bf16.mxu1 %vm6140_vm1, %v5560_v43  ;;  %5246 = vmatprep.mubr.msk.f32.mxu0 %vm2266_vm0, %v6437_v44  ;;  %v5533_v43 = vpack.c.bf16 %v2217_v35, %v2216_v33  ;;  %v6640_v35 = vsel %vm443_vm2, %v393_v18, %v434_v19 }
  0x79   : > { %5294 = vmatprep.mubr.msk.f32.mxu1 %vm2266_vm0, %v6437_v44  ;;  %5247 = vmatmul.mubr.msk.f32.gmra.mrb[14].mxu0 %vm2266_vm0, %v6437_v44  ;;  %v447_v49 = vsel %vm443_vm2, %v377_v40, %v418_v41 }
  0x7a   : > { %5295 = vmatmul.mubr.msk.f32.gmra.mrb[14].mxu1 %vm2266_vm0, %v6437_v44  ;;  %5328 = vmatprep.mubr.msk.f32.mxu0 %vm2266_vm0, %v6124_v3 }
  0x7b   : > { %5376 = vmatprep.mubr.msk.f32.mxu1 %vm2266_vm0, %v6124_v3 }
  0x7e   : > { %5517 = vmatpush3.bf16.xpose.msk.msra.mxu0 %vm6140_vm1, %v5515_v53 }
  0x7f   : > { %5565 = vmatpush3.bf16.xpose.msk.msra.mxu1 %vm6140_vm1, %v5563_v54  ;;  %5520 = vmatprep.subr.msk.bf16.mxu0 %vm6140_vm1, %v5518_v55 }
  0x80   : > { %5568 = vmatprep.subr.msk.bf16.mxu1 %vm6140_vm1, %v5566_v56  ;;  %v6572_v56 = vsub.s32 4, %v6486_v10 }
  0x86   : > { %5523 = vmatpush3.bf16.xpose.msk.msra.mxu0 %vm6140_vm1, %v5521_v4  ;;  %v381_v4 = vrot.slane %v6513_v23, %v6572_v56 }
  0x87   : > { %5571 = vmatpush3.bf16.xpose.msk.msra.mxu1 %vm6140_vm1, %v5569_v7  ;;  %5526 = vmatprep.subr.msk.bf16.mxu0 %vm6140_vm1, %v5524_v8  ;;  %v389_v7 = vrot.slane %v6513_v23, %v6575_v57  ;;  %v422_v8 = vrot.slane %v6516_v24, %v6572_v56 }
  0x88   : > { %5574 = vmatprep.subr.msk.bf16.mxu1 %vm6140_vm1, %v5572_v9 }
  0x8e   : > { %5529 = vmatpush3.bf16.xpose.msk.msra.mxu0 %vm6140_vm1, %v5527_v22  ;;  %v6550_v47 = vpop.permute.xlu0 %455  ;;  %v448_v22 = vsel %vm443_vm2, %v381_v4, %v422_v8 }
  0x8f   : > { %5577 = vmatpush3.bf16.xpose.msk.msra.mxu1 %vm6140_vm1, %v5575_v25  ;;  %5532 = vmatprep.subr.msk.bf16.mxu0 %vm6140_vm1, %v5530_v26  ;;  %v6553_v48 = vmul.f32 %v6550_v47, %v444_v42  ;;  %v6559_v50 = vmul.f32 %v6550_v47, %v445_v46  ;;  %v6569_v54 = vmul.f32 %v6550_v47, %v447_v49  ;;  %v6003_v42 = vmov 683565275  }
  0x90   : > { %5580 = vmatprep.subr.msk.bf16.mxu1 %vm6140_vm1, %v5578_v28  ;;  %v6620_v25 = vmul.f32 %v6550_v47, %v446_v12  ;;  %v450_v28 = vsel %vm443_vm2, %v389_v7, %v430_v11  ;;  %v6633_v32 = vmul.f32 %v6550_v47, %v448_v22  ;;  %v6004_v46 = vmov 2475754826  }
  0x91   : > { %v469_v52 = vand.u32 2139095040, %v6553_v48  ;;  %v573_v53 = vand.u32 2139095040, %v6559_v50  ;;  %v570_v58 = vand.u32 2147483647, %v6559_v50  ;;  %v781_v63 = vand.u32 2139095040, %v6569_v54 }
  0x92   : > { %v6643_v36 = vmul.f32 %v6550_v47, %v450_v28  ;;  %v677_v37 = vand.u32 2139095040, %v6620_v25  ;;  %v778_v39 = vand.u32 2147483647, %v6569_v54  ;;  %v6005_v49 = vmov 2131351028  }
  0x93   : > { %v470_v55 = vshrl.u32 %v469_v52, 23  ;;  %v574_v59 = vshrl.u32 %v573_v53, 23  ;;  %v577_v9 = vand.u32 8388607, %v570_v58  ;;  %v782_v14 = vshrl.u32 %v781_v63, 23 }
  0x94   : > { %v6006_v53 = vmov 2102212464   ;;  %v6008_v7 = vmov 1326507024   ;;  %v785_v28 = vand.u32 8388607, %v778_v39 }
  0x95   : > { %v4902_v61 = vadd.s32 4294967169, %v470_v55  ;;  %v4906_v62 = vadd.s32 4294967169, %v574_v59  ;;  %v578_v26 = vor.u32 8388608, %v577_v9  ;;  %v6007_v59 = vmov 920167782  }
  0x96   : > { %5535 = vmatpush3.bf16.xpose.msk.msra.mxu0 %vm6140_vm1, %v5533_v43 }
  0x97   : > { %5583 = vmatpush3.bf16.xpose.msk.msra.mxu1 %vm6140_vm1, %v5581_v45  ;;  %v580_v13 = vadd.s32 1, %v4906_v62  ;;  %v476_v15 = vadd.s32 1, %v4902_v61  ;;  %v6650_v38 = vshll.u32 %v578_v26, 8 }
  0x99   : > { %vm581_vm3 = vcmp.gt.s32.totalorder %v580_v13, 0  ;;  %vm477_vm4 = vcmp.gt.s32.totalorder %v476_v15, 0 }
  0x9a   : > { %v582_v24 = vsel %vm581_vm3, %v580_v13, 0  ;;  %v6653_v40 = vsel %vm477_vm4, %v476_v15, 0 }
  0x9b   : > { %v584_v33 = vand.u32 31, %v582_v24 }
  0x9d   : > { %5329 = vmatmul.mubr.msk.f32.vlgmr.msra.gmra.mrb[16].mxu0 %vm2266_vm0, %v6124_v3  ;;  %v585_v41 = vsub.s32 32, %v584_v33  ;;  %v587_v43 = vshll.u32 %v6003_v42, %v584_v33  ;;  %v593_v52 = vshll.u32 %v6005_v49, %v584_v33  ;;  %v596_v55 = vshll.u32 %v6006_v53, %v584_v33 }
  0x9e   : > { %5377 = vmatmul.mubr.msk.f32.vlgmr.msra.gmra.mrb[16].mxu1 %vm2266_vm0, %v6124_v3  ;;  %5330 = vmatprep.mubr.msk.f32.mxu0 %vm2266_vm0, %v6311_v0  ;;  %v385_v3 = vrot.slane %v6513_v23, %v6584_v1  ;;  %v4914_v23 = vadd.s32 4294967169, %v782_v14  ;;  %v599_v60 = vshll.u32 %v6007_v59, %v584_v33 }
  0x9f   : > { %5378 = vmatprep.mubr.msk.f32.mxu1 %vm2266_vm0, %v6311_v0  ;;  %v588_v5 = vshrl.u32 %v6004_v46, %v585_v41  ;;  %v591_v61 = vshrl.u32 %v6005_v49, %v585_v41  ;;  %v594_v62 = vshrl.u32 %v6006_v53, %v585_v41  ;;  %v586_v63 = vshrl.u32 %v6003_v42, %v585_v41 }
  0xa0   : > { %v6630_v31 = vsel %vm443_vm2, %v385_v3, %v426_v17  ;;  %v788_v45 = vadd.s32 1, %v4914_v23  ;;  %v597_v4 = vshrl.u32 %v6007_v59, %v585_v41  ;;  %v600_v8 = vshrl.u32 %v6008_v7, %v585_v41 }
  0xa1   : > { %5331 = vmatmul.mubr.msk.f32.gmra.mrb[18].mxu0 %vm2266_vm0, %v6311_v0  ;;  %v589_v9 = vor.u32 %v588_v5, %v587_v43  ;;  %v595_v12 = vor.u32 %v594_v62, %v593_v52  ;;  %v678_v5 = vshrl.u32 %v677_v37, 23 }
  0xa2   : > { %5379 = vmatmul.mubr.msk.f32.gmra.mrb[18].mxu1 %vm2266_vm0, %v6311_v0  ;;  %5332 = vmatprep.mubr.msk.f32.mxu0 %vm2266_vm0, %v6327_v6  ;;  %v6637_v0 = vshrl.u32 %v582_v24, 5  ;;  %vm789_vm7 = vcmp.gt.s32.totalorder %v788_v45, 0  ;;  %v601_v13 = vor.u32 %v600_v8, %v599_v60 }
  0xa3   : > { %5380 = vmatprep.mubr.msk.f32.mxu1 %vm2266_vm0, %v6327_v6  ;;  %v790_v14 = vsel %vm789_vm7, %v788_v45, 0  ;;  %vm6865_vm7 = vcmp.le.f32.partialorder %v570_v58, 0.7853982 }
  0xa4   : > { %vm602_vm5 = vcmp.lt.s32.totalorder %v6637_v0, 1  ;;  %vm604_vm6 = vcmp.lt.s32.totalorder %v6637_v0, 3  ;;  %vm605_vm8 = vcmp.lt.s32.totalorder %v6637_v0, 4  ;;  %vm603_vm9 = vcmp.lt.s32.totalorder %v6637_v0, 2 }
  0xa5   : > { %5333 = vmatmul.mubr.msk.f32.gmra.mrb[20].mxu0 %vm2266_vm0, %v6327_v6  ;;  %v606_v15 = vsel %vm602_vm5, %v586_v63, %v589_v9  ;;  %v607_v3 = vsel %vm605_vm8, %v595_v12, 2102212464  ;;  %v615_v26 = vsel %vm605_vm8, %v601_v13, 1326507024  ;;  %v792_v24 = vand.u32 31, %v790_v14 }
  0xa6   : > { %5381 = vmatmul.mubr.msk.f32.gmra.mrb[20].mxu1 %vm2266_vm0, %v6327_v6  ;;  %5334 = vmatprep.mubr.msk.f32.mxu0 %vm2266_vm0, %v6353_v16  ;;  %v590_v6 = vshll.u32 %v6004_v46, %v584_v33  ;;  %v885_v33 = vand.u32 2139095040, %v6633_v32  ;;  %v6715_v0 = vand.u32 31, %v6653_v40 }
  0xa7   : > { %5382 = vmatprep.mubr.msk.f32.mxu1 %vm2266_vm0, %v6353_v16  ;;  %v793_v62 = vsub.s32 32, %v792_v24  ;;  %v795_v8 = vshll.u32 %v6003_v42, %v792_v24 }
  0xa8   : > { %v592_v11 = vor.u32 %v591_v61, %v590_v6  ;;  %v6723_v61 = vshrl.u32 %v790_v14, 5 }
  0xa9   : > { %5335 = vmatmul.mubr.msk.f32.gmra.mrb[22].mxu0 %vm2266_vm0, %v6353_v16  ;;  %v796_v37 = vshrl.u32 %v6004_v46, %v793_v62  ;;  %v805_v13 = vshrl.u32 %v6007_v59, %v793_v62 }
  0xaa   : > { %5383 = vmatmul.mubr.msk.f32.gmra.mrb[22].mxu1 %vm2266_vm0, %v6353_v16  ;;  %5336 = vmatprep.mubr.msk.f32.mxu0 %vm2266_vm0, %v6369_v20  ;;  %v598_v16 = vor.u32 %v597_v4, %v596_v55  ;;  %v610_v17 = vsel %vm602_vm5, %v589_v9, %v592_v11  ;;  %v614_v18 = vsel %vm602_vm5, %v592_v11, %v595_v12  ;;  %v786_v4 = vor.u32 8388608, %v785_v28 }
  0xab   : > { %5384 = vmatprep.mubr.msk.f32.mxu1 %vm2266_vm0, %v6369_v20  ;;  %v608_v19 = vsel %vm604_vm6, %v592_v11, %v607_v3  ;;  %v798_v9 = vshll.u32 %v6004_v46, %v792_v24  ;;  %v801_v11 = vshll.u32 %v6005_v49, %v792_v24  ;;  %v797_v14 = vor.u32 %v796_v37, %v795_v8 }
  0xac   : > { %v611_v22 = vsel %vm605_vm8, %v598_v16, 920167782  ;;  %v609_v41 = vsel %vm603_vm9, %v606_v15, %v608_v19  ;;  %vm810_vm11 = vcmp.lt.s32.totalorder %v6723_v61, 1  ;;  %v807_v19 = vshll.u32 %v6007_v59, %v792_v24 }
  0xad   : > { %5337 = vmatmul.mubr.msk.f32.gmra.mrb[24].mxu0 %vm2266_vm0, %v6369_v20  ;;  %v612_v23 = vsel %vm604_vm6, %v595_v12, %v611_v22  ;;  %v625_v63 = vmul.u32 %v6650_v38, %v609_v41  ;;  %v802_v12 = vshrl.u32 %v6006_v53, %v793_v62  ;;  %v808_v22 = vshrl.u32 %v6008_v7, %v793_v62 }
  0xae   : > { %5385 = vmatmul.mubr.msk.f32.gmra.mrb[24].mxu1 %vm2266_vm0, %v6369_v20  ;;  %5338 = vmatprep.mubr.msk.f32.mxu0 %vm2266_vm0, %v6395_v30  ;;  %v616_v20 = vsel %vm604_vm6, %v598_v16, %v615_v26  ;;  %v613_v43 = vsel %vm603_vm9, %v610_v17, %v612_v23  ;;  %v804_v16 = vshll.u32 %v6006_v53, %v792_v24  ;;  %vm813_vm12 = vcmp.lt.s32.totalorder %v6723_v61, 4 }
  0xaf   : > { %5386 = vmatprep.mubr.msk.f32.mxu1 %vm2266_vm0, %v6395_v30  ;;  %v617_v45 = vsel %vm603_vm9, %v614_v18, %v616_v20  ;;  %v6710_v55 = vmul.u32.u64.low %v6650_v38, %v613_v43  ;;  %v6711_v60 = vmul.u32.u64.high %v6650_v38, %v613_v43, %v6710_v55  ;;  %v803_v3 = vor.u32 %v802_v12, %v801_v11 }
  0xb0   : > { %v6706_v6 = vmul.u32.u64.low %v6650_v38, %v617_v45  ;;  %v6707_v52 = vmul.u32.u64.high %v6650_v38, %v617_v45, %v6706_v6  ;;  %v806_v18 = vor.u32 %v805_v13, %v804_v16  ;;  %v8063_v28 = vand.u32 2147483647, %v6553_v48 }
  0xb1   : > { %5339 = vmatmul.mubr.msk.f32.gmra.mrb[26].mxu0 %vm2266_vm0, %v6395_v30  ;;  %v628_v38 = vadd.s32 1, %v6711_v60  ;;  %v809_v23 = vor.u32 %v808_v22, %v807_v19  ;;  %vm812_vm13 = vcmp.lt.s32.totalorder %v6723_v61, 3  ;;  %v826_v41 = vshll.u32 %v786_v4, 8 }
  0xb2   : > { %5387 = vmatmul.mubr.msk.f32.gmra.mrb[26].mxu1 %vm2266_vm0, %v6395_v30  ;;  %5340 = vmatprep.mubr.msk.f32.mxu0 %vm2266_vm0, %v6411_v34  ;;  %v799_v30 = vshrl.u32 %v6005_v49, %v793_v62  ;;  %vm627_vm10 = vc.u32 %v6707_v52, %v6710_v55  ;;  %v819_v20 = vsel %vm813_vm12, %v806_v18, 920167782  ;;  %vm811_vm14 = vcmp.lt.s32.totalorder %v6723_v61, 2 }
  0xb3   : > { %5388 = vmatprep.mubr.msk.f32.mxu1 %vm2266_vm0, %v6411_v34  ;;  %v629_v17 = vsel %vm627_vm10, %v628_v38, %v6711_v60  ;;  %v820_v43 = vsel %vm812_vm13, %v803_v3, %v819_v20  ;;  %v815_v6 = vsel %vm813_vm12, %v803_v3, 2102212464  ;;  %v481_v8 = vsub.s32 32, %v6715_v0 }
  0xb4   : > { %v800_v15 = vor.u32 %v799_v30, %v798_v9  ;;  %v630_v26 = vadd.s32 %v629_v17, %v625_v63  ;;  %v823_v63 = vsel %vm813_vm12, %v809_v23, 1326507024  ;;  %v4910_v30 = vadd.s32 4294967169, %v678_v5 }
  0xb5   : > { %5341 = vmatmul.mubr.msk.f32.gmra.mrb[28].mxu0 %vm2266_vm0, %v6411_v34  ;;  %v1093_v11 = vand.u32 2139095040, %v6643_v36  ;;  %v794_v12 = vshrl.u32 %v6003_v42, %v793_v62  ;;  %v6781_v16 = vshrl.u32 %v6653_v40, 5  ;;  %v484_v19 = vshrl.u32 %v6004_v46, %v481_v8 }
  0xb6   : > { %5389 = vmatmul.mubr.msk.f32.gmra.mrb[28].mxu1 %vm2266_vm0, %v6411_v34  ;;  %5342 = vmatprep.mubr.msk.f32.mxu0 %vm2266_vm0, %v6437_v44  ;;  %v818_v34 = vsel %vm810_vm11, %v797_v14, %v800_v15  ;;  %v631_v24 = vadd.s32 536870912, %v630_v26  ;;  %v822_v45 = vsel %vm810_vm11, %v800_v15, %v803_v3  ;;  %v816_v5 = vsel %vm812_vm13, %v800_v15, %v815_v6 }
  0xb7   : > { %5390 = vmatprep.mubr.msk.f32.mxu1 %vm2266_vm0, %v6437_v44  ;;  %v821_v60 = vsel %vm811_vm14, %v818_v34, %v820_v43  ;;  %v487_v62 = vshrl.u32 %v6005_v49, %v481_v8  ;;  %v473_v40 = vand.u32 8388607, %v8063_v28  ;;  %v490_v34 = vshrl.u32 %v6006_v53, %v481_v8 }
  0xb8   : > { %v6768_v4 = vshrl.u32 %v631_v24, 30  ;;  %v6772_v9 = vmul.u32.u64.low %v826_v41, %v821_v60  ;;  %v6773_v37 = vmul.u32.u64.high %v826_v41, %v821_v60, %v6772_v9  ;;  %v493_v23 = vshrl.u32 %v6007_v59, %v481_v8 }
  0xb9   : > { %5343 = vmatmul.mubr.msk.f32.gmra.mrb[30].mxu0 %vm2266_vm0, %v6437_v44  ;;  %v486_v15 = vshll.u32 %v6004_v46, %v6715_v0  ;;  %v496_v24 = vshrl.u32 %v6008_v7, %v481_v8  ;;  %v492_v6 = vshll.u32 %v6006_v53, %v6715_v0  ;;  %vm498_vm1 = vcmp.lt.s32.totalorder %v6781_v16, 1 }
  0xba   : > { %5391 = vmatmul.mubr.msk.f32.gmra.mrb[30].mxu1 %vm2266_vm0, %v6437_v44  ;;  %v824_v44 = vsel %vm812_vm13, %v806_v18, %v823_v63  ;;  %v633_v13 = vshll.u32 %v6768_v4, 30  ;;  %v814_v18 = vsel %vm810_vm11, %v794_v12, %v797_v14  ;;  %v836_v20 = vadd.s32 1, %v6773_v37 }
  0xbb   : > { %v825_v38 = vsel %vm811_vm14, %v822_v45, %v824_v44  ;;  %v483_v14 = vshll.u32 %v6003_v42, %v6715_v0  ;;  %v817_v43 = vsel %vm811_vm14, %v814_v18, %v816_v5  ;;  %v489_v45 = vshll.u32 %v6005_v49, %v6715_v0 }
  0xbc   : > { %v6784_v3 = vmul.u32.u64.low %v826_v41, %v825_v38  ;;  %v6785_v17 = vmul.u32.u64.high %v826_v41, %v825_v38, %v6784_v3  ;;  %v6793_v22 = vsub.s32 %v630_v26, %v633_v13  ;;  %v488_v63 = vor.u32 %v487_v62, %v486_v15 }
  0xbd   : > { %v485_v60 = vor.u32 %v484_v19, %v483_v14  ;;  %v495_v44 = vshll.u32 %v6007_v59, %v6715_v0  ;;  %v684_v12 = vadd.s32 1, %v4910_v30  ;;  %v491_v13 = vor.u32 %v490_v34, %v489_v45 }
  0xbe   : > { %v636_v26 = vsub.s32 0, %v6793_v22  ;;  %vm835_vm15 = vc.u32 %v6785_v17, %v6772_v9  ;;  %v494_v61 = vor.u32 %v493_v23, %v492_v6  ;;  %v833_v3 = vmul.u32 %v826_v41, %v817_v43 }
  0xbf   : > { %v837_v18 = vsel %vm835_vm15, %v836_v20, %v6773_v37  ;;  %v482_v5 = vshrl.u32 %v6003_v42, %v481_v8  ;;  %v497_v28 = vor.u32 %v496_v24, %v495_v44  ;;  %vm572_vm0 = vcmp.lt.s32.totalorder %v6559_v50, 0 }
  0xc0   : > { %v4907_v38 = vmin.u32 %v636_v26, %v6793_v22  ;;  %v626_v19 = vadd.s32 %v6710_v55, %v6707_v52  ;;  %v474_v14 = vor.u32 8388608, %v473_v40  ;;  %v838_v0 = vadd.s32 %v837_v18, %v833_v3 }
  0xc1   : > { %vm499_vm2 = vcmp.lt.s32.totalorder %v6781_v16, 2  ;;  %vm501_vm3 = vcmp.lt.s32.totalorder %v6781_v16, 4  ;;  %v506_v41 = vsel %vm498_vm1, %v485_v60, %v488_v63  ;;  %vm500_vm4 = vcmp.lt.s32.totalorder %v6781_v16, 3 }
  0xc2   : > { %v638_v62 = vclz %v4907_v38  ;;  %v507_v8 = vsel %vm501_vm3, %v494_v61, 920167782  ;;  %v510_v30 = vsel %vm498_vm1, %v488_v63, %v491_v13  ;;  %v839_v52 = vadd.s32 536870912, %v838_v0 }
  0xc3   : > { %v503_v55 = vsel %vm501_vm3, %v491_v13, 2102212464  ;;  %v508_v40 = vsel %vm500_vm4, %v491_v13, %v507_v8  ;;  %v511_v34 = vsel %vm501_vm3, %v497_v28, 1326507024  ;;  %v656_v23 = vsub.s32 4, %v6768_v4 }
  0xc4   : > { %v4908_v37 = vadd.s32 4294967294, %v638_v62  ;;  %v509_v20 = vsel %vm499_vm2, %v506_v41, %v508_v40  ;;  %v512_v15 = vsel %vm500_vm4, %v494_v61, %v511_v34  ;;  %v840_v26 = vshrl.u32 %v839_v52, 30 }
  0xc5   : > { %v513_v43 = vsel %vm499_vm2, %v510_v30, %v512_v15  ;;  %v514_v45 = vshll.u32 %v474_v14, 8  ;;  %v502_v28 = vsel %vm498_vm1, %v482_v5, %v485_v60  ;;  %v504_v38 = vsel %vm500_vm4, %v488_v63, %v503_v55 }
  0xc6   : > { %vm4909_vm5 = vcmp.lt.s32.totalorder %v4908_v37, 0  ;;  %v841_v3 = vshll.u32 %v840_v26, 30  ;;  %v886_v14 = vshrl.u32 %v885_v33, 23  ;;  %v657_v60 = vsel %vm572_vm0, %v656_v23, %v6768_v4 }
  0xc7   : > { %v641_v24 = vsel %vm4909_vm5, 0, %v4908_v37  ;;  %v6844_v18 = vmul.u32.u64.low %v514_v45, %v513_v43  ;;  %v6845_v62 = vmul.u32.u64.high %v514_v45, %v513_v43, %v6844_v18  ;;  %vm685_vm6 = vcmp.gt.s32.totalorder %v684_v12, 0 }
  0xc8   : > { %v642_v6 = vsub.s32 32, %v641_v24  ;;  %v646_v44 = vsub.s32 4294967266, %v641_v24  ;;  %v643_v13 = vshll.u32 %v6793_v22, %v641_v24  ;;  %v6855_v5 = vsub.s32 %v838_v0, %v841_v3 }
  0xc9   : > { %v6847_v37 = vmul.u32.u64.low %v514_v45, %v509_v20  ;;  %v6848_v8 = vmul.u32.u64.high %v514_v45, %v509_v20, %v6847_v37  ;;  %v6859_v22 = vmul.f32 %v6550_v47, %v6630_v31  ;;  %v1094_v63 = vshrl.u32 %v1093_v11, 23 }
  0xca   : > { %v644_v61 = vshrl.u32 %v626_v19, %v642_v6  ;;  %v647_v41 = vadd.s32 127, %v646_v44  ;;  %v844_v4 = vsub.s32 0, %v6855_v5  ;;  %v864_v0 = vsub.s32 4, %v840_v26 }
  0xcb   : > { %v505_v52 = vsel %vm499_vm2, %v502_v28, %v504_v38  ;;  %v659_v55 = vsel %vm6865_vm7, 0, %v657_v60  ;;  %vm523_vm8 = vc.u32 %v6845_v62, %v6847_v37  ;;  %v524_v11 = vadd.s32 1, %v6848_v8 }
  0xcc   : > { %v645_v19 = vor.u32 %v644_v61, %v643_v13  ;;  %v648_v30 = vshll.u32 %v647_v41, 23  ;;  %v686_v40 = vsel %vm685_vm6, %v684_v12, 0  ;;  %v4918_v34 = vadd.s32 4294967169, %v886_v14 }
  0xcd   : > { %vm780_vm9 = vcmp.lt.s32.totalorder %v6569_v54, 0  ;;  %v4915_v58 = vmin.u32 %v844_v4, %v6855_v5  ;;  %v521_v15 = vmul.u32 %v514_v45, %v505_v52  ;;  %v525_v16 = vsel %vm523_vm8, %v524_v11, %v6848_v8 }
  0xce   : > { %v649_v31 = vor.u32 4788187, %v648_v30  ;;  %v652_v20 = vcvt.s32.f32 %v645_v19  ;;  %v663_v24 = vadd.s32 3, %v659_v55  ;;  %v865_v6 = vsel %vm780_vm9, %v864_v0, %v840_v26 }
  0xcf   : > { %v846_v43 = vclz %v4915_v58  ;;  %v6883_v44 = vmul.f32 %v6550_v47, %v6640_v35  ;;  %v688_v12 = vand.u32 31, %v686_v40  ;;  %v6885_v28 = vadd.s32 4294967169, %v1094_v63 }
  0xd0   : > { %v650_v23 = vand.u32 2147483647, %v649_v31  ;;  %v526_v13 = vadd.s32 %v525_v16, %v521_v15  ;;  %v6887_v3 = vshrl.u32 %v686_v40, 5  ;;  %v6889_v18 = vadd.s32 1, %v4918_v34 }
  0xd1   : > { %vm6893_vm10 = vcmp.le.f32.partialorder %v778_v39, 0.7853982  ;;  %v4916_v26 = vadd.s32 4294967294, %v846_v43  ;;  %v6897_v41 = vand.u32 3, %v659_v55  ;;  %v6901_v8 = vand.u32 3, %v663_v24 }
  0xd2   : > { %v653_v38 = vmul.f32 %v652_v20, %v650_v23  ;;  %v867_v47 = vsel %vm6893_vm10, 0, %v865_v6  ;;  %v527_v35 = vadd.s32 536870912, %v526_v13  ;;  %v834_v14 = vadd.s32 %v6772_v9, %v6785_v17 }
  0xd3   : > { %vm4917_vm11 = vcmp.lt.s32.totalorder %v4916_v26, 0  ;;  %v674_v60 = vand.u32 2147483647, %v6620_v25  ;;  %v689_v30 = vsub.s32 32, %v688_v12  ;;  %v871_v31 = vadd.s32 3, %v867_v47 }
  0xd4   : > { %v654_v61 = vxor.u32 2147483648, %v653_v38  ;;  %v849_v63 = vsel %vm4917_vm11, 0, %v4916_v26  ;;  %v6908_v19 = vshrl.u32 %v527_v35, 30  ;;  %v6913_v55 = vand.u32 3, %v867_v47 }
  0xd5   : > { %v850_v0 = vsub.s32 32, %v849_v63  ;;  %v854_v52 = vsub.s32 4294967266, %v849_v63  ;;  %v6916_v9 = vadd.s32 %v6847_v37, %v6845_v62  ;;  %v851_v11 = vshll.u32 %v6855_v5, %v849_v63 }
  0xd6   : > { %v655_v39 = vsel %vm572_vm0, %v654_v61, %v653_v38  ;;  %v529_v17 = vshll.u32 %v6908_v19, 30  ;;  %v692_v33 = vshrl.u32 %v6004_v46, %v689_v30  ;;  %v695_v23 = vshrl.u32 %v6005_v49, %v689_v30 }
  0xd7   : > { %v658_v4 = vsel %vm6865_vm7, %v6559_v50, %v655_v39  ;;  %v852_v40 = vshrl.u32 %v834_v14, %v850_v0  ;;  %v855_v34 = vadd.s32 127, %v854_v52  ;;  %v701_v20 = vshrl.u32 %v6007_v59, %v689_v30 }
  0xd8   : > { %5874 = vcosq.f32 %v658_v4  ;;  %v6920_v58 = vsub.s32 %v526_v13, %v529_v17  ;;  %v6927_v62 = vand.u32 8388607, %v674_v60  ;;  %v698_v37 = vshrl.u32 %v6006_v53, %v689_v30 }
  0xd9   : > { %5876 = vsinq.f32 %v658_v4  ;;  %v853_v15 = vor.u32 %v852_v40, %v851_v11  ;;  %v856_v16 = vshll.u32 %v855_v34, 23  ;;  %vm669_vm12 = vcmp.eq.s32.totalorder %v6901_v8, 2 }
  0xda   : > { %vm1499_vm13 = vcmp.eq.s32.totalorder %v6897_v41, 2  ;;  %v532_v5 = vsub.s32 0, %v6920_v58  ;;  %v691_v24 = vshll.u32 %v6003_v42, %v688_v12  ;;  %v694_v43 = vshll.u32 %v6004_v46, %v688_v12 }
  0xdb   : > { %v700_v6 = vshll.u32 %v6006_v53, %v688_v12  ;;  %vm666_vm14 = vcmp.eq.s32.totalorder %v6901_v8, 0  ;;  %vm1496_vm15 = vcmp.eq.s32.totalorder %v6897_v41, 0  ;;  %v857_v38 = vor.u32 4788187, %v856_v16 }
  0xdc   : > { %v6938_v13 = vand.u32 3, %v871_v31  ;;  %v697_v26 = vshll.u32 %v6005_v49, %v688_v12  ;;  %v704_v61 = vshrl.u32 %v6008_v7, %v689_v30  ;;  %vm665_vm0 = vcmp.lt.s32.totalorder %v6901_v8, 2 }
  0xdd   : > { %vm1495_vm1 = vcmp.lt.s32.totalorder %v6897_v41, 2  ;;  %v4903_v47 = vmin.u32 %v532_v5, %v6920_v58  ;;  %v693_v35 = vor.u32 %v692_v33, %v691_v24  ;;  %v696_v14 = vor.u32 %v695_v23, %v694_v43 }
  0xde   : > { %v702_v39 = vor.u32 %v701_v20, %v700_v6  ;;  %vm662_vm2 = vweird.f32 %v6559_v50  ;;  %v858_v63 = vand.u32 2147483647, %v857_v38  ;;  %v860_v4 = vcvt.s32.f32 %v853_v15 }
  0xdf   : > { %v699_v0 = vor.u32 %v698_v37, %v697_v26  ;;  %v703_v52 = vshll.u32 %v6007_v59, %v688_v12  ;;  %v534_v31 = vclz %v4903_v47  ;;  %v552_v17 = vsub.s32 4, %v6908_v19 }
  0xe0   : > { %v682_v11 = vor.u32 8388608, %v6927_v62  ;;  %v690_v40 = vshrl.u32 %v6003_v42, %v689_v30  ;;  %v861_v34 = vmul.f32 %v860_v4, %v858_v63  ;;  %vm706_vm3 = vcmp.lt.s32.totalorder %v6887_v3, 1 }
  0xe1   : > { %v705_v16 = vor.u32 %v704_v61, %v703_v52  ;;  %vm709_vm4 = vcmp.lt.s32.totalorder %v6887_v3, 4  ;;  %v4904_v23 = vadd.s32 4294967294, %v534_v31  ;;  %vm707_vm5 = vcmp.lt.s32.totalorder %v6887_v3, 2 }
  0xe2   : > { %v5875_v33 = vpop.eup %5874  ;;  %vm708_vm6 = vcmp.lt.s32.totalorder %v6887_v3, 3  ;;  %v715_v12 = vsel %vm709_vm4, %v702_v39, 920167782  ;;  %v862_v62 = vxor.u32 2147483648, %v861_v34  ;;  %vm468_vm7 = vcmp.lt.s32.totalorder %v6553_v48, 0 }
  0xe3   : > { %v5877_v20 = vpop.eup %5876  ;;  %v670_v15 = vxor.u32 2147483648, %v5875_v33  ;;  %v711_v30 = vsel %vm709_vm4, %v699_v0, 2102212464  ;;  %v714_v37 = vsel %vm706_vm3, %v693_v35, %v696_v14  ;;  %vm4905_vm8 = vcmp.lt.s32.totalorder %v4904_v23, 0 }
  0xe4   : > { %v667_v5 = vxor.u32 2147483648, %v5877_v20  ;;  %v716_v24 = vsel %vm708_vm6, %v699_v0, %v715_v12  ;;  %v718_v43 = vsel %vm706_vm3, %v696_v14, %v699_v0  ;;  %v863_v26 = vsel %vm780_vm9, %v862_v62, %v861_v34 }
  0xe5   : > { %v671_v6 = vsel %vm669_vm12, %v670_v15, %v5877_v20  ;;  %v1501_v38 = vsel %vm1499_vm13, %v670_v15, %v5877_v20  ;;  %v537_v61 = vsel %vm4905_vm8, 0, %v4904_v23  ;;  %v866_v4 = vsel %vm6893_vm10, %v6569_v54, %v863_v26 }
  0xe6   : > { %v668_v47 = vsel %vm666_vm14, %v5875_v33, %v667_v5  ;;  %v1498_v63 = vsel %vm1496_vm15, %v5875_v33, %v667_v5  ;;  %v538_v0 = vsub.s32 32, %v537_v61  ;;  %5878 = vcosq.f32 %v866_v4 }
  0xe7   : > { %v672_v52 = vsel %vm665_vm0, %v668_v47, %v671_v6  ;;  %v1502_v31 = vsel %vm1495_vm1, %v1498_v63, %v1501_v38  ;;  %v717_v34 = vsel %vm707_vm5, %v714_v37, %v716_v24  ;;  %5880 = vsinq.f32 %v866_v4 }
  0xe8   : > { %v673_v23 = vsel %vm662_vm2, nan, %v672_v52  ;;  %v1503_v33 = vsel %vm662_vm2, nan, %v1502_v31  ;;  %v540_v45 = vshrl.u32 %v6916_v9, %v538_v0  ;;  %v542_v20 = vsub.s32 4294967266, %v537_v61 }
  0xe9   : > { %v5584_v12 = vpack.c.bf16 %v1503_v33, %v673_v23  ;;  %v719_v8 = vsel %vm709_vm4, %v705_v16, 1326507024  ;;  %v722_v41 = vshll.u32 %v682_v11, 8  ;;  %v539_v15 = vshll.u32 %v6920_v58, %v537_v61 }
  0xea   : > { %v710_v62 = vsel %vm706_vm3, %v690_v40, %v693_v35  ;;  %v712_v37 = vsel %vm708_vm6, %v696_v14, %v711_v30  ;;  %v720_v50 = vsel %vm708_vm6, %v702_v39, %v719_v8  ;;  %v543_v5 = vadd.s32 127, %v542_v20 }
  0xeb   : > { %5585 = vmatprep.subr.bf16.mxu0 %v5584_v12  ;;  %v721_v9 = vsel %vm707_vm5, %v718_v43, %v720_v50  ;;  %v7000_v24 = vmul.u32.u64.low %v722_v41, %v717_v34  ;;  %v7001_v6 = vmul.u32.u64.high %v722_v41, %v717_v34, %v7000_v24  ;;  %v7005_v58 = vadd.s32 1, %v6885_v28 }
  0xec   : > { %v553_v35 = vsel %vm468_vm7, %v552_v17, %v6908_v19  ;;  %v7010_v14 = vmul.u32.u64.low %v722_v41, %v721_v9  ;;  %v7011_v11 = vmul.u32.u64.high %v722_v41, %v721_v9, %v7010_v14  ;;  %v541_v39 = vor.u32 %v540_v45, %v539_v15 }
  0xed   : > { %v544_v40 = vshll.u32 %v543_v5, 23  ;;  %v713_v16 = vsel %vm707_vm5, %v710_v62, %v712_v37  ;;  %v989_v30 = vand.u32 2139095040, %v6859_v22  ;;  %vm870_vm9 = vweird.f32 %v6569_v54 }
  0xee   : > { %vm1701_vm10 = vcmp.lt.s32.totalorder %v6913_v55, 2  ;;  %vm1702_vm11 = vcmp.eq.s32.totalorder %v6913_v55, 0  ;;  %vm1705_vm12 = vcmp.eq.s32.totalorder %v6913_v55, 2  ;;  %v8072_v28 = vand.u32 2147483647, %v6553_v48 }
  0xef   : > { %vm873_vm14 = vcmp.lt.s32.totalorder %v6938_v13, 2  ;;  %v545_v3 = vor.u32 4788187, %v544_v40  ;;  %v732_v17 = vadd.s32 1, %v7001_v6  ;;  %v990_v43 = vshrl.u32 %v989_v30, 23 }
  0xf0   : > { %vm7022_vm13 = vcmp.le.f32.partialorder %v8072_v28, 0.7853982  ;;  %vm893_vm15 = vcmp.gt.s32.totalorder %v6889_v18, 0  ;;  %v729_v26 = vmul.u32 %v722_v41, %v713_v16  ;;  %vm731_vm0 = vc.u32 %v7011_v11, %v7000_v24  ;;  %v5879_v47 = vpop.eup %5878 }
  0xf1   : > { %v555_v38 = vsel %vm7022_vm13, 0, %v553_v35  ;;  %v986_v61 = vand.u32 2147483647, %v6859_v22  ;;  %v546_v63 = vand.u32 2147483647, %v545_v3  ;;  %v548_v4 = vcvt.s32.f32 %v541_v39  ;;  %v5881_v31 = vpop.eup %5880 }
  0xf2   : > { %v733_v0 = vsel %vm731_vm0, %v732_v17, %v7001_v6  ;;  %v4922_v52 = vadd.s32 4294967169, %v990_v43  ;;  %vm874_vm1 = vcmp.eq.s32.totalorder %v6938_v13, 0  ;;  %vm877_vm2 = vcmp.eq.s32.totalorder %v6938_v13, 2 }
  0xf3   : > { %v878_v34 = vxor.u32 2147483648, %v5879_v47  ;;  %v734_v23 = vadd.s32 %v733_v0, %v729_v26  ;;  %v875_v33 = vxor.u32 2147483648, %v5881_v31  ;;  %v549_v45 = vmul.f32 %v548_v4, %v546_v63 }
  0xf4   : > { %v559_v12 = vadd.s32 3, %v555_v38  ;;  %v996_v20 = vadd.s32 1, %v4922_v52  ;;  %v993_v62 = vand.u32 8388607, %v986_v61  ;;  %v1197_v30 = vand.u32 2139095040, %v6883_v44 }
  0xf5   : > { %v879_v8 = vsel %vm877_vm2, %v878_v34, %v5881_v31  ;;  %v1707_v41 = vsel %vm1705_vm12, %v878_v34, %v5881_v31  ;;  %v735_v15 = vadd.s32 536870912, %v734_v23  ;;  %v876_v37 = vsel %vm874_vm1, %v5879_v47, %v875_v33 }
  0xf6   : > { %v1704_v50 = vsel %vm1702_vm11, %v5879_v47, %v875_v33  ;;  %v550_v5 = vxor.u32 2147483648, %v549_v45  ;;  %vm997_vm3 = vcmp.gt.s32.totalorder %v996_v20, 0  ;;  %v880_v9 = vsel %vm873_vm14, %v876_v37, %v879_v8 }
  0xf7   : > { %v1708_v6 = vsel %vm1701_vm10, %v1704_v50, %v1707_v41  ;;  %v7047_v35 = vshrl.u32 %v735_v15, 30  ;;  %v998_v14 = vsel %vm997_vm3, %v996_v20, 0  ;;  %v881_v39 = vsel %vm870_vm9, nan, %v880_v9 }
  0xf8   : > { %v1709_v40 = vsel %vm870_vm9, nan, %v1708_v6  ;;  %v551_v16 = vsel %vm468_vm7, %v550_v5, %v549_v45  ;;  %vm1101_vm4 = vcmp.gt.s32.totalorder %v7005_v58, 0  ;;  %v7061_v3 = vand.u32 3, %v559_v12 }
  0xf9   : > { %v5588_v13 = vpack.c.bf16 %v1709_v40, %v881_v39  ;;  %v554_v55 = vsel %vm7022_vm13, %v6553_v48, %v551_v16  ;;  %v737_v28 = vshll.u32 %v7047_v35, 30  ;;  %v7063_v17 = vand.u32 3, %v555_v38 }
  0xfa   : > { %5882 = vcosq.f32 %v554_v55  ;;  %v1000_v54 = vand.u32 31, %v998_v14  ;;  %v994_v26 = vor.u32 8388608, %v993_v62  ;;  %v7070_v47 = vsel %vm893_vm15, %v6889_v18, 0 }
  0xfb   : > { %5589 = vmatprep.subr.bf16.mxu1 %v5588_v13  ;;  %5884 = vsinq.f32 %v554_v55  ;;  %v7065_v43 = vsub.s32 %v734_v23, %v737_v28  ;;  %v7073_v19 = vsel %vm1101_vm4, %v7005_v58, 0  ;;  %v1198_v4 = vshrl.u32 %v1197_v30, 23 }
  0xfc   : > { %v1001_v63 = vsub.s32 32, %v1000_v54  ;;  %v7076_v38 = vshrl.u32 %v998_v14, 5  ;;  %v1003_v52 = vshll.u32 %v6003_v42, %v1000_v54  ;;  %v1194_v31 = vand.u32 2147483647, %v6883_v44 }
  0xfd   : > { %v740_v0 = vsub.s32 0, %v7065_v43  ;;  %vm565_vm5 = vcmp.eq.s32.totalorder %v7061_v3, 2  ;;  %vm1396_vm6 = vcmp.eq.s32.totalorder %v7063_v17, 2  ;;  %v1006_v34 = vshll.u32 %v6004_v46, %v1000_v54 }
  0xfe   : > { %v1004_v18 = vshrl.u32 %v6004_v46, %v1001_v63  ;;  %v1007_v58 = vshrl.u32 %v6005_v49, %v1001_v63  ;;  %v1010_v23 = vshrl.u32 %v6006_v53, %v1001_v63  ;;  %vm562_vm7 = vcmp.eq.s32.totalorder %v7061_v3, 0 }
  0xff   : > { %vm1393_vm8 = vcmp.eq.s32.totalorder %v7063_v17, 0  ;;  %v730_v33 = vadd.s32 %v7000_v24, %v7011_v11  ;;  %v4911_v45 = vmin.u32 %v740_v0, %v7065_v43  ;;  %v1009_v12 = vshll.u32 %v6005_v49, %v1000_v54 }
 0x100   : > { %v7092_v20 = vshll.u32 %v994_v26, 8  ;;  %vm561_vm9 = vcmp.lt.s32.totalorder %v7061_v3, 2  ;;  %vm1392_vm10 = vcmp.lt.s32.totalorder %v7063_v17, 2  ;;  %v760_v8 = vsub.s32 4, %v7047_v35 }
 0x101   : > { %v1005_v41 = vor.u32 %v1004_v18, %v1003_v52  ;;  %v1008_v15 = vor.u32 %v1007_v58, %v1006_v34  ;;  %v4930_v62 = vadd.s32 4294967169, %v1198_v4  ;;  %vm558_vm11 = vweird.f32 %v6553_v48 }
 0x102   : > { %v742_v37 = vclz %v4911_v45  ;;  %v1002_v24 = vshrl.u32 %v6003_v42, %v1001_v63  ;;  %v1011_v11 = vor.u32 %v1010_v23, %v1009_v12  ;;  %vm1018_vm12 = vcmp.lt.s32.totalorder %v7076_v38, 1 }
 0x103   : > { %v1012_v50 = vshll.u32 %v6006_v53, %v1000_v54  ;;  %v1013_v5 = vshrl.u32 %v6007_v59, %v1001_v63  ;;  %v1015_v9 = vshll.u32 %v6007_v59, %v1000_v54  ;;  %v1016_v6 = vshrl.u32 %v6008_v7, %v1001_v63 }
 0x104   : > { %v4912_v14 = vadd.s32 4294967294, %v742_v37  ;;  %vm1019_vm13 = vcmp.lt.s32.totalorder %v7076_v38, 2  ;;  %vm1020_vm14 = vcmp.lt.s32.totalorder %v7076_v38, 3  ;;  %vm1021_vm15 = vcmp.lt.s32.totalorder %v7076_v38, 4  ;;  %v5883_v39 = vpop.eup %5882 }
 0x105   : > { %v1014_v40 = vor.u32 %v1013_v5, %v1012_v50  ;;  %v1017_v16 = vor.u32 %v1016_v6, %v1015_v9  ;;  %v1022_v30 = vsel %vm1018_vm12, %v1002_v24, %v1005_v41  ;;  %v1026_v13 = vsel %vm1018_vm12, %v1005_v41, %v1008_v15  ;;  %v5885_v55 = vpop.eup %5884 }
 0x106   : > { %v566_v28 = vxor.u32 2147483648, %v5883_v39  ;;  %vm4913_vm0 = vcmp.lt.s32.totalorder %v4912_v14, 0  ;;  %v1023_v54 = vsel %vm1021_vm15, %v1011_v11, 2102212464  ;;  %v1030_v26 = vsel %vm1018_vm12, %v1008_v15, %v1011_v11 }
 0x107   : > { %v563_v63 = vxor.u32 2147483648, %v5885_v55  ;;  %v745_v4 = vsel %vm4913_vm0, 0, %v4912_v14  ;;  %v1027_v0 = vsel %vm1021_vm15, %v1014_v40, 920167782  ;;  %v1204_v52 = vadd.s32 1, %v4930_v62 }
 0x108   : > { %v567_v18 = vsel %vm565_vm5, %v566_v28, %v5885_v55  ;;  %v1398_v34 = vsel %vm1396_vm6, %v566_v28, %v5885_v55  ;;  %v746_v58 = vsub.s32 32, %v745_v4  ;;  %v747_v23 = vshll.u32 %v7065_v43, %v745_v4 }
 0x109   : > { %v564_v45 = vsel %vm562_vm7, %v5883_v39, %v563_v63  ;;  %v1395_v12 = vsel %vm1393_vm8, %v5883_v39, %v563_v63  ;;  %v750_v41 = vsub.s32 4294967266, %v745_v4  ;;  %v1028_v37 = vsel %vm1020_vm14, %v1011_v11, %v1027_v0  ;;  %v7164_v63 = vld [vmem:[%s8056_s3] sm:$0xff] }
 0x10a   : > { %v568_v62 = vsel %vm561_vm9, %v564_v45, %v567_v18  ;;  %v1399_v24 = vsel %vm1392_vm10, %v1395_v12, %v1398_v34  ;;  %v748_v50 = vshrl.u32 %v730_v33, %v746_v58  ;;  %v1029_v43 = vsel %vm1019_vm13, %v1026_v13, %v1028_v37 }
 0x10b   : > { %v569_v5 = vsel %vm558_vm11, nan, %v568_v62  ;;  %v1400_v9 = vsel %vm558_vm11, nan, %v1399_v24  ;;  %v751_v6 = vadd.s32 127, %v750_v41  ;;  %v1031_v11 = vsel %vm1021_vm15, %v1017_v16, 1326507024 }
 0x10c   : > { %v5586_v14 = vpack.c.bf16 %v1400_v9, %v569_v5  ;;  %v749_v3 = vor.u32 %v748_v50, %v747_v23  ;;  %v1024_v17 = vsel %vm1020_vm14, %v1008_v15, %v1023_v54  ;;  %v1032_v33 = vsel %vm1020_vm14, %v1014_v40, %v1031_v11 }
 0x10d   : > { %v752_v39 = vshll.u32 %v751_v6, 23  ;;  %v1033_v13 = vsel %vm1019_vm13, %v1030_v26, %v1032_v33  ;;  %v7147_v55 = vmul.u32.u64.low %v7092_v20, %v1029_v43  ;;  %v7148_v48 = vmul.u32.u64.high %v7092_v20, %v1029_v43, %v7147_v55 }
 0x10e   : > { %5587 = vmatpush1.bf16.msra.mxu0 %v5586_v14  ;;  %vm676_vm1 = vcmp.lt.s32.totalorder %v6620_v25, 0  ;;  %v7153_v16 = vmul.u32.u64.low %v7092_v20, %v1033_v13  ;;  %v7154_v28 = vmul.u32.u64.high %v7092_v20, %v1033_v13, %v7153_v16  ;;  %vm1205_vm2 = vcmp.gt.s32.totalorder %v1204_v52, 0 }
 0x10f   : > { %v753_v15 = vor.u32 4788187, %v752_v39  ;;  %v761_v40 = vsel %vm676_vm1, %v760_v8, %v7047_v35  ;;  %v1025_v54 = vsel %vm1019_vm13, %v1022_v30, %v1024_v17  ;;  %v1206_v26 = vsel %vm1205_vm2, %v1204_v52, 0 }
 0x110   : > { %vm7168_vm3 = vcmp.le.f32.partialorder %v674_v60, 0.7853982  ;;  %v1208_v0 = vand.u32 31, %v1206_v26  ;;  %vm3127_vm4 = vcmask 130048   ;;  %v756_v34 = vcvt.s32.f32 %v749_v3 }
 0x111   : > { %v754_v18 = vand.u32 2147483647, %v753_v15  ;;  %v1044_v35 = vadd.s32 1, %v7148_v48  ;;  %v1201_v38 = vand.u32 8388607, %v1194_v31  ;;  %v6009_v8 = vmov 0.0  }
 0x112   : > { %3216 = vmatprep.mubr.f32.mxu0 %v6009_v8  ;;  %3329 = vmatprep.mubr.f32.mxu1 %v6009_v8  ;;  %v763_v60 = vsel %vm7168_vm3, 0, %v761_v40  ;;  %v1041_v30 = vmul.u32 %v7092_v20, %v1025_v54  ;;  %vm1043_vm5 = vc.u32 %v7154_v28, %v7147_v55  ;;  %v1209_v52 = vsub.s32 32, %v1208_v0  ;;  %v7192_v20 = vld [vmem:[%s8056_s3 + $0x8] sm:$0xff] }
 0x113   : > { %5126 = vmatmul.mubr.msk.f32.vlgmr.msra.gmra.mrb[0].mxu0 %vm3127_vm4, %v7164_v63  ;;  %v757_v58 = vmul.f32 %v756_v34, %v754_v18  ;;  %v1045_v23 = vsel %vm1043_vm5, %v1044_v35, %v7148_v48  ;;  %v7185_v45 = vshrl.u32 %v1206_v26, 5  ;;  %v1211_v12 = vshll.u32 %v6003_v42, %v1208_v0  ;;  %v7211_v48 = vld [vmem:[%s8056_s3 + $0x10] sm:$0xff] }
 0x114   : > { %3222 = vmatprep.mubr.f32.mxu0 %v6009_v8  ;;  %v1046_v41 = vadd.s32 %v1045_v23, %v1041_v30  ;;  %v1212_v37 = vshrl.u32 %v6004_v46, %v1209_v52  ;;  %v1214_v62 = vshll.u32 %v6004_v46, %v1208_v0  ;;  %v1215_v24 = vshrl.u32 %v6005_v49, %v1209_v52 }
 0x115   : > { %v758_v50 = vxor.u32 2147483648, %v757_v58  ;;  %v1218_v43 = vshrl.u32 %v6006_v53, %v1209_v52  ;;  %v1220_v5 = vshll.u32 %v6006_v53, %v1208_v0  ;;  %v1221_v9 = vshrl.u32 %v6007_v59, %v1209_v52 }
 0x116   : > { %v1047_v6 = vadd.s32 536870912, %v1046_v41  ;;  %v1213_v11 = vor.u32 %v1212_v37, %v1211_v12  ;;  %v1216_v14 = vor.u32 %v1215_v24, %v1214_v62  ;;  %v1217_v3 = vshll.u32 %v6005_v49, %v1208_v0 }
 0x117   : > { %5127 = vmatmul.mubr.msk.f32.gmra.mrb[2].mxu0 %vm3127_vm4, %v7192_v20  ;;  %v759_v17 = vsel %vm676_vm1, %v758_v50, %v757_v58  ;;  %v1222_v33 = vor.u32 %v1221_v9, %v1220_v5  ;;  %v1223_v39 = vshll.u32 %v6007_v59, %v1208_v0  ;;  %v1224_v13 = vshrl.u32 %v6008_v7, %v1209_v52 }
 0x118   : > { %3228 = vmatprep.mubr.f32.mxu0 %v6009_v8  ;;  %v762_v16 = vsel %vm7168_vm3, %v6620_v25, %v759_v17  ;;  %v7216_v15 = vshrl.u32 %v1047_v6, 30  ;;  %v1202_v40 = vor.u32 8388608, %v1201_v38  ;;  %v1219_v54 = vor.u32 %v1218_v43, %v1217_v3  ;;  %v7232_v38 = vld [vmem:[%s8056_s3 + $0x18] sm:$0xff] }
 0x119   : > { %5886 = vcosq.f32 %v762_v16  ;;  %v767_v26 = vadd.s32 3, %v763_v60  ;;  %v1210_v0 = vshrl.u32 %v6003_v42, %v1209_v52  ;;  %v1225_v18 = vor.u32 %v1224_v13, %v1223_v39 }
 0x11a   : > { %5888 = vsinq.f32 %v762_v16  ;;  %v1049_v34 = vshll.u32 %v7216_v15, 30  ;;  %vm1226_vm6 = vcmp.lt.s32.totalorder %v7185_v45, 1  ;;  %vm1229_vm7 = vcmp.lt.s32.totalorder %v7185_v45, 4 }
 0x11b   : > { %5128 = vmatmul.mubr.msk.f32.gmra.mrb[4].mxu0 %vm3127_vm4, %v7211_v48  ;;  %vm1227_vm8 = vcmp.lt.s32.totalorder %v7185_v45, 2  ;;  %vm1228_vm9 = vcmp.lt.s32.totalorder %v7185_v45, 3  ;;  %v1234_v4 = vsel %vm1226_vm6, %v1213_v11, %v1216_v14  ;;  %v1235_v35 = vsel %vm1229_vm7, %v1222_v33, 920167782 }
 0x11c   : > { %3234 = vmatprep.mubr.f32.mxu0 %v6009_v8  ;;  %v7234_v30 = vsub.s32 %v1046_v41, %v1049_v34  ;;  %v1231_v52 = vsel %vm1229_vm7, %v1219_v54, 2102212464  ;;  %v1236_v58 = vsel %vm1228_vm9, %v1219_v54, %v1235_v35  ;;  %v1238_v23 = vsel %vm1226_vm6, %v1216_v14, %v1219_v54 }
 0x11d   : > { %v1597_v12 = vand.u32 3, %v763_v60  ;;  %v1237_v37 = vsel %vm1227_vm8, %v1234_v4, %v1236_v58  ;;  %v1239_v62 = vsel %vm1229_vm7, %v1225_v18, 1326507024  ;;  %v1242_v24 = vshll.u32 %v1202_v40, 8 }
 0x11e   : > { %v768_v50 = vand.u32 3, %v767_v26  ;;  %v1052_v43 = vsub.s32 0, %v7234_v30  ;;  %v1230_v41 = vsel %vm1226_vm6, %v1210_v0, %v1213_v11  ;;  %v1240_v5 = vsel %vm1228_vm9, %v1222_v33, %v1239_v62  ;;  %v7261_v11 = vld [vmem:[%s8056_s3 + $0x20] sm:$0xff]  ;;  %v7289_v0 = vld [vmem:[%s8056_s3 + $0x28] sm:$0xff] }
 0x11f   : > { %5129 = vmatmul.mubr.msk.f32.gmra.mrb[6].mxu0 %vm3127_vm4, %v7232_v38  ;;  %v1232_v60 = vsel %vm1228_vm9, %v1216_v14, %v1231_v52  ;;  %v1241_v9 = vsel %vm1227_vm8, %v1238_v23, %v1240_v5  ;;  %v7253_v6 = vmul.u32.u64.low %v1242_v24, %v1237_v37  ;;  %v7254_v3 = vmul.u32.u64.high %v1242_v24, %v1237_v37, %v7253_v6 }
 0x120   : > { %3240 = vmatprep.mubr.f32.mxu0 %v6009_v8  ;;  %v7264_v17 = vshrl.u32 %v7070_v47, 5  ;;  %v7267_v33 = vand.u32 31, %v7070_v47  ;;  %v7270_v14 = vshrl.u32 %v7073_v19, 5  ;;  %v4923_v39 = vmin.u32 %v1052_v43, %v7234_v30 }
 0x121   : > { %v7274_v13 = vand.u32 31, %v7073_v19  ;;  %vm766_vm10 = vweird.f32 %v6620_v25  ;;  %v7277_v16 = vmul.u32.u64.low %v1242_v24, %v1241_v9  ;;  %v7278_v40 = vmul.u32.u64.high %v1242_v24, %v1241_v9, %v7277_v16 }
 0x122   : > { %vm1598_vm11 = vcmp.lt.s32.totalorder %v1597_v12, 2  ;;  %vm1599_vm12 = vcmp.eq.s32.totalorder %v1597_v12, 0  ;;  %v1054_v54 = vclz %v4923_v39  ;;  %v1233_v47 = vsel %vm1227_vm8, %v1230_v41, %v1232_v60 }
 0x123   : > { %5130 = vmatmul.mubr.msk.f32.gmra.mrb[8].mxu0 %vm3127_vm4, %v7261_v11  ;;  %v5887_v26 = vpop.eup %5886  ;;  %vm769_vm13 = vcmp.lt.s32.totalorder %v768_v50, 2  ;;  %vm770_vm14 = vcmp.eq.s32.totalorder %v768_v50, 0  ;;  %vm1602_vm15 = vcmp.eq.s32.totalorder %v1597_v12, 2  ;;  %v1252_v19 = vadd.s32 1, %v7254_v3 }
 0x124   : > { %3246 = vmatprep.mubr.f32.mxu0 %v6009_v8  ;;  %v5889_v18 = vpop.eup %5888  ;;  %vm773_vm0 = vcmp.eq.s32.totalorder %v768_v50, 2  ;;  %v774_v45 = vxor.u32 2147483648, %v5887_v26  ;;  %v1042_v34 = vadd.s32 %v7147_v55, %v7154_v28  ;;  %v4924_v4 = vadd.s32 4294967294, %v1054_v54 }
 0x125   : > { %v771_v35 = vxor.u32 2147483648, %v5889_v18  ;;  %v1072_v52 = vsub.s32 4, %v7216_v15  ;;  %v1249_v58 = vmul.u32 %v1242_v24, %v1233_v47  ;;  %vm1251_vm1 = vc.u32 %v7278_v40, %v7253_v6  ;;  %v7305_v24 = vld [vmem:[%s8056_s3 + $0x30] sm:$0xff] }
 0x126   : > { %v775_v23 = vsel %vm773_vm0, %v774_v45, %v5889_v18  ;;  %v1604_v37 = vsel %vm1602_vm15, %v774_v45, %v5889_v18  ;;  %vm4925_vm2 = vcmp.lt.s32.totalorder %v4924_v4, 0  ;;  %v1253_v62 = vsel %vm1251_vm1, %v1252_v19, %v7254_v3 }
 0x127   : > { %5131 = vmatmul.mubr.msk.f32.gmra.mrb[10].mxu0 %vm3127_vm4, %v7289_v0  ;;  %v772_v43 = vsel %vm770_vm14, %v5887_v26, %v771_v35  ;;  %v1601_v55 = vsel %vm1599_vm12, %v5887_v26, %v771_v35  ;;  %v1057_v28 = vsel %vm4925_vm2, 0, %v4924_v4  ;;  %v1254_v41 = vadd.s32 %v1253_v62, %v1249_v58 }
 0x128   : > { %3252 = vmatprep.mubr.f32.mxu0 %v6009_v8  ;;  %v776_v5 = vsel %vm769_vm13, %v772_v43, %v775_v23  ;;  %v1605_v60 = vsel %vm1598_vm11, %v1601_v55, %v1604_v37  ;;  %v1058_v9 = vsub.s32 32, %v1057_v28  ;;  %v897_v3 = vsub.s32 32, %v7267_v33 }
 0x129   : > { %v777_v39 = vsel %vm766_vm10, nan, %v776_v5  ;;  %v1606_v16 = vsel %vm766_vm10, nan, %v1605_v60  ;;  %v1062_v54 = vsub.s32 4294967266, %v1057_v28  ;;  %v1255_v47 = vadd.s32 536870912, %v1254_v41 }
 0x12a   : > { %v5590_v26 = vpack.c.bf16 %v1606_v16, %v777_v39  ;;  %vm7316_vm3 = vcmp.le.f32.partialorder %v986_v61, 0.7853982  ;;  %v1060_v12 = vshrl.u32 %v1042_v34, %v1058_v9  ;;  %v882_v50 = vand.u32 2147483647, %v6633_v32  ;;  %v7331_v61 = vld [vmem:[%s8056_s3 + $0x38] sm:$0xff] }
 0x12b   : > { %5132 = vmatmul.mubr.msk.f32.gmra.mrb[12].mxu0 %vm3127_vm4, %v7305_v24  ;;  %vm988_vm5 = vcmp.lt.s32.totalorder %v6859_v22, 0  ;;  %v1059_v25 = vshll.u32 %v7234_v30, %v1057_v28  ;;  %v1063_v18 = vadd.s32 127, %v1062_v54  ;;  %v7325_v45 = vshrl.u32 %v1255_v47, 30 }
 0x12c   : > { %3258 = vmatprep.mubr.f32.mxu0 %v6009_v8  ;;  %5591 = vmatpush1.bf16.msra.mxu1 %v5590_v26  ;;  %v1073_v34 = vsel %vm988_vm5, %v1072_v52, %v7216_v15  ;;  %v900_v4 = vshrl.u32 %v6004_v46, %v897_v3  ;;  %v903_v35 = vshrl.u32 %v6005_v49, %v897_v3  ;;  %v7343_v43 = vand.u32 8388607, %v882_v50 }
 0x12d   : > { %v909_v30 = vshrl.u32 %v6007_v59, %v897_v3  ;;  %v1061_v58 = vor.u32 %v1060_v12, %v1059_v25  ;;  %v1064_v23 = vshll.u32 %v1063_v18, 23  ;;  %v1257_v37 = vshll.u32 %v7325_v45, 30 }
 0x12e   : > { %v906_v62 = vshrl.u32 %v6006_v53, %v897_v3  ;;  %v899_v55 = vshll.u32 %v6003_v42, %v7267_v33  ;;  %v902_v15 = vshll.u32 %v6004_v46, %v7267_v33  ;;  %v908_v52 = vshll.u32 %v6006_v53, %v7267_v33 }
 0x12f   : > { %5133 = vmatmul.mubr.msk.f32.gmra.mrb[14].mxu0 %vm3127_vm4, %v7331_v61  ;;  %v1065_v28 = vor.u32 4788187, %v1064_v23  ;;  %v1075_v5 = vsel %vm7316_vm3, 0, %v1073_v34  ;;  %v7355_v60 = vsub.s32 %v1254_v41, %v1257_v37  ;;  %5134 = vmatmul.mubr.msk.f32.vlgmr.msra.gmra.mrb[0].mxu1 %vm3127_vm4, %v7164_v63  ;;  %v905_v9 = vshll.u32 %v6005_v49, %v7267_v33 }
 0x130   : > { %3442 = vmatprep.mubr.f32.mxu0 %v6009_v8  ;;  %v901_v39 = vor.u32 %v900_v4, %v899_v55  ;;  %v904_v16 = vor.u32 %v903_v35, %v902_v15  ;;  %v910_v54 = vor.u32 %v909_v30, %v908_v52  ;;  %v912_v47 = vshrl.u32 %v6008_v7, %v897_v3  ;;  %v3605_v35 = vld [vmem:[%s8058_s5 + $0x8] sm:$0xff] }
 0x131   : > { %3335 = vmatprep.mubr.f32.mxu1 %v6009_v8  ;;  %v1066_v26 = vand.u32 2147483647, %v1065_v28  ;;  %v1068_v12 = vcvt.s32.f32 %v1061_v58  ;;  %v1260_v41 = vsub.s32 0, %v7355_v60  ;;  %v907_v25 = vor.u32 %v906_v62, %v905_v9  ;;  %3619 = vperm.xlu1 %5873, %v3605_v35  }
 0x132   : > { %v1079_v18 = vadd.s32 3, %v1075_v5  ;;  %v7365_v34 = vand.u32 3, %v1075_v5  ;;  %vm1196_vm6 = vcmp.lt.s32.totalorder %v6883_v44, 0  ;;  %v890_v23 = vor.u32 8388608, %v7343_v43 }
 0x133   : > { %v911_v4 = vshll.u32 %v6007_v59, %v7267_v33  ;;  %v1069_v30 = vmul.f32 %v1068_v12, %v1066_v26  ;;  %v4931_v58 = vmin.u32 %v1260_v41, %v7355_v60  ;;  %v898_v37 = vshrl.u32 %v6003_v42, %v897_v3  ;;  %5135 = vmatmul.mubr.msk.f32.gmra.mrb[2].mxu1 %vm3127_vm4, %v7192_v20  ;;  %v3606_v3 = vld [vmem:[%s8058_s5 + $0x10] sm:$0xff] }
 0x134   : > { %vm917_vm7 = vcmp.lt.s32.totalorder %v7264_v17, 4  ;;  %vm914_vm8 = vcmp.lt.s32.totalorder %v7264_v17, 1  ;;  %vm916_vm9 = vcmp.lt.s32.totalorder %v7264_v17, 3  ;;  %3341 = vmatprep.mubr.f32.mxu1 %v6009_v8  ;;  %v7391_v28 = vand.u32 3, %v1079_v18 }
 0x135   : > { %v913_v62 = vor.u32 %v912_v47, %v911_v4  ;;  %v923_v33 = vsel %vm917_vm7, %v910_v54, 920167782  ;;  %v1070_v43 = vxor.u32 2147483648, %v1069_v30  ;;  %v1262_v55 = vclz %v4931_v58  ;;  %3624 = vperm.xlu1 %5873, %v3606_v3  }
 0x136   : > { %v919_v15 = vsel %vm917_vm7, %v907_v25, 2102212464  ;;  %v922_v52 = vsel %vm914_vm8, %v901_v39, %v904_v16  ;;  %v1280_v5 = vsub.s32 4, %v7325_v45  ;;  %vm915_vm10 = vcmp.lt.s32.totalorder %v7264_v17, 2 }
 0x137   : > { %v924_v9 = vsel %vm916_vm9, %v907_v25, %v923_v33  ;;  %v1071_v47 = vsel %vm988_vm5, %v1070_v43, %v1069_v30  ;;  %vm7401_vm11 = vcmp.le.f32.partialorder %v1194_v31, 0.7853982  ;;  %v4932_v12 = vadd.s32 4294967294, %v1262_v55  ;;  %5136 = vmatmul.mubr.msk.f32.gmra.mrb[4].mxu1 %vm3127_vm4, %v7211_v48 }
 0x138   : > { %v918_v41 = vsel %vm914_vm8, %v898_v37, %v901_v39  ;;  %v926_v18 = vsel %vm914_vm8, %v904_v16, %v907_v25  ;;  %v1074_v4 = vsel %vm7316_vm3, %v6859_v22, %v1071_v47  ;;  %v920_v31 = vsel %vm916_vm9, %v904_v16, %v919_v15  ;;  %3347 = vmatprep.mubr.f32.mxu1 %v6009_v8  ;;  %v3608_v25 = vld [vmem:[%s8058_s5 + $0x20] sm:$0xff] }
 0x139   : > { %v925_v35 = vsel %vm915_vm10, %v922_v52, %v924_v9  ;;  %v927_v39 = vsel %vm917_vm7, %v913_v62, 1326507024  ;;  %5890 = vcosq.f32 %v1074_v4  ;;  %vm4933_vm12 = vcmp.lt.s32.totalorder %v4932_v12, 0  ;;  %3634 = vperm.xlu1 %5873, %v3608_v25  }
 0x13a   : > { %v928_v19 = vsel %vm916_vm9, %v910_v54, %v927_v39  ;;  %v930_v30 = vshll.u32 %v890_v23, 8  ;;  %5892 = vsinq.f32 %v1074_v4  ;;  %v1265_v16 = vsel %vm4933_vm12, 0, %v4932_v12  ;;  %v3788_v4 = vld [vmem:[%s8060_s7] sm:$0xff] }
 0x13b   : > { %v929_v58 = vsel %vm915_vm10, %v926_v18, %v928_v19  ;;  %v1090_v37 = vand.u32 2147483647, %v6643_v36  ;;  %v1250_v62 = vadd.s32 %v7253_v6, %v7278_v40  ;;  %v1266_v33 = vsub.s32 32, %v1265_v16  ;;  %5137 = vmatmul.mubr.msk.f32.gmra.mrb[6].mxu1 %vm3127_vm4, %v7232_v38  ;;  %v3610_v6 = vld [vmem:[%s8058_s5 + $0x30] sm:$0xff] }
 0x13c   : > { %v1270_v3 = vsub.s32 4294967266, %v1265_v16  ;;  %v1281_v43 = vsel %vm1196_vm6, %v1280_v5, %v7325_v45  ;;  %v7436_v54 = vmul.u32.u64.low %v930_v30, %v929_v58  ;;  %v7437_v23 = vmul.u32.u64.high %v930_v30, %v929_v58, %v7436_v54  ;;  %3353 = vmatprep.mubr.f32.mxu1 %v6009_v8 }
 0x13d   : > { %v7439_v55 = vmul.u32.u64.low %v930_v30, %v925_v35  ;;  %v7440_v15 = vmul.u32.u64.high %v930_v30, %v925_v35, %v7439_v55  ;;  %v1267_v40 = vshll.u32 %v7355_v60, %v1265_v16  ;;  %v1268_v45 = vshrl.u32 %v1250_v62, %v1266_v33  ;;  %3644 = vperm.xlu1 %5873, %v3610_v6  }
 0x13e   : > { %v1271_v52 = vadd.s32 127, %v1270_v3  ;;  %v921_v5 = vsel %vm915_vm10, %v918_v41, %v920_v31  ;;  %vm1908_vm13 = vcmp.eq.s32.totalorder %v7365_v34, 0  ;;  %vm1911_vm14 = vcmp.eq.s32.totalorder %v7365_v34, 2 }
 0x13f   : > { %v7454_v9 = vand.u32 8388607, %v1090_v37  ;;  %v7457_v47 = vsub.s32 32, %v7274_v13  ;;  %vm1081_vm15 = vcmp.lt.s32.totalorder %v7391_v28, 2  ;;  %vm1082_vm0 = vcmp.eq.s32.totalorder %v7391_v28, 0  ;;  %5138 = vmatmul.mubr.msk.f32.gmra.mrb[8].mxu1 %vm3127_vm4, %v7261_v11 }
 0x140   : > { %vm1085_vm1 = vcmp.eq.s32.totalorder %v7391_v28, 2  ;;  %vm1907_vm2 = vcmp.lt.s32.totalorder %v7365_v34, 2  ;;  %v1269_v17 = vor.u32 %v1268_v45, %v1267_v40  ;;  %v1272_v60 = vshll.u32 %v1271_v52, 23  ;;  %3359 = vmatprep.mubr.f32.mxu1 %v6009_v8  ;;  %v3790_v45 = vld [vmem:[%s8060_s7 + $0x10] sm:$0xff] }
 0x141   : > { %vm1078_vm3 = vweird.f32 %v6859_v22  ;;  %v7468_v12 = vsel %vm7401_vm11, 0, %v1281_v43  ;;  %v937_v41 = vmul.u32 %v930_v30, %v921_v5  ;;  %vm939_vm5 = vc.u32 %v7437_v23, %v7439_v55  ;;  %3798 = vperm.xlu1 %5873, %v3788_v4  }
 0x142   : > { %v940_v18 = vadd.s32 1, %v7440_v15  ;;  %v1273_v31 = vor.u32 4788187, %v1272_v60  ;;  %v1107_v35 = vshll.u32 %v6003_v42, %v7274_v13  ;;  %v1108_v39 = vshrl.u32 %v6004_v46, %v7457_v47 }
 0x143   : > { %v1110_v25 = vshll.u32 %v6004_v46, %v7274_v13  ;;  %v1098_v30 = vor.u32 8388608, %v7454_v9  ;;  %v1111_v16 = vshrl.u32 %v6005_v49, %v7457_v47  ;;  %v1113_v58 = vshll.u32 %v6005_v49, %v7274_v13  ;;  %v5891_v62 = vpop.eup %5890  ;;  %5139 = vmatmul.mubr.msk.f32.gmra.mrb[10].mxu1 %vm3127_vm4, %v7289_v0 }
 0x144   : > { %v941_v19 = vsel %vm939_vm5, %v940_v18, %v7440_v15  ;;  %v1274_v33 = vand.u32 2147483647, %v1273_v31  ;;  %v1276_v3 = vcvt.s32.f32 %v1269_v17  ;;  %v1116_v54 = vshll.u32 %v6006_v53, %v7274_v13  ;;  %v5893_v46 = vpop.eup %5892  ;;  %3365 = vmatprep.mubr.f32.mxu1 %v6009_v8 }
 0x145   : > { %v942_v43 = vadd.s32 %v941_v19, %v937_v41  ;;  %v1086_v15 = vxor.u32 2147483648, %v5891_v62  ;;  %v1114_v6 = vshrl.u32 %v6006_v53, %v7457_v47  ;;  %v1117_v40 = vshrl.u32 %v6007_v59, %v7457_v47  ;;  %3808 = vperm.xlu1 %5873, %v3790_v45  }
 0x146   : > { %v1119_v49 = vshll.u32 %v6007_v59, %v7274_v13  ;;  %v1083_v52 = vxor.u32 2147483648, %v5893_v46  ;;  %v1277_v5 = vmul.f32 %v1276_v3, %v1274_v33  ;;  %v7503_v60 = vor.u32 %v1108_v39, %v1107_v35 }
 0x147   : > { %v943_v17 = vadd.s32 536870912, %v942_v43  ;;  %v1087_v53 = vsel %vm1085_vm1, %v1086_v15, %v5893_v46  ;;  %v1913_v41 = vsel %vm1911_vm14, %v1086_v15, %v5893_v46  ;;  %v1112_v18 = vor.u32 %v1111_v16, %v1110_v25  ;;  %5140 = vmatmul.mubr.msk.f32.gmra.mrb[12].mxu1 %vm3127_vm4, %v7305_v24  ;;  %v3792_v16 = vld [vmem:[%s8060_s7 + $0x20] sm:$0xff]  ;;  %v3794_v15 = vld [vmem:[%s8060_s7 + $0x30] sm:$0xff] }
 0x148   : > { %v1120_v59 = vshrl.u32 %v6008_v7, %v7457_v47  ;;  %v1084_v13 = vsel %vm1082_vm0, %v5891_v62, %v1083_v52  ;;  %v1910_v4 = vsel %vm1908_vm13, %v5891_v62, %v1083_v52  ;;  %v1278_v31 = vxor.u32 2147483648, %v1277_v5  ;;  %3371 = vmatprep.mubr.f32.mxu1 %v6009_v8 }
 0x149   : > { %v7515_v19 = vshrl.u32 %v943_v17, 30  ;;  %v1088_v35 = vsel %vm1081_vm15, %v1084_v13, %v1087_v53  ;;  %v1914_v39 = vsel %vm1907_vm2, %v1910_v4, %v1913_v41  ;;  %v1115_v7 = vor.u32 %v1114_v6, %v1113_v58  ;;  %3818 = vperm.xlu1 %5873, %v3792_v16  }
 0x14a   : > { %v1118_v25 = vor.u32 %v1117_v40, %v1116_v54  ;;  %v1089_v62 = vsel %vm1078_vm3, nan, %v1088_v35  ;;  %v1915_v33 = vsel %vm1078_vm3, nan, %v1914_v39  ;;  %v1279_v28 = vsel %vm1196_vm6, %v1278_v31, %v1277_v5 }
 0x14b   : > { %v945_v34 = vshll.u32 %v7515_v19, 30  ;;  %v5592_v3 = vpack.c.bf16 %v1915_v33, %v1089_v62  ;;  %v1282_v58 = vsel %vm7401_vm11, %v6883_v44, %v1279_v28  ;;  %v1121_v54 = vor.u32 %v1120_v59, %v1119_v49  ;;  %5141 = vmatmul.mubr.msk.f32.gmra.mrb[14].mxu1 %vm3127_vm4, %v7331_v61 }
 0x14c   : > { %vm1122_vm7 = vcmp.lt.s32.totalorder %v7270_v14, 1  ;;  %5894 = vcosq.f32 %v1282_v58  ;;  %vm1125_vm8 = vcmp.lt.s32.totalorder %v7270_v14, 4  ;;  %v1287_v26 = vadd.s32 3, %v7468_v12  ;;  %3555 = vmatprep.mubr.f32.mxu1 %v6009_v8 }
 0x14d   : > { %v7538_v46 = vsub.s32 %v942_v43, %v945_v34  ;;  %v1130_v22 = vsel %vm1122_vm7, %v7503_v60, %v1112_v18  ;;  %5593 = vmatprep.subr.bf16.mxu0 %v5592_v3  ;;  %5896 = vsinq.f32 %v1282_v58  ;;  %vm1124_vm6 = vcmp.lt.s32.totalorder %v7270_v14, 3  ;;  %3828 = vperm.xlu1 %5873, %v3794_v15  }
 0x14e   : > { %v1131_v43 = vsel %vm1125_vm8, %v1118_v25, 920167782  ;;  %vm1123_vm9 = vcmp.lt.s32.totalorder %v7270_v14, 2  ;;  %v2112_v49 = vand.u32 3, %v7468_v12  ;;  %v1134_v5 = vsel %vm1122_vm7, %v1112_v18, %v1115_v7 }
 0x14f   : > { %v948_v6 = vsub.s32 0, %v7538_v46  ;;  %v1132_v40 = vsel %vm1124_vm6, %v1115_v7, %v1131_v43  ;;  %v1135_v17 = vsel %vm1125_vm8, %v1121_v54, 1326507024  ;;  %v1138_v53 = vshll.u32 %v1098_v30, 8 }
 0x150   : > { %v1133_v45 = vsel %vm1123_vm9, %v1130_v22, %v1132_v40  ;;  %v1288_v41 = vand.u32 3, %v1287_v26  ;;  %v1127_v59 = vsel %vm1125_vm8, %v1115_v7, 2102212464  ;;  %v1136_v13 = vsel %vm1124_vm6, %v1118_v25, %v1135_v17 }
 0x151   : > { %v4919_v52 = vmin.u32 %v948_v6, %v7538_v46  ;;  %v7572_v4 = vmul.u32.u64.low %v1138_v53, %v1133_v45  ;;  %v7573_v31 = vmul.u32.u64.high %v1138_v53, %v1133_v45, %v7572_v4  ;;  %vm1286_vm10 = vweird.f32 %v6883_v44 }
 0x152   : > { %v1106_v35 = vshrl.u32 %v6003_v42, %v7457_v47  ;;  %v1137_v9 = vsel %vm1123_vm9, %v1134_v5, %v1136_v13  ;;  %vm2113_vm11 = vcmp.lt.s32.totalorder %v2112_v49, 2  ;;  %vm2114_vm12 = vcmp.eq.s32.totalorder %v2112_v49, 0 }
 0x153   : > { %v950_v12 = vclz %v4919_v52  ;;  %v7581_v39 = vmul.u32.u64.low %v1138_v53, %v1137_v9  ;;  %v7582_v7 = vmul.u32.u64.high %v1138_v53, %v1137_v9, %v7581_v39  ;;  %vm2117_vm13 = vcmp.eq.s32.totalorder %v2112_v49, 2 }
 0x154   : > { %v1126_v25 = vsel %vm1122_vm7, %v1106_v35, %v7503_v60  ;;  %v1128_v16 = vsel %vm1124_vm6, %v1112_v18, %v1127_v59  ;;  %vm1289_vm14 = vcmp.lt.s32.totalorder %v1288_v41, 2  ;;  %vm1290_vm15 = vcmp.eq.s32.totalorder %v1288_v41, 0 }
 0x155   : > { %v4920_v30 = vadd.s32 4294967294, %v950_v12  ;;  %vm1293_vm0 = vcmp.eq.s32.totalorder %v1288_v41, 2  ;;  %v938_v33 = vadd.s32 %v7439_v55, %v7437_v23  ;;  %v1148_v34 = vadd.s32 1, %v7573_v31 }
 0x156   : > { %v5895_v62 = vpop.eup %5894  ;;  %v1129_v60 = vsel %vm1123_vm9, %v1126_v25, %v1128_v16  ;;  %vm1147_vm2 = vc.u32 %v7582_v7, %v7572_v4  ;;  %vm884_vm3 = vcmp.lt.s32.totalorder %v6633_v32, 0  ;;  %vm883_vm5 = vcmp.le.f32.partialorder %v882_v50, 0.7853982 }
 0x157   : > { %vm4921_vm1 = vcmp.lt.s32.totalorder %v4920_v30, 0  ;;  %v5897_v42 = vpop.eup %5896  ;;  %v1294_v47 = vxor.u32 2147483648, %v5895_v62  ;;  %v1145_v14 = vmul.u32 %v1138_v53, %v1129_v60  ;;  %v1149_v45 = vsel %vm1147_vm2, %v1148_v34, %v7573_v31 }
 0x158   : > { %v953_v28 = vsel %vm4921_vm1, 0, %v4920_v30  ;;  %v1291_v3 = vxor.u32 2147483648, %v5897_v42  ;;  %v968_v31 = vsub.s32 4, %v7515_v19  ;;  %v1146_v50 = vadd.s32 %v7572_v4, %v7582_v7 }
 0x159   : > { %v954_v58 = vsub.s32 32, %v953_v28  ;;  %v958_v54 = vsub.s32 4294967266, %v953_v28  ;;  %v1295_v18 = vsel %vm1293_vm0, %v1294_v47, %v5897_v42  ;;  %v2119_v22 = vsel %vm2117_vm13, %v1294_v47, %v5897_v42 }
 0x15a   : > { %v955_v26 = vshll.u32 %v7538_v46, %v953_v28  ;;  %v1292_v43 = vsel %vm1290_vm15, %v5895_v62, %v1291_v3  ;;  %v2116_v23 = vsel %vm2114_vm12, %v5895_v62, %v1291_v3  ;;  %v1150_v12 = vadd.s32 %v1149_v45, %v1145_v14 }
 0x15b   : > { %v956_v55 = vshrl.u32 %v938_v33, %v954_v58  ;;  %v959_v15 = vadd.s32 127, %v958_v54  ;;  %v1296_v6 = vsel %vm1289_vm14, %v1292_v43, %v1295_v18  ;;  %v2120_v40 = vsel %vm2113_vm11, %v2116_v23, %v2119_v22 }
 0x15c   : > { %v1297_v52 = vsel %vm1286_vm10, nan, %v1296_v6  ;;  %v2121_v46 = vsel %vm1286_vm10, nan, %v2120_v40  ;;  %v1151_v35 = vadd.s32 536870912, %v1150_v12  ;;  %v969_v16 = vsel %vm884_vm3, %v968_v31, %v7515_v19 }
 0x15d   : > { %v957_v5 = vor.u32 %v956_v55, %v955_v26  ;;  %v960_v17 = vshll.u32 %v959_v15, 23  ;;  %v5596_v59 = vpack.c.bf16 %v2121_v46, %v1297_v52  ;;  %v971_v47 = vsel %vm883_vm5, 0, %v969_v16 }
 0x15e   : > { %v7607_v49 = vshrl.u32 %v1151_v35, 30  ;;  %v975_v34 = vadd.s32 3, %v971_v47  ;;  %v1803_v58 = vand.u32 3, %v971_v47  ;;  %vm974_vm13 = vweird.f32 %v6633_v32 }
 0x15f   : > { %v961_v13 = vor.u32 4788187, %v960_v17  ;;  %5597 = vmatprep.subr.bf16.mxu1 %v5596_v59  ;;  %v964_v9 = vcvt.s32.f32 %v957_v5  ;;  %vm1092_vm14 = vcmp.lt.s32.totalorder %v6643_v36, 0  ;;  %vm1091_vm15 = vcmp.le.f32.partialorder %v1090_v37, 0.7853982 }
 0x160   : > { %v1153_v30 = vshll.u32 %v7607_v49, 30  ;;  %v976_v54 = vand.u32 3, %v975_v34  ;;  %vm1805_vm8 = vcmp.eq.s32.totalorder %v1803_v58, 0  ;;  %vm1808_vm10 = vcmp.eq.s32.totalorder %v1803_v58, 2 }
 0x161   : > { %v962_v41 = vand.u32 2147483647, %v961_v13  ;;  %vm1804_vm12 = vcmp.lt.s32.totalorder %v1803_v58, 2 }
 0x162   : > { %v1154_v44 = vsub.s32 %v1150_v12, %v1153_v30  ;;  %vm978_vm6 = vcmp.eq.s32.totalorder %v976_v54, 0  ;;  %vm981_vm9 = vcmp.eq.s32.totalorder %v976_v54, 2  ;;  %vm977_vm11 = vcmp.lt.s32.totalorder %v976_v54, 2 }
 0x163   : > { %v965_v53 = vmul.f32 %v964_v9, %v962_v41 }
 0x164   : > { %v1156_v42 = vsub.s32 0, %v1154_v44 }
 0x165   : > { %v966_v39 = vxor.u32 2147483648, %v965_v53 }
 0x166   : > { %v4927_v33 = vmin.u32 %v1156_v42, %v1154_v44 }
 0x167   : > { %v967_v25 = vsel %vm884_vm3, %v966_v39, %v965_v53  ;;  %v1176_v53 = vsub.s32 4, %v7607_v49 }
 0x168   : > { %v970_v62 = vsel %vm883_vm5, %v6633_v32, %v967_v25  ;;  %v1158_v28 = vclz %v4927_v33 }
 0x169   : > { %5898 = vcosq.f32 %v970_v62  ;;  %v1177_v30 = vsel %vm1092_vm14, %v1176_v53, %v7607_v49 }
 0x16a   : > { %5900 = vsinq.f32 %v970_v62  ;;  %v4928_v3 = vadd.s32 4294967294, %v1158_v28 }
 0x16c   : > { %vm4929_vm7 = vcmp.lt.s32.totalorder %v4928_v3, 0 }
 0x16d   : > { %v1161_v60 = vsel %vm4929_vm7, 0, %v4928_v3 }
 0x16e   : > { %v1162_v18 = vsub.s32 32, %v1161_v60  ;;  %v1166_v22 = vsub.s32 4294967266, %v1161_v60  ;;  %v1163_v23 = vshll.u32 %v1154_v44, %v1161_v60  ;;  %v1179_v44 = vsel %vm1091_vm15, 0, %v1177_v30 }
 0x16f   : > { %v1183_v25 = vadd.s32 3, %v1179_v44  ;;  %v2009_v49 = vand.u32 3, %v1179_v44 }
 0x170   : > { %v1164_v55 = vshrl.u32 %v1146_v50, %v1162_v18  ;;  %v1167_v15 = vadd.s32 127, %v1166_v22 }
 0x171   : > { %v1184_v37 = vand.u32 3, %v1183_v25  ;;  %vm2014_vm1 = vcmp.eq.s32.totalorder %v2009_v49, 2  ;;  %vm2011_vm3 = vcmp.eq.s32.totalorder %v2009_v49, 0  ;;  %vm2010_vm7 = vcmp.lt.s32.totalorder %v2009_v49, 2 }
 0x172   : > { %v1165_v45 = vor.u32 %v1164_v55, %v1163_v23  ;;  %v1168_v52 = vshll.u32 %v1167_v15, 23 }
 0x173   : > { %v5899_v19 = vpop.eup %5898  ;;  %vm1189_vm0 = vcmp.eq.s32.totalorder %v1184_v37, 2  ;;  %vm1186_vm2 = vcmp.eq.s32.totalorder %v1184_v37, 0  ;;  %vm1185_vm5 = vcmp.lt.s32.totalorder %v1184_v37, 2 }
 0x174   : > { %v5901_v26 = vpop.eup %5900  ;;  %v982_v43 = vxor.u32 2147483648, %v5899_v19  ;;  %v1169_v17 = vor.u32 4788187, %v1168_v52  ;;  %v1172_v41 = vcvt.s32.f32 %v1165_v45 }
 0x175   : > { %v979_v6 = vxor.u32 2147483648, %v5901_v26 }
 0x176   : > { %v983_v40 = vsel %vm981_vm9, %v982_v43, %v5901_v26  ;;  %v1810_v14 = vsel %vm1808_vm10, %v982_v43, %v5901_v26  ;;  %v1170_v35 = vand.u32 2147483647, %v1169_v17 }
 0x177   : > { %v980_v46 = vsel %vm978_vm6, %v5899_v19, %v979_v6  ;;  %v1807_v4 = vsel %vm1805_vm8, %v5899_v19, %v979_v6  ;;  %vm1182_vm8 = vweird.f32 %v6643_v36 }
 0x178   : > { %v984_v7 = vsel %vm977_vm11, %v980_v46, %v983_v40  ;;  %v1811_v5 = vsel %vm1804_vm12, %v1807_v4, %v1810_v14  ;;  %v1173_v9 = vmul.f32 %v1172_v41, %v1170_v35 }
 0x179   : > { %v985_v59 = vsel %vm974_vm13, nan, %v984_v7  ;;  %v1812_v12 = vsel %vm974_vm13, nan, %v1811_v5 }
 0x17a   : > { %v5594_v13 = vpack.c.bf16 %v1812_v12, %v985_v59  ;;  %v1174_v31 = vxor.u32 2147483648, %v1173_v9 }
 0x17c   : > { %5595 = vmatpush1.bf16.msra.mxu0 %v5594_v13  ;;  %v1175_v32 = vsel %vm1092_vm14, %v1174_v31, %v1173_v9 }
 0x17d   : > { %v1178_v39 = vsel %vm1091_vm15, %v6643_v36, %v1175_v32 }
 0x17e   : > { %5902 = vcosq.f32 %v1178_v39 }
 0x17f   : > { %5142 = vmatmul.mubr.msk.f32.vlgmr.msra.gmra.mrb[16].mxu0 %vm3127_vm4, %v7164_v63  ;;  %5904 = vsinq.f32 %v1178_v39 }
 0x180   : > { %3448 = vmatprep.mubr.f32.mxu0 %v6009_v8 }
 0x183   : > { %5143 = vmatmul.mubr.msk.f32.gmra.mrb[18].mxu0 %vm3127_vm4, %v7192_v20 }
 0x184   : > { %3454 = vmatprep.mubr.f32.mxu0 %v6009_v8 }
 0x187   : > { %5144 = vmatmul.mubr.msk.f32.gmra.mrb[20].mxu0 %vm3127_vm4, %v7211_v48 }
 0x188   : > { %3460 = vmatprep.mubr.f32.mxu0 %v6009_v8  ;;  %v5903_v16 = vpop.eup %5902 }
 0x189   : > { %v5905_v62 = vpop.eup %5904  ;;  %v1190_v42 = vxor.u32 2147483648, %v5903_v16 }
 0x18a   : > { %v1187_v47 = vxor.u32 2147483648, %v5905_v62 }
 0x18b   : > { %5145 = vmatmul.mubr.msk.f32.gmra.mrb[22].mxu0 %vm3127_vm4, %v7232_v38  ;;  %v1191_v33 = vsel %vm1189_vm0, %v1190_v42, %v5905_v62  ;;  %v2016_v28 = vsel %vm2014_vm1, %v1190_v42, %v5905_v62 }
 0x18c   : > { %3466 = vmatprep.mubr.f32.mxu0 %v6009_v8  ;;  %v1188_v34 = vsel %vm1186_vm2, %v5903_v16, %v1187_v47  ;;  %v2013_v3 = vsel %vm2011_vm3, %v5903_v16, %v1187_v47 }
 0x18d   : > { %v1192_v58 = vsel %vm1185_vm5, %v1188_v34, %v1191_v33  ;;  %v2017_v54 = vsel %vm2010_vm7, %v2013_v3, %v2016_v28 }
 0x18e   : > { %v1193_v60 = vsel %vm1182_vm8, nan, %v1192_v58  ;;  %v2018_v50 = vsel %vm1182_vm8, nan, %v2017_v54 }
 0x18f   : > { %5146 = vmatmul.mubr.msk.f32.gmra.mrb[24].mxu0 %vm3127_vm4, %v7261_v11  ;;  %v5598_v18 = vpack.c.bf16 %v2018_v50, %v1193_v60 }
 0x190   : > { %3472 = vmatprep.mubr.f32.mxu0 %v6009_v8 }
 0x191   : > { %5599 = vmatpush1.bf16.msra.mxu1 %v5598_v18 }
 0x193   : > { %5147 = vmatmul.mubr.msk.f32.gmra.mrb[26].mxu0 %vm3127_vm4, %v7289_v0 }
 0x194   : > { %3478 = vmatprep.mubr.f32.mxu0 %v6009_v8  ;;  %5150 = vmatmul.mubr.msk.f32.vlgmr.msra.gmra.mrb[16].mxu1 %vm3127_vm4, %v7164_v63 }
 0x195   : > { %3561 = vmatprep.mubr.f32.mxu1 %v6009_v8 }
 0x197   : > { %5148 = vmatmul.mubr.msk.f32.gmra.mrb[28].mxu0 %vm3127_vm4, %v7305_v24 }
 0x198   : > { %3484 = vmatprep.mubr.f32.mxu0 %v6009_v8  ;;  %5151 = vmatmul.mubr.msk.f32.gmra.mrb[18].mxu1 %vm3127_vm4, %v7192_v20  ;;  %v7675_v20 = vpop.permute.xlu0 %3614 }
 0x199   : > { %3567 = vmatprep.mubr.f32.mxu1 %v6009_v8 }
 0x19b   : > { %5149 = vmatmul.mubr.msk.f32.gmra.mrb[30].mxu0 %vm3127_vm4, %v7331_v61 }
 0x19c   : > { %3925 = vmatprep.mubr.f32.mxu0 %v6009_v8  ;;  %5152 = vmatmul.mubr.msk.f32.gmra.mrb[20].mxu1 %vm3127_vm4, %v7211_v48  ;;  %v7686_v52 = vpop.permute.xlu0 %3629 }
 0x19d   : > { %3573 = vmatprep.mubr.f32.mxu1 %v6009_v8 }
 0x1a0   : > { %5153 = vmatmul.mubr.msk.f32.gmra.mrb[22].mxu1 %vm3127_vm4, %v7232_v38  ;;  %v7694_v39 = vpop.permute.xlu0 %3639 }
 0x1a1   : > { %3579 = vmatprep.mubr.f32.mxu1 %v6009_v8 }
 0x1a4   : > { %5154 = vmatmul.mubr.msk.f32.gmra.mrb[24].mxu1 %vm3127_vm4, %v7261_v11  ;;  %v7702_v50 = vpop.permute.xlu0 %3649 }
 0x1a5   : > { %3585 = vmatprep.mubr.f32.mxu1 %v6009_v8 }
 0x1a8   : > { %5155 = vmatmul.mubr.msk.f32.gmra.mrb[26].mxu1 %vm3127_vm4, %v7289_v0 }
 0x1a9   : > { %3591 = vmatprep.mubr.f32.mxu1 %v6009_v8 }
 0x1ac   : > { %5156 = vmatmul.mubr.msk.f32.gmra.mrb[28].mxu1 %vm3127_vm4, %v7305_v24 }
 0x1ad   : > { %3597 = vmatprep.mubr.f32.mxu1 %v6009_v8 }
 0x1b0   : > { %5157 = vmatmul.mubr.msk.f32.gmra.mrb[30].mxu1 %vm3127_vm4, %v7331_v61  ;;  %v7678_v38 = vpop.permute.xlu1 %3619  ;;  %vm3836_vm4 = vcmask 523264  }
 0x1b1   : > { %4038 = vmatprep.mubr.f32.mxu1 %v6009_v8 }
 0x1b4   : > { %v7683_v40 = vpop.permute.xlu1 %3624 }
 0x1b8   : > { %v7691_v31 = vpop.permute.xlu1 %3634 }
 0x1bc   : > { %v7699_v58 = vpop.permute.xlu1 %3644 }
 0x1e6   : > { %v3218_v36 = vpop.f32.mrb[0].mxu0 }
 0x1e7   : > { %v3220_v63 = vpop.f32.mrb[1].mxu0  ;;  %v3652_v48 = vadd.f32 %v7675_v20, %v3218_v36 }
 0x1e8   : > { %v3653_v11 = vadd.f32 %v7675_v20, %v3220_v63 }
 0x1e9   : > { %v3716_v26 = vmax.f32 %v3652_v48, 0.0 }
 0x1ea   : > { %v3224_v0 = vpop.f32.mrb[2].mxu0  ;;  %v3717_v43 = vmax.f32 %v3653_v11, 0.0 }
 0x1eb   : > { %v3660_v24 = vadd.f32 %v7678_v38, %v3224_v0  ;;  %v3226_v22 = vpop.f32.mrb[3].mxu0 }
 0x1ec   : > { %v3661_v19 = vadd.f32 %v7678_v38, %v3226_v22 }
 0x1ed   : > { %v3724_v61 = vmax.f32 %v3660_v24, 0.0 }
 0x1ee   : > { %v3725_v23 = vmax.f32 %v3661_v19, 0.0  ;;  %v3230_v55 = vpop.f32.mrb[4].mxu0 }
 0x1ef   : > { %v5602_v15 = vpack.c.bf16 %v3724_v61, %v3716_v26  ;;  %v3232_v6 = vpop.f32.mrb[5].mxu0  ;;  %v3668_v45 = vadd.f32 %v7683_v40, %v3230_v55 }
 0x1f0   : > { %v5600_v14 = vpack.c.bf16 %v3725_v23, %v3717_v43  ;;  %v3669_v46 = vadd.f32 %v7683_v40, %v3232_v6 }
 0x1f1   : > { %v3732_v59 = vmax.f32 %v3668_v45, 0.0 }
 0x1f2   : > { %v3236_v4 = vpop.f32.mrb[6].mxu0  ;;  %5601 = vmatprep.subr.bf16.mxu0 %v5600_v14  ;;  %v3733_v13 = vmax.f32 %v3669_v46, 0.0 }
 0x1f3   : > { %v3676_v7 = vadd.f32 %v7686_v52, %v3236_v4  ;;  %v3238_v5 = vpop.f32.mrb[7].mxu0  ;;  %5603 = vmatpush1.bf16.msra.mxu0 %v5602_v15 }
 0x1f4   : > { %v3677_v17 = vadd.f32 %v7686_v52, %v3238_v5 }
 0x1f5   : > { %v3740_v12 = vmax.f32 %v3676_v7, 0.0 }
 0x1f6   : > { %v3741_v35 = vmax.f32 %v3677_v17, 0.0  ;;  %v3242_v41 = vpop.f32.mrb[8].mxu0 }
 0x1f7   : > { %v5606_v9 = vpack.c.bf16 %v3740_v12, %v3732_v59  ;;  %v3244_v53 = vpop.f32.mrb[9].mxu0  ;;  %v3684_v30 = vadd.f32 %v7691_v31, %v3242_v41  ;;  %v7714_v12 = vld [vmem:[%s8059_s6] sm:$0xff] }
 0x1f8   : > { %v5604_v32 = vpack.c.bf16 %v3741_v35, %v3733_v13  ;;  %v3685_v44 = vadd.f32 %v7691_v31, %v3244_v53 }
 0x1f9   : > { %v3748_v62 = vmax.f32 %v3684_v30, 0.0  ;;  %v7724_v30 = vld [vmem:[%s8059_s6 + $0x8] sm:$0xff] }
 0x1fa   : > { %v3248_v25 = vpop.f32.mrb[10].mxu0  ;;  %5605 = vmatprep.subr.bf16.mxu0 %v5604_v32  ;;  %v3749_v47 = vmax.f32 %v3685_v44, 0.0 }
 0x1fb   : > { %v3692_v37 = vadd.f32 %v7694_v39, %v3248_v25  ;;  %v3250_v49 = vpop.f32.mrb[11].mxu0  ;;  %5607 = vmatpush1.bf16.msra.mxu0 %v5606_v9 }
 0x1fc   : > { %v3693_v16 = vadd.f32 %v7694_v39, %v3250_v49 }
 0x1fd   : > { %v3756_v42 = vmax.f32 %v3692_v37, 0.0 }
 0x1fe   : > { %v3757_v33 = vmax.f32 %v3693_v16, 0.0  ;;  %v3254_v28 = vpop.f32.mrb[12].mxu0 }
 0x1ff   : > { %v5610_v34 = vpack.c.bf16 %v3756_v42, %v3748_v62  ;;  %v3256_v3 = vpop.f32.mrb[13].mxu0  ;;  %v3700_v60 = vadd.f32 %v7699_v58, %v3254_v28 }
 0x200   : > { %v5608_v54 = vpack.c.bf16 %v3757_v33, %v3749_v47  ;;  %v3701_v18 = vadd.f32 %v7699_v58, %v3256_v3  ;;  %v7734_v33 = vld [vmem:[%s8059_s6 + $0x10] sm:$0xff] }
 0x201   : > { %v3764_v22 = vmax.f32 %v3700_v60, 0.0 }
 0x202   : > { %v3260_v36 = vpop.f32.mrb[14].mxu0  ;;  %5609 = vmatprep.subr.bf16.mxu0 %v5608_v54  ;;  %v3331_v63 = vpop.f32.mrb[0].mxu1  ;;  %v3765_v61 = vmax.f32 %v3701_v18, 0.0 }
 0x203   : > { %v3708_v48 = vadd.f32 %v7702_v50, %v3260_v36  ;;  %v3262_v11 = vpop.f32.mrb[15].mxu0  ;;  %5611 = vmatpush1.bf16.msra.mxu0 %v5610_v34  ;;  %v3333_v0 = vpop.f32.mrb[1].mxu1  ;;  %v3654_v26 = vadd.f32 %v7675_v20, %v3331_v63  ;;  %v7744_v36 = vld [vmem:[%s8059_s6 + $0x18] sm:$0xff] }
 0x204   : > { %v3709_v24 = vadd.f32 %v7702_v50, %v3262_v11  ;;  %v3655_v23 = vadd.f32 %v7675_v20, %v3333_v0 }
 0x205   : > { %v3772_v19 = vmax.f32 %v3708_v48, 0.0  ;;  %v3718_v4 = vmax.f32 %v3654_v26, 0.0 }
 0x206   : > { %v3773_v43 = vmax.f32 %v3709_v24, 0.0  ;;  %v3337_v55 = vpop.f32.mrb[2].mxu1  ;;  %v3719_v5 = vmax.f32 %v3655_v23, 0.0 }
 0x207   : > { %v5614_v15 = vpack.c.bf16 %v3772_v19, %v3764_v22  ;;  %v3662_v6 = vadd.f32 %v7678_v38, %v3337_v55  ;;  %v3339_v14 = vpop.f32.mrb[3].mxu1 }
 0x208   : > { %v5612_v45 = vpack.c.bf16 %v3773_v43, %v3765_v61  ;;  %v3663_v46 = vadd.f32 %v7678_v38, %v3339_v14  ;;  %v7754_v61 = vld [vmem:[%s8059_s6 + $0x20] sm:$0xff] }
 0x209   : > { %v3726_v7 = vmax.f32 %v3662_v6, 0.0 }
 0x20a   : > { %5613 = vmatprep.subr.bf16.mxu0 %v5612_v45  ;;  %v3727_v17 = vmax.f32 %v3663_v46, 0.0  ;;  %v3343_v59 = vpop.f32.mrb[4].mxu1  ;;  %v7764_v45 = vld [vmem:[%s8059_s6 + $0x28] sm:$0xff] }
 0x20b   : > { %5615 = vmatpush1.bf16.msra.mxu0 %v5614_v15  ;;  %v5618_v13 = vpack.c.bf16 %v3726_v7, %v3718_v4  ;;  %v3345_v35 = vpop.f32.mrb[5].mxu1  ;;  %v3670_v9 = vadd.f32 %v7683_v40, %v3343_v59 }
 0x20c   : > { %v5616_v41 = vpack.c.bf16 %v3727_v17, %v3719_v5  ;;  %v3671_v53 = vadd.f32 %v7683_v40, %v3345_v35  ;;  %v7774_v35 = vld [vmem:[%s8059_s6 + $0x30] sm:$0xff] }
 0x20d   : > { %v3734_v49 = vmax.f32 %v3670_v9, 0.0 }
 0x20e   : > { %5158 = vmatmul.mubr.msk.f32.vlgmr.msra.gmra.mrb[32].mxu0 %vm3836_vm4, %v7714_v12  ;;  %v3349_v32 = vpop.f32.mrb[6].mxu1  ;;  %5617 = vmatprep.subr.bf16.mxu1 %v5616_v41  ;;  %v3735_v62 = vmax.f32 %v3671_v53, 0.0  ;;  %v7782_v53 = vld [vmem:[%s8059_s6 + $0x38] sm:$0xff] }
 0x20f   : > { %3931 = vmatprep.mubr.f32.mxu0 %v6009_v8  ;;  %v3678_v44 = vadd.f32 %v7686_v52, %v3349_v32  ;;  %v3351_v25 = vpop.f32.mrb[7].mxu1  ;;  %5619 = vmatpush1.bf16.msra.mxu1 %v5618_v13 }
 0x210   : > { %v3679_v37 = vadd.f32 %v7686_v52, %v3351_v25 }
 0x211   : > { %v3742_v16 = vmax.f32 %v3678_v44, 0.0 }
 0x212   : > { %5159 = vmatmul.mubr.msk.f32.gmra.mrb[34].mxu0 %vm3836_vm4, %v7724_v30  ;;  %v3743_v42 = vmax.f32 %v3679_v37, 0.0  ;;  %v3355_v47 = vpop.f32.mrb[8].mxu1 }
 0x213   : > { %3937 = vmatprep.mubr.f32.mxu0 %v6009_v8  ;;  %v5622_v28 = vpack.c.bf16 %v3742_v16, %v3734_v49  ;;  %v3357_v34 = vpop.f32.mrb[9].mxu1  ;;  %v3686_v54 = vadd.f32 %v7691_v31, %v3355_v47 }
 0x214   : > { %v5620_v3 = vpack.c.bf16 %v3743_v42, %v3735_v62  ;;  %v3687_v60 = vadd.f32 %v7691_v31, %v3357_v34 }
 0x215   : > { %v3750_v0 = vmax.f32 %v3686_v54, 0.0 }
 0x216   : > { %5160 = vmatmul.mubr.msk.f32.gmra.mrb[36].mxu0 %vm3836_vm4, %v7734_v33  ;;  %v3361_v18 = vpop.f32.mrb[10].mxu1  ;;  %5621 = vmatprep.subr.bf16.mxu1 %v5620_v3  ;;  %v3751_v22 = vmax.f32 %v3687_v60, 0.0 }
 0x217   : > { %3943 = vmatprep.mubr.f32.mxu0 %v6009_v8  ;;  %v3694_v63 = vadd.f32 %v7694_v39, %v3361_v18  ;;  %v3363_v48 = vpop.f32.mrb[11].mxu1  ;;  %5623 = vmatpush1.bf16.msra.mxu1 %v5622_v28 }
 0x218   : > { %v3695_v11 = vadd.f32 %v7694_v39, %v3363_v48 }
 0x219   : > { %v3758_v24 = vmax.f32 %v3694_v63, 0.0 }
 0x21a   : > { %5161 = vmatmul.mubr.msk.f32.gmra.mrb[38].mxu0 %vm3836_vm4, %v7744_v36  ;;  %v3759_v19 = vmax.f32 %v3695_v11, 0.0  ;;  %v3367_v26 = vpop.f32.mrb[12].mxu1 }
 0x21b   : > { %3949 = vmatprep.mubr.f32.mxu0 %v6009_v8  ;;  %v5626_v43 = vpack.c.bf16 %v3758_v24, %v3750_v0  ;;  %v3369_v23 = vpop.f32.mrb[13].mxu1  ;;  %v3702_v15 = vadd.f32 %v7699_v58, %v3367_v26 }
 0x21c   : > { %v5624_v55 = vpack.c.bf16 %v3759_v19, %v3751_v22  ;;  %v3703_v6 = vadd.f32 %v7699_v58, %v3369_v23 }
 0x21d   : > { %v3766_v5 = vmax.f32 %v3702_v15, 0.0 }
 0x21e   : > { %5162 = vmatmul.mubr.msk.f32.gmra.mrb[40].mxu0 %vm3836_vm4, %v7754_v61  ;;  %v3373_v14 = vpop.f32.mrb[14].mxu1  ;;  %5625 = vmatprep.subr.bf16.mxu1 %v5624_v55  ;;  %v3767_v59 = vmax.f32 %v3703_v6, 0.0 }
 0x21f   : > { %3955 = vmatprep.mubr.f32.mxu0 %v6009_v8  ;;  %v3710_v46 = vadd.f32 %v7702_v50, %v3373_v14  ;;  %v3375_v4 = vpop.f32.mrb[15].mxu1  ;;  %5627 = vmatpush1.bf16.msra.mxu1 %v5626_v43 }
 0x220   : > { %v3711_v7 = vadd.f32 %v7702_v50, %v3375_v4 }
 0x221   : > { %v3774_v17 = vmax.f32 %v3710_v46, 0.0 }
 0x222   : > { %5163 = vmatmul.mubr.msk.f32.gmra.mrb[42].mxu0 %vm3836_vm4, %v7764_v45  ;;  %v3775_v13 = vmax.f32 %v3711_v7, 0.0 }
 0x223   : > { %3961 = vmatprep.mubr.f32.mxu0 %v6009_v8  ;;  %v5630_v41 = vpack.c.bf16 %v3774_v17, %v3766_v5 }
 0x224   : > { %v5628_v9 = vpack.c.bf16 %v3775_v13, %v3767_v59 }
 0x226   : > { %5164 = vmatmul.mubr.msk.f32.gmra.mrb[44].mxu0 %vm3836_vm4, %v7774_v35  ;;  %5629 = vmatprep.subr.bf16.mxu1 %v5628_v9 }
 0x227   : > { %3967 = vmatprep.mubr.f32.mxu0 %v6009_v8  ;;  %5631 = vmatpush1.bf16.msra.mxu1 %v5630_v41 }
 0x22a   : > { %5165 = vmatmul.mubr.msk.f32.gmra.mrb[46].mxu0 %vm3836_vm4, %v7782_v53  ;;  %5166 = vmatmul.mubr.msk.f32.vlgmr.msra.gmra.mrb[32].mxu1 %vm3836_vm4, %v7714_v12 }
 0x22b   : > { %4151 = vmatprep.mubr.f32.mxu0 %v6009_v8  ;;  %4044 = vmatprep.mubr.f32.mxu1 %v6009_v8 }
 0x22e   : > { %5167 = vmatmul.mubr.msk.f32.gmra.mrb[34].mxu1 %vm3836_vm4, %v7724_v30 }
 0x22f   : > { %4050 = vmatprep.mubr.f32.mxu1 %v6009_v8 }
 0x232   : > { %5168 = vmatmul.mubr.msk.f32.gmra.mrb[36].mxu1 %vm3836_vm4, %v7734_v33 }
 0x233   : > { %4056 = vmatprep.mubr.f32.mxu1 %v6009_v8 }
 0x236   : > { %5169 = vmatmul.mubr.msk.f32.gmra.mrb[38].mxu1 %vm3836_vm4, %v7744_v36 }
 0x237   : > { %4062 = vmatprep.mubr.f32.mxu1 %v6009_v8 }
 0x23a   : > { %5170 = vmatmul.mubr.msk.f32.gmra.mrb[40].mxu1 %vm3836_vm4, %v7754_v61 }
 0x23b   : > { %4068 = vmatprep.mubr.f32.mxu1 %v6009_v8 }
 0x23e   : > { %5171 = vmatmul.mubr.msk.f32.gmra.mrb[42].mxu1 %vm3836_vm4, %v7764_v45 }
 0x23f   : > { %4074 = vmatprep.mubr.f32.mxu1 %v6009_v8 }
 0x242   : > { %5172 = vmatmul.mubr.msk.f32.gmra.mrb[44].mxu1 %vm3836_vm4, %v7774_v35 }
 0x243   : > { %4080 = vmatprep.mubr.f32.mxu1 %v6009_v8 }
 0x246   : > { %5173 = vmatmul.mubr.msk.f32.gmra.mrb[46].mxu1 %vm3836_vm4, %v7782_v53 }
 0x247   : > { %4264 = vmatprep.mubr.f32.mxu1 %v6009_v8 }
 0x252   : > { %v3444_v32 = vpop.f32.mrb[16].mxu0 }
 0x253   : > { %v3446_v44 = vpop.f32.mrb[17].mxu0  ;;  %v3656_v25 = vadd.f32 %v7675_v20, %v3444_v32 }
 0x254   : > { %v3657_v37 = vadd.f32 %v7675_v20, %v3446_v44 }
 0x255   : > { %v3720_v47 = vmax.f32 %v3656_v25, 0.0 }
 0x256   : > { %v3450_v49 = vpop.f32.mrb[18].mxu0  ;;  %v3721_v34 = vmax.f32 %v3657_v37, 0.0 }
 0x257   : > { %v3664_v16 = vadd.f32 %v7678_v38, %v3450_v49  ;;  %v3452_v62 = vpop.f32.mrb[19].mxu0 }
 0x258   : > { %v3665_v42 = vadd.f32 %v7678_v38, %v3452_v62 }
 0x259   : > { %v3728_v28 = vmax.f32 %v3664_v16, 0.0 }
 0x25a   : > { %v3729_v3 = vmax.f32 %v3665_v42, 0.0  ;;  %v3456_v54 = vpop.f32.mrb[20].mxu0 }
 0x25b   : > { %v5634_v60 = vpack.c.bf16 %v3728_v28, %v3720_v47  ;;  %v3458_v18 = vpop.f32.mrb[21].mxu0  ;;  %v3672_v48 = vadd.f32 %v7683_v40, %v3456_v54 }
 0x25c   : > { %v5632_v63 = vpack.c.bf16 %v3729_v3, %v3721_v34  ;;  %v3673_v11 = vadd.f32 %v7683_v40, %v3458_v18 }
 0x25d   : > { %v3736_v26 = vmax.f32 %v3672_v48, 0.0 }
 0x25e   : > { %v3462_v0 = vpop.f32.mrb[22].mxu0  ;;  %5633 = vmatprep.subr.bf16.mxu0 %v5632_v63  ;;  %v3737_v23 = vmax.f32 %v3673_v11, 0.0 }
 0x25f   : > { %v3680_v24 = vadd.f32 %v7686_v52, %v3462_v0  ;;  %v3464_v22 = vpop.f32.mrb[23].mxu0  ;;  %5635 = vmatpush1.bf16.msra.mxu0 %v5634_v60 }
 0x260   : > { %v3681_v19 = vadd.f32 %v7686_v52, %v3464_v22 }
 0x261   : > { %v3744_v43 = vmax.f32 %v3680_v24, 0.0 }
 0x262   : > { %v3745_v55 = vmax.f32 %v3681_v19, 0.0  ;;  %v3468_v15 = vpop.f32.mrb[24].mxu0 }
 0x263   : > { %v5638_v6 = vpack.c.bf16 %v3744_v43, %v3736_v26  ;;  %v3470_v14 = vpop.f32.mrb[25].mxu0  ;;  %v3688_v4 = vadd.f32 %v7691_v31, %v3468_v15 }
 0x264   : > { %v5636_v46 = vpack.c.bf16 %v3745_v55, %v3737_v23  ;;  %v3689_v7 = vadd.f32 %v7691_v31, %v3470_v14 }
 0x265   : > { %v3752_v41 = vmax.f32 %v3688_v4, 0.0 }
 0x266   : > { %v3474_v5 = vpop.f32.mrb[26].mxu0  ;;  %5637 = vmatprep.subr.bf16.mxu0 %v5636_v46  ;;  %v3753_v32 = vmax.f32 %v3689_v7, 0.0 }
 0x267   : > { %v3696_v17 = vadd.f32 %v7694_v39, %v3474_v5  ;;  %v3476_v59 = vpop.f32.mrb[27].mxu0  ;;  %5639 = vmatpush1.bf16.msra.mxu0 %v5638_v6  ;;  %v3557_v37 = vpop.f32.mrb[16].mxu1 }
 0x268   : > { %v3697_v13 = vadd.f32 %v7694_v39, %v3476_v59  ;;  %v3559_v62 = vpop.f32.mrb[17].mxu1  ;;  %v3658_v28 = vadd.f32 %v7675_v20, %v3557_v37 }
 0x269   : > { %v3760_v9 = vmax.f32 %v3696_v17, 0.0  ;;  %v3659_v54 = vadd.f32 %v7675_v20, %v3559_v62 }
 0x26a   : > { %v3761_v44 = vmax.f32 %v3697_v13, 0.0  ;;  %v3480_v25 = vpop.f32.mrb[28].mxu0  ;;  %v3722_v26 = vmax.f32 %v3658_v28, 0.0 }
 0x26b   : > { %v5642_v49 = vpack.c.bf16 %v3760_v9, %v3752_v41  ;;  %v3482_v16 = vpop.f32.mrb[29].mxu0  ;;  %v3704_v47 = vadd.f32 %v7699_v58, %v3480_v25  ;;  %v3563_v60 = vpop.f32.mrb[18].mxu1  ;;  %v3723_v15 = vmax.f32 %v3659_v54, 0.0 }
 0x26c   : > { %v5640_v42 = vpack.c.bf16 %v3761_v44, %v3753_v32  ;;  %v3705_v34 = vadd.f32 %v7699_v58, %v3482_v16  ;;  %v3666_v48 = vadd.f32 %v7678_v38, %v3563_v60  ;;  %v3565_v11 = vpop.f32.mrb[19].mxu1 }
 0x26d   : > { %v3667_v24 = vadd.f32 %v7678_v38, %v3565_v11  ;;  %v3768_v22 = vmax.f32 %v3704_v47, 0.0 }
 0x26e   : > { %v3486_v3 = vpop.f32.mrb[30].mxu0  ;;  %5641 = vmatprep.subr.bf16.mxu0 %v5640_v42  ;;  %v3730_v43 = vmax.f32 %v3666_v48, 0.0  ;;  %v3769_v23 = vmax.f32 %v3705_v34, 0.0 }
 0x26f   : > { %v3712_v18 = vadd.f32 %v7702_v50, %v3486_v3  ;;  %v3488_v63 = vpop.f32.mrb[31].mxu0  ;;  %5643 = vmatpush1.bf16.msra.mxu0 %v5642_v49  ;;  %v3731_v20 = vmax.f32 %v3667_v24, 0.0  ;;  %v3569_v6 = vpop.f32.mrb[20].mxu1 }
 0x270   : > { %v3713_v0 = vadd.f32 %v7702_v50, %v3488_v63  ;;  %v5650_v46 = vpack.c.bf16 %v3730_v43, %v3722_v26  ;;  %v3571_v4 = vpop.f32.mrb[21].mxu1  ;;  %v3674_v17 = vadd.f32 %v7683_v40, %v3569_v6 }
 0x271   : > { %v3776_v19 = vmax.f32 %v3712_v18, 0.0  ;;  %v5648_v5 = vpack.c.bf16 %v3731_v20, %v3723_v15  ;;  %v3675_v59 = vadd.f32 %v7683_v40, %v3571_v4 }
 0x272   : > { %v3777_v55 = vmax.f32 %v3713_v0, 0.0  ;;  %v3738_v32 = vmax.f32 %v3674_v17, 0.0 }
 0x273   : > { %v5646_v14 = vpack.c.bf16 %v3776_v19, %v3768_v22  ;;  %v3575_v38 = vpop.f32.mrb[22].mxu1  ;;  %5649 = vmatprep.subr.bf16.mxu1 %v5648_v5  ;;  %v3739_v25 = vmax.f32 %v3675_v59, 0.0 }
 0x274   : > { %v5644_v7 = vpack.c.bf16 %v3777_v55, %v3769_v23  ;;  %v3682_v13 = vadd.f32 %v7686_v52, %v3575_v38  ;;  %v3577_v41 = vpop.f32.mrb[23].mxu1  ;;  %5651 = vmatpush1.bf16.msra.mxu1 %v5650_v46 }
 0x275   : > { %v3683_v9 = vadd.f32 %v7686_v52, %v3577_v41 }
 0x276   : > { %5645 = vmatprep.subr.bf16.mxu0 %v5644_v7  ;;  %v3746_v44 = vmax.f32 %v3682_v13, 0.0 }
 0x277   : > { %5647 = vmatpush1.bf16.msra.mxu0 %v5646_v14  ;;  %v3747_v37 = vmax.f32 %v3683_v9, 0.0  ;;  %v3581_v49 = vpop.f32.mrb[24].mxu1 }
 0x278   : > { %v5654_v40 = vpack.c.bf16 %v3746_v44, %v3738_v32  ;;  %v3583_v16 = vpop.f32.mrb[25].mxu1  ;;  %v3690_v42 = vadd.f32 %v7691_v31, %v3581_v49 }
 0x279   : > { %v5652_v62 = vpack.c.bf16 %v3747_v37, %v3739_v25  ;;  %v3691_v52 = vadd.f32 %v7691_v31, %v3583_v16 }
 0x27a   : > { %5174 = vmatmul.mubr.msk.f32.vlgmr.msra.gmra.mrb[48].mxu0 %vm3836_vm4, %v7714_v12  ;;  %v3754_v54 = vmax.f32 %v3690_v42, 0.0 }
 0x27b   : > { %4157 = vmatprep.mubr.f32.mxu0 %v6009_v8  ;;  %v3587_v47 = vpop.f32.mrb[26].mxu1  ;;  %5653 = vmatprep.subr.bf16.mxu1 %v5652_v62  ;;  %v3755_v18 = vmax.f32 %v3691_v52, 0.0 }
 0x27c   : > { %v3698_v28 = vadd.f32 %v7694_v39, %v3587_v47  ;;  %v3589_v34 = vpop.f32.mrb[27].mxu1  ;;  %5655 = vmatpush1.bf16.msra.mxu1 %v5654_v40 }
 0x27d   : > { %v3699_v3 = vadd.f32 %v7694_v39, %v3589_v34 }
 0x27e   : > { %5175 = vmatmul.mubr.msk.f32.gmra.mrb[50].mxu0 %vm3836_vm4, %v7724_v30  ;;  %v3762_v60 = vmax.f32 %v3698_v28, 0.0 }
 0x27f   : > { %4163 = vmatprep.mubr.f32.mxu0 %v6009_v8  ;;  %v3763_v63 = vmax.f32 %v3699_v3, 0.0  ;;  %v3593_v48 = vpop.f32.mrb[28].mxu1 }
 0x280   : > { %v5658_v31 = vpack.c.bf16 %v3762_v60, %v3754_v54  ;;  %v3595_v11 = vpop.f32.mrb[29].mxu1  ;;  %v3706_v24 = vadd.f32 %v7699_v58, %v3593_v48 }
 0x281   : > { %v5656_v0 = vpack.c.bf16 %v3763_v63, %v3755_v18  ;;  %v3707_v39 = vadd.f32 %v7699_v58, %v3595_v11 }
 0x282   : > { %5176 = vmatmul.mubr.msk.f32.gmra.mrb[52].mxu0 %vm3836_vm4, %v7734_v33  ;;  %v3770_v23 = vmax.f32 %v3706_v24, 0.0 }
 0x283   : > { %4169 = vmatprep.mubr.f32.mxu0 %v6009_v8  ;;  %v3599_v22 = vpop.f32.mrb[30].mxu1  ;;  %5657 = vmatprep.subr.bf16.mxu1 %v5656_v0  ;;  %v3771_v15 = vmax.f32 %v3707_v39, 0.0 }
 0x284   : > { %v3714_v19 = vadd.f32 %v7702_v50, %v3599_v22  ;;  %v3601_v26 = vpop.f32.mrb[31].mxu1  ;;  %5659 = vmatpush1.bf16.msra.mxu1 %v5658_v31 }
 0x285   : > { %v3715_v43 = vadd.f32 %v7702_v50, %v3601_v26 }
 0x286   : > { %5177 = vmatmul.mubr.msk.f32.gmra.mrb[54].mxu0 %vm3836_vm4, %v7744_v36  ;;  %v3778_v55 = vmax.f32 %v3714_v19, 0.0 }
 0x287   : > { %4175 = vmatprep.mubr.f32.mxu0 %v6009_v8  ;;  %v3779_v20 = vmax.f32 %v3715_v43, 0.0 }
 0x288   : > { %v5662_v58 = vpack.c.bf16 %v3778_v55, %v3770_v23 }
 0x289   : > { %v5660_v6 = vpack.c.bf16 %v3779_v20, %v3771_v15 }
 0x28a   : > { %5178 = vmatmul.mubr.msk.f32.gmra.mrb[56].mxu0 %vm3836_vm4, %v7754_v61 }
 0x28b   : > { %4181 = vmatprep.mubr.f32.mxu0 %v6009_v8  ;;  %5661 = vmatprep.subr.bf16.mxu1 %v5660_v6 }
 0x28c   : > { %5663 = vmatpush1.bf16.msra.mxu1 %v5662_v58 }
 0x28e   : > { %5179 = vmatmul.mubr.msk.f32.gmra.mrb[58].mxu0 %vm3836_vm4, %v7764_v45 }
 0x28f   : > { %4187 = vmatprep.mubr.f32.mxu0 %v6009_v8  ;;  %5182 = vmatmul.mubr.msk.f32.vlgmr.msra.gmra.mrb[48].mxu1 %vm3836_vm4, %v7714_v12 }
 0x290   : > { %4270 = vmatprep.mubr.f32.mxu1 %v6009_v8 }
 0x292   : > { %5180 = vmatmul.mubr.msk.f32.gmra.mrb[60].mxu0 %vm3836_vm4, %v7774_v35 }
 0x293   : > { %4193 = vmatprep.mubr.f32.mxu0 %v6009_v8  ;;  %5183 = vmatmul.mubr.msk.f32.gmra.mrb[50].mxu1 %vm3836_vm4, %v7724_v30  ;;  %v7891_v30 = vpop.permute.xlu1 %3798 }
 0x294   : > { %4276 = vmatprep.mubr.f32.mxu1 %v6009_v8 }
 0x296   : > { %5181 = vmatmul.mubr.msk.f32.gmra.mrb[62].mxu0 %vm3836_vm4, %v7782_v53 }
 0x297   : > { %4486 = vmatprep.mubr.f32.mxu0 %v6009_v8  ;;  %5184 = vmatmul.mubr.msk.f32.gmra.mrb[52].mxu1 %vm3836_vm4, %v7734_v33  ;;  %v7899_v13 = vpop.permute.xlu1 %3808 }
 0x298   : > { %4282 = vmatprep.mubr.f32.mxu1 %v6009_v8 }
 0x29b   : > { %5185 = vmatmul.mubr.msk.f32.gmra.mrb[54].mxu1 %vm3836_vm4, %v7744_v36  ;;  %v7894_v36 = vpop.permute.xlu0 %3803  ;;  %v7907_v3 = vpop.permute.xlu1 %3818 }
 0x29c   : > { %4288 = vmatprep.mubr.f32.mxu1 %v6009_v8 }
 0x29f   : > { %5186 = vmatmul.mubr.msk.f32.gmra.mrb[56].mxu1 %vm3836_vm4, %v7754_v61  ;;  %v7902_v32 = vpop.permute.xlu0 %3813  ;;  %v7915_v55 = vpop.permute.xlu1 %3828 }
 0x2a0   : > { %4294 = vmatprep.mubr.f32.mxu1 %v6009_v8 }
 0x2a3   : > { %5187 = vmatmul.mubr.msk.f32.gmra.mrb[58].mxu1 %vm3836_vm4, %v7764_v45  ;;  %v7910_v18 = vpop.permute.xlu0 %3823 }
 0x2a4   : > { %4300 = vmatprep.mubr.f32.mxu1 %v6009_v8 }
 0x2a7   : > { %5188 = vmatmul.mubr.msk.f32.gmra.mrb[60].mxu1 %vm3836_vm4, %v7774_v35  ;;  %v7918_v58 = vpop.permute.xlu0 %3833 }
 0x2a8   : > { %4306 = vmatprep.mubr.f32.mxu1 %v6009_v8 }
 0x2ab   : > { %5189 = vmatmul.mubr.msk.f32.gmra.mrb[62].mxu1 %vm3836_vm4, %v7782_v53 }
 0x2ac   : > { %4557 = vmatprep.mubr.f32.mxu1 %v6009_v8 }
 0x2e1   : > { %v3927_v50 = vpop.f32.mrb[32].mxu0 }
 0x2e2   : > { %v3929_v12 = vpop.f32.mrb[33].mxu0  ;;  %v3928_v33 = vadd.f32 %v3927_v50, %v7891_v30 }
 0x2e3   : > { %v3930_v61 = vadd.f32 %v3929_v12, %v7891_v30 }
 0x2e4   : > { %v4313_v4 = vmax.f32 %v3928_v33, 0.0 }
 0x2e5   : > { %v3933_v45 = vpop.f32.mrb[34].mxu0  ;;  %v4314_v7 = vmax.f32 %v3930_v61, 0.0 }
 0x2e6   : > { %v3934_v35 = vadd.f32 %v3933_v45, %v7894_v36  ;;  %v3935_v14 = vpop.f32.mrb[35].mxu0 }
 0x2e7   : > { %v3936_v46 = vadd.f32 %v3935_v14, %v7894_v36 }
 0x2e8   : > { %v4321_v53 = vmax.f32 %v3934_v35, 0.0 }
 0x2e9   : > { %v4322_v5 = vmax.f32 %v3936_v46, 0.0  ;;  %v3939_v17 = vpop.f32.mrb[36].mxu0 }
 0x2ea   : > { %v5666_v59 = vpack.c.bf16 %v4321_v53, %v4313_v4  ;;  %v3941_v38 = vpop.f32.mrb[37].mxu0  ;;  %v3940_v9 = vadd.f32 %v3939_v17, %v7899_v13 }
 0x2eb   : > { %v5664_v41 = vpack.c.bf16 %v4322_v5, %v4314_v7  ;;  %v3942_v44 = vadd.f32 %v3941_v38, %v7899_v13 }
 0x2ec   : > { %v4329_v16 = vmax.f32 %v3940_v9, 0.0 }
 0x2ed   : > { %v3945_v25 = vpop.f32.mrb[38].mxu0  ;;  %5665 = vmatprep.subr.bf16.mxu0 %v5664_v41  ;;  %v4330_v42 = vmax.f32 %v3942_v44, 0.0 }
 0x2ee   : > { %v3946_v37 = vadd.f32 %v3945_v25, %v7902_v32  ;;  %v3947_v49 = vpop.f32.mrb[39].mxu0  ;;  %5667 = vmatpush1.bf16.msra.mxu0 %v5666_v59 }
 0x2ef   : > { %v3948_v40 = vadd.f32 %v3947_v49, %v7902_v32 }
 0x2f0   : > { %v4337_v62 = vmax.f32 %v3946_v37, 0.0 }
 0x2f1   : > { %v4338_v52 = vmax.f32 %v3948_v40, 0.0  ;;  %v3951_v47 = vpop.f32.mrb[40].mxu0 }
 0x2f2   : > { %v5670_v28 = vpack.c.bf16 %v4337_v62, %v4329_v16  ;;  %v3953_v34 = vpop.f32.mrb[41].mxu0  ;;  %v3952_v60 = vadd.f32 %v3951_v47, %v7907_v3  ;;  %v7930_v62 = vld [vmem:[%s8061_s8] sm:$0x1] }
 0x2f3   : > { %v5668_v54 = vpack.c.bf16 %v4338_v52, %v4330_v42  ;;  %v3954_v63 = vadd.f32 %v3953_v34, %v7907_v3 }
 0x2f4   : > { %v4345_v24 = vmax.f32 %v3952_v60, 0.0 }
 0x2f5   : > { %v3957_v48 = vpop.f32.mrb[42].mxu0  ;;  %5669 = vmatprep.subr.bf16.mxu0 %v5668_v54  ;;  %v4346_v22 = vmax.f32 %v3954_v63, 0.0 }
 0x2f6   : > { %v3958_v31 = vadd.f32 %v3957_v48, %v7910_v18  ;;  %v3959_v11 = vpop.f32.mrb[43].mxu0  ;;  %5671 = vmatpush1.bf16.msra.mxu0 %v5670_v28 }
 0x2f7   : > { %v3960_v0 = vadd.f32 %v3959_v11, %v7910_v18 }
 0x2f8   : > { %v4353_v39 = vmax.f32 %v3958_v31, 0.0 }
 0x2f9   : > { %v4354_v19 = vmax.f32 %v3960_v0, 0.0  ;;  %v3963_v26 = vpop.f32.mrb[44].mxu0 }
 0x2fa   : > { %v5674_v43 = vpack.c.bf16 %v4353_v39, %v4345_v24  ;;  %v3965_v23 = vpop.f32.mrb[45].mxu0  ;;  %v3964_v20 = vadd.f32 %v3963_v26, %v7915_v55 }
 0x2fb   : > { %v5672_v15 = vpack.c.bf16 %v4354_v19, %v4346_v22  ;;  %v3966_v6 = vadd.f32 %v3965_v23, %v7915_v55 }
 0x2fc   : > { %v4361_v14 = vmax.f32 %v3964_v20, 0.0 }
 0x2fd   : > { %v3969_v50 = vpop.f32.mrb[46].mxu0  ;;  %5673 = vmatprep.subr.bf16.mxu0 %v5672_v15  ;;  %v4040_v12 = vpop.f32.mrb[32].mxu1  ;;  %v4362_v53 = vmax.f32 %v3966_v6, 0.0 }
 0x2fe   : > { %v3970_v33 = vadd.f32 %v3969_v50, %v7918_v58  ;;  %v3971_v61 = vpop.f32.mrb[47].mxu0  ;;  %5675 = vmatpush1.bf16.msra.mxu0 %v5674_v43  ;;  %v4042_v45 = vpop.f32.mrb[33].mxu1  ;;  %v4041_v4 = vadd.f32 %v4040_v12, %v7891_v30 }
 0x2ff   : > { %v3972_v35 = vadd.f32 %v3971_v61, %v7918_v58  ;;  %v4043_v5 = vadd.f32 %v4042_v45, %v7891_v30 }
 0x300   : > { %v4369_v46 = vmax.f32 %v3970_v33, 0.0  ;;  %v4315_v25 = vmax.f32 %v4041_v4, 0.0 }
 0x301   : > { %v4370_v7 = vmax.f32 %v3972_v35, 0.0  ;;  %v4046_v17 = vpop.f32.mrb[34].mxu1  ;;  %v4316_v49 = vmax.f32 %v4043_v5, 0.0 }
 0x302   : > { %v5678_v59 = vpack.c.bf16 %v4369_v46, %v4361_v14  ;;  %v4047_v38 = vadd.f32 %v4046_v17, %v7894_v36  ;;  %v4048_v41 = vpop.f32.mrb[35].mxu1 }
 0x303   : > { %v5676_v9 = vpack.c.bf16 %v4370_v7, %v4362_v53  ;;  %v4049_v44 = vadd.f32 %v4048_v41, %v7894_v36 }
 0x304   : > { %v4323_v37 = vmax.f32 %v4047_v38, 0.0 }
 0x305   : > { %5677 = vmatprep.subr.bf16.mxu0 %v5676_v9  ;;  %v4324_v40 = vmax.f32 %v4049_v44, 0.0  ;;  %v4052_v16 = vpop.f32.mrb[36].mxu1 }
 0x306   : > { %5679 = vmatpush1.bf16.msra.mxu0 %v5678_v59  ;;  %v5682_v42 = vpack.c.bf16 %v4323_v37, %v4315_v25  ;;  %v4054_v52 = vpop.f32.mrb[37].mxu1  ;;  %v4053_v28 = vadd.f32 %v4052_v16, %v7899_v13 }
 0x307   : > { %v5680_v47 = vpack.c.bf16 %v4324_v40, %v4316_v49  ;;  %v4055_v34 = vadd.f32 %v4054_v52, %v7899_v13 }
 0x308   : > { %v4331_v31 = vmax.f32 %v4053_v28, 0.0 }
 0x309   : > { %5190 = vmatmul.mubr.msk.f32.vlgmr.msra.gmra.mrb[64].mxu0 %vm3836_vm4, %v7930_v62  ;;  %v4058_v54 = vpop.f32.mrb[38].mxu1  ;;  %5681 = vmatprep.subr.bf16.mxu1 %v5680_v47  ;;  %v4332_v0 = vmax.f32 %v4055_v34, 0.0 }
 0x30a   : > { %4628 = vmatprep.mubr.f32.mxu0 %v6009_v8  ;;  %v4059_v60 = vadd.f32 %v4058_v54, %v7902_v32  ;;  %v4060_v63 = vpop.f32.mrb[39].mxu1  ;;  %5683 = vmatpush1.bf16.msra.mxu1 %v5682_v42 }
 0x30b   : > { %v4061_v48 = vadd.f32 %v4060_v63, %v7902_v32 }
 0x30c   : > { %v4339_v11 = vmax.f32 %v4059_v60, 0.0 }
 0x30d   : > { %v4340_v24 = vmax.f32 %v4061_v48, 0.0  ;;  %v4064_v39 = vpop.f32.mrb[40].mxu1 }
 0x30e   : > { %v5686_v22 = vpack.c.bf16 %v4339_v11, %v4331_v31  ;;  %v4066_v19 = vpop.f32.mrb[41].mxu1  ;;  %v4065_v43 = vadd.f32 %v4064_v39, %v7907_v3 }
 0x30f   : > { %v5684_v26 = vpack.c.bf16 %v4340_v24, %v4332_v0  ;;  %v4067_v23 = vadd.f32 %v4066_v19, %v7907_v3 }
 0x310   : > { %v4347_v12 = vmax.f32 %v4065_v43, 0.0 }
 0x311   : > { %v4070_v15 = vpop.f32.mrb[42].mxu1  ;;  %5685 = vmatprep.subr.bf16.mxu1 %v5684_v26  ;;  %v4348_v61 = vmax.f32 %v4067_v23, 0.0 }
 0x312   : > { %v4071_v20 = vadd.f32 %v4070_v15, %v7910_v18  ;;  %v4072_v6 = vpop.f32.mrb[43].mxu1  ;;  %5687 = vmatpush1.bf16.msra.mxu1 %v5686_v22 }
 0x313   : > { %v4073_v50 = vadd.f32 %v4072_v6, %v7910_v18 }
 0x314   : > { %v4355_v33 = vmax.f32 %v4071_v20, 0.0 }
 0x315   : > { %v4356_v45 = vmax.f32 %v4073_v50, 0.0  ;;  %v4076_v35 = vpop.f32.mrb[44].mxu1 }
 0x316   : > { %v5690_v14 = vpack.c.bf16 %v4355_v33, %v4347_v12  ;;  %v4078_v46 = vpop.f32.mrb[45].mxu1  ;;  %v4077_v53 = vadd.f32 %v4076_v35, %v7915_v55 }
 0x317   : > { %v5688_v4 = vpack.c.bf16 %v4356_v45, %v4348_v61  ;;  %v4079_v7 = vadd.f32 %v4078_v46, %v7915_v55 }
 0x318   : > { %v4363_v41 = vmax.f32 %v4077_v53, 0.0 }
 0x319   : > { %v4082_v5 = vpop.f32.mrb[46].mxu1  ;;  %5689 = vmatprep.subr.bf16.mxu1 %v5688_v4  ;;  %v4364_v44 = vmax.f32 %v4079_v7, 0.0 }
 0x31a   : > { %v4083_v17 = vadd.f32 %v4082_v5, %v7918_v58  ;;  %v4084_v59 = vpop.f32.mrb[47].mxu1  ;;  %5691 = vmatpush1.bf16.msra.mxu1 %v5690_v14 }
 0x31b   : > { %v4085_v38 = vadd.f32 %v4084_v59, %v7918_v58 }
 0x31c   : > { %v4371_v9 = vmax.f32 %v4083_v17, 0.0 }
 0x31d   : > { %v4372_v25 = vmax.f32 %v4085_v38, 0.0 }
 0x31e   : > { %v5694_v37 = vpack.c.bf16 %v4371_v9, %v4363_v41 }
 0x31f   : > { %v5692_v49 = vpack.c.bf16 %v4372_v25, %v4364_v44 }
 0x321   : > { %5693 = vmatprep.subr.bf16.mxu1 %v5692_v49 }
 0x322   : > { %5695 = vmatpush1.bf16.msra.mxu1 %v5694_v37 }
 0x325   : > { %5191 = vmatmul.mubr.msk.f32.vlgmr.msra.gmra.mrb[64].mxu1 %vm3836_vm4, %v7930_v62 }
 0x326   : > { %4699 = vmatprep.mubr.f32.mxu1 %v6009_v8 }
 0x34d   : > { %v4153_v40 = vpop.f32.mrb[48].mxu0 }
 0x34e   : > { %v4155_v16 = vpop.f32.mrb[49].mxu0  ;;  %v4154_v42 = vadd.f32 %v4153_v40, %v7891_v30 }
 0x34f   : > { %v4156_v52 = vadd.f32 %v4155_v16, %v7891_v30 }
 0x350   : > { %v4317_v60 = vmax.f32 %v4154_v42, 0.0 }
 0x351   : > { %v4159_v47 = vpop.f32.mrb[50].mxu0  ;;  %v4318_v48 = vmax.f32 %v4156_v52, 0.0 }
 0x352   : > { %v4160_v28 = vadd.f32 %v4159_v47, %v7894_v36  ;;  %v4161_v34 = vpop.f32.mrb[51].mxu0 }
 0x353   : > { %v4162_v54 = vadd.f32 %v4161_v34, %v7894_v36 }
 0x354   : > { %v4325_v63 = vmax.f32 %v4160_v28, 0.0 }
 0x355   : > { %v4326_v31 = vmax.f32 %v4162_v54, 0.0  ;;  %v4165_v11 = vpop.f32.mrb[52].mxu0 }
 0x356   : > { %v5698_v0 = vpack.c.bf16 %v4325_v63, %v4317_v60  ;;  %v4167_v24 = vpop.f32.mrb[53].mxu0  ;;  %v4166_v39 = vadd.f32 %v4165_v11, %v7899_v13 }
 0x357   : > { %v5696_v8 = vpack.c.bf16 %v4326_v31, %v4318_v48  ;;  %v4168_v22 = vadd.f32 %v4167_v24, %v7899_v13 }
 0x358   : > { %v4333_v15 = vmax.f32 %v4166_v39, 0.0 }
 0x359   : > { %v4171_v19 = vpop.f32.mrb[54].mxu0  ;;  %5697 = vmatprep.subr.bf16.mxu0 %v5696_v8  ;;  %v4334_v6 = vmax.f32 %v4168_v22, 0.0 }
 0x35a   : > { %v4172_v26 = vadd.f32 %v4171_v19, %v7902_v32  ;;  %v4173_v43 = vpop.f32.mrb[55].mxu0  ;;  %5699 = vmatpush1.bf16.msra.mxu0 %v5698_v0 }
 0x35b   : > { %v4174_v23 = vadd.f32 %v4173_v43, %v7902_v32 }
 0x35c   : > { %v4341_v20 = vmax.f32 %v4172_v26, 0.0 }
 0x35d   : > { %v4342_v50 = vmax.f32 %v4174_v23, 0.0  ;;  %v4177_v12 = vpop.f32.mrb[56].mxu0 }
 0x35e   : > { %v5702_v33 = vpack.c.bf16 %v4341_v20, %v4333_v15  ;;  %v4179_v61 = vpop.f32.mrb[57].mxu0  ;;  %v4178_v35 = vadd.f32 %v4177_v12, %v7907_v3 }
 0x35f   : > { %v5700_v45 = vpack.c.bf16 %v4342_v50, %v4334_v6  ;;  %v4180_v14 = vadd.f32 %v4179_v61, %v7907_v3 }
 0x360   : > { %v4349_v5 = vmax.f32 %v4178_v35, 0.0 }
 0x361   : > { %v4183_v46 = vpop.f32.mrb[58].mxu0  ;;  %5701 = vmatprep.subr.bf16.mxu0 %v5700_v45  ;;  %v4350_v59 = vmax.f32 %v4180_v14, 0.0 }
 0x362   : > { %v4184_v4 = vadd.f32 %v4183_v46, %v7910_v18  ;;  %v4185_v53 = vpop.f32.mrb[59].mxu0  ;;  %5703 = vmatpush1.bf16.msra.mxu0 %v5702_v33  ;;  %v4266_v9 = vpop.f32.mrb[48].mxu1 }
 0x363   : > { %v4186_v7 = vadd.f32 %v4185_v53, %v7910_v18  ;;  %v4268_v37 = vpop.f32.mrb[49].mxu1  ;;  %v4267_v16 = vadd.f32 %v4266_v9, %v7891_v30 }
 0x364   : > { %v4357_v17 = vmax.f32 %v4184_v4, 0.0  ;;  %v4269_v47 = vadd.f32 %v4268_v37, %v7891_v30 }
 0x365   : > { %v4358_v38 = vmax.f32 %v4186_v7, 0.0  ;;  %v4189_v41 = vpop.f32.mrb[60].mxu0  ;;  %v4319_v24 = vmax.f32 %v4267_v16, 0.0 }
 0x366   : > { %v5706_v44 = vpack.c.bf16 %v4357_v17, %v4349_v5  ;;  %v4191_v25 = vpop.f32.mrb[61].mxu0  ;;  %v4190_v40 = vadd.f32 %v4189_v41, %v7915_v55  ;;  %v4272_v28 = vpop.f32.mrb[50].mxu1  ;;  %v4320_v19 = vmax.f32 %v4269_v47, 0.0 }
 0x367   : > { %v5704_v49 = vpack.c.bf16 %v4358_v38, %v4350_v59  ;;  %v4192_v42 = vadd.f32 %v4191_v25, %v7915_v55  ;;  %v4273_v60 = vadd.f32 %v4272_v28, %v7894_v36  ;;  %v4274_v63 = vpop.f32.mrb[51].mxu1 }
 0x368   : > { %v4275_v31 = vadd.f32 %v4274_v63, %v7894_v36  ;;  %v4365_v11 = vmax.f32 %v4190_v40, 0.0 }
 0x369   : > { %v4195_v52 = vpop.f32.mrb[62].mxu0  ;;  %5705 = vmatprep.subr.bf16.mxu0 %v5704_v49  ;;  %v4327_v8 = vmax.f32 %v4273_v60, 0.0  ;;  %v4366_v39 = vmax.f32 %v4192_v42, 0.0 }
 0x36a   : > { %v4196_v34 = vadd.f32 %v4195_v52, %v7918_v58  ;;  %v4197_v54 = vpop.f32.mrb[63].mxu0  ;;  %5707 = vmatpush1.bf16.msra.mxu0 %v5706_v44  ;;  %v4328_v30 = vmax.f32 %v4275_v31, 0.0  ;;  %v4278_v26 = vpop.f32.mrb[52].mxu1 }
 0x36b   : > { %v4198_v48 = vadd.f32 %v4197_v54, %v7918_v58  ;;  %v5714_v23 = vpack.c.bf16 %v4327_v8, %v4319_v24  ;;  %v4280_v15 = vpop.f32.mrb[53].mxu1  ;;  %v4279_v50 = vadd.f32 %v4278_v26, %v7899_v13 }
 0x36c   : > { %v4373_v0 = vmax.f32 %v4196_v34, 0.0  ;;  %v5712_v6 = vpack.c.bf16 %v4328_v30, %v4320_v19  ;;  %v4281_v12 = vadd.f32 %v4280_v15, %v7899_v13 }
 0x36d   : > { %v4374_v22 = vmax.f32 %v4198_v48, 0.0  ;;  %v4335_v35 = vmax.f32 %v4279_v50, 0.0 }
 0x36e   : > { %v5710_v43 = vpack.c.bf16 %v4373_v0, %v4365_v11  ;;  %v4284_v36 = vpop.f32.mrb[54].mxu1  ;;  %5713 = vmatprep.subr.bf16.mxu1 %v5712_v6  ;;  %v4336_v46 = vmax.f32 %v4281_v12, 0.0 }
 0x36f   : > { %v5708_v20 = vpack.c.bf16 %v4374_v22, %v4366_v39  ;;  %v4285_v33 = vadd.f32 %v4284_v36, %v7902_v32  ;;  %v4286_v61 = vpop.f32.mrb[55].mxu1  ;;  %5715 = vmatpush1.bf16.msra.mxu1 %v5714_v23 }
 0x370   : > { %v4287_v45 = vadd.f32 %v4286_v61, %v7902_v32 }
 0x371   : > { %5709 = vmatprep.subr.bf16.mxu0 %v5708_v20  ;;  %v4343_v14 = vmax.f32 %v4285_v33, 0.0 }
 0x372   : > { %5711 = vmatpush1.bf16.msra.mxu0 %v5710_v43  ;;  %v4344_v4 = vmax.f32 %v4287_v45, 0.0  ;;  %v4290_v53 = vpop.f32.mrb[56].mxu1 }
 0x373   : > { %v5718_v7 = vpack.c.bf16 %v4343_v14, %v4335_v35  ;;  %v4292_v5 = vpop.f32.mrb[57].mxu1  ;;  %v4291_v17 = vadd.f32 %v4290_v53, %v7907_v3 }
 0x374   : > { %v5716_v13 = vpack.c.bf16 %v4344_v4, %v4336_v46  ;;  %v4293_v59 = vadd.f32 %v4292_v5, %v7907_v3 }
 0x375   : > { %5192 = vmatmul.mubr.msk.f32.vlgmr.msra.gmra.mrb[66].mxu0 %vm3836_vm4, %v7930_v62  ;;  %v4351_v44 = vmax.f32 %v4291_v17, 0.0  ;;  %v6010_v17 = vmov 1966171168  }
 0x376   : > { %v4296_v38 = vpop.f32.mrb[58].mxu1  ;;  %5717 = vmatprep.subr.bf16.mxu1 %v5716_v13  ;;  %v4352_v37 = vmax.f32 %v4293_v59, 0.0 }
 0x377   : > { %v4297_v41 = vadd.f32 %v4296_v38, %v7910_v18  ;;  %v4298_v32 = vpop.f32.mrb[59].mxu1  ;;  %5719 = vmatpush1.bf16.msra.mxu1 %v5718_v7 }
 0x378   : > { %v4299_v9 = vadd.f32 %v4298_v32, %v7910_v18 }
 0x379   : > { %v4359_v25 = vmax.f32 %v4297_v41, 0.0 }
 0x37a   : > { %v4360_v49 = vmax.f32 %v4299_v9, 0.0  ;;  %v4302_v40 = vpop.f32.mrb[60].mxu1 }
 0x37b   : > { %v5722_v16 = vpack.c.bf16 %v4359_v25, %v4351_v44  ;;  %v4304_v42 = vpop.f32.mrb[61].mxu1  ;;  %v4303_v47 = vadd.f32 %v4302_v40, %v7915_v55 }
 0x37c   : > { %v5720_v52 = vpack.c.bf16 %v4360_v49, %v4352_v37  ;;  %v4305_v3 = vadd.f32 %v4304_v42, %v7915_v55  ;;  %v7987_v55 = vld [vmem:[%s6500_s21 + $0x2] ss:$4 sm:$0xff]  ;;  %s340_s21 = sand.u32 1, %s5992_s10  }
 0x37d   : > { %v4367_v60 = vmax.f32 %v4303_v47, 0.0  ;;  %v4382_v24 = vrot.slane %v7987_v55, %v6510_v21  ;;  %v4386_v8 = vrot.slane %v7987_v55, %v6519_v27  ;;  %v4390_v21 = vrot.slane %v7987_v55, %v6562_v51  ;;  %s4895_s29 = sshll.u32 %s340_s21, 3  ;;  %s4806_s24 = scalar_lea.sflag [#allocation3], %s340_s21 }
 0x37e   : > { %v4308_v28 = vpop.f32.mrb[62].mxu1  ;;  %5721 = vmatprep.subr.bf16.mxu1 %v5720_v52  ;;  %v4368_v48 = vmax.f32 %v4305_v3, 0.0  ;;  %v4394_v27 = vrot.slane %v7987_v55, %v6522_v29  ;;  %v4759_v29 = vunpack.c.l.s4 %v6010_v17  ;;  %v4398_v49 = vrot.slane %v7987_v55, %v6572_v56  ;;  %s342_s14 = scalar_lea.vmem [#allocation2], %s4895_s29 }
 0x37f   : > { %v4309_v34 = vadd.f32 %v4308_v28, %v7918_v58  ;;  %v4310_v54 = vpop.f32.mrb[63].mxu1  ;;  %5723 = vmatpush1.bf16.msra.mxu1 %v5722_v16  ;;  %v4402_v40 = vrot.slane %v7987_v55, %v6584_v1  ;;  %v4406_v56 = vrot.slane %v7987_v55, %v6575_v57  ;;  %v4410_v1 = vrot.slane %v7987_v55, %v6589_v2  ;;  %s4820_s13 = sshll.u32 %s342_s14, 4  ;;  %s8013_s13 = int_to_ptr.vmem [resolvable:$true] %s4820_s13 }
 0x380   : > { %v4311_v18 = vadd.f32 %v4310_v54, %v7918_v58  ;;  %v4760_v59 = vunpack.c.0.s8 %v4759_v29  ;;  %s5938_s25 = scalar_lea.vmem %s8013_s13, 128  ;;  %p5945_p1 = scmp.lt.s32.totalorder %s8013_s13, %s5943_s27 }
 0x381   : > { %v4375_v63 = vmax.f32 %v4309_v34, 0.0  ;;  %p5939_p12 = scmp.ne.s32.totalorder %s8013_s13, %s5938_s25  ;;  %p5946_p2 = scmp.lt.s32.totalorder %s5944_s28, %s5938_s25 }
 0x382   : > { %v4376_v31 = vmax.f32 %v4311_v18, 0.0  ;;  %v4763_v38 = vsub.s32 %v4760_v59, %v6486_v10 }
 0x383   : > { %v5726_v11 = vpack.c.bf16 %v4375_v63, %v4367_v60  ;;  %p5940_p13 = pnand %p5939_p12, %p6100_p5  ;;  %p5947_p3 = por %p5946_p2, %p5945_p1 }
 0x384   : > { %v5724_v0 = vpack.c.bf16 %v4376_v31, %v4368_v48 }
 0x385   : > { %p5941_p0 = pneg %p5940_p13 }
 0x386   : > { %5725 = vmatprep.subr.bf16.mxu1 %v5724_v0 }
 0x387   : > { %5727 = vmatpush1.bf16.msra.mxu1 %v5726_v11  ;;  %p5948_p4 = pnand %p5947_p3, %p5941_p0 }
 0x38a   : > { %5193 = vmatmul.mubr.msk.f32.vlgmr.msra.gmra.mrb[66].mxu1 %vm3836_vm4, %v7930_v62 }
 0x3dc   : > { %v4488_v58 = vpop.f32.mrb[64].mxu0 }
 0x3dd   : > { %v4489_v39 = vadd.f32 %v4488_v58, %v4382_v24  ;;  %v4490_v22 = vpop.f32.mrb[65].mxu0 }
 0x3de   : > { %v4491_v19 = vadd.f32 %v4490_v22, %v4386_v8 }
 0x3df   : > { %v4706_v30 = vsub.f32 0.0, %v4489_v39 }
 0x3e0   : > { %v4707_v26 = vsub.f32 0.0, %v4491_v19 }
 0x3e1   : > { %v4714_v43 = vmul.f32 1.442695, %v4706_v30 }
 0x3e2   : > { %v4716_v23 = vmul.f32 1.442695, %v4707_v26 }
 0x3e3   : > { %5906 = vpow2.f32 %v4714_v43 }
 0x3e4   : > { %5908 = vpow2.f32 %v4716_v23 }
 0x3ed   : > { %v5907_v15 = vpop.eup %5906 }
 0x3ee   : > { %v5909_v62 = vpop.eup %5908  ;;  %v4730_v20 = vadd.f32 1.0, %v5907_v15 }
 0x3ef   : > { %v4731_v6 = vadd.f32 1.0, %v5909_v62 }
 0x3f0   : > { %5910 = vrcp.f32 %v4730_v20 }
 0x3f1   : > { %5912 = vrcp.f32 %v4731_v6 }
 0x3f8   : > { %v4559_v50 = vpop.f32.mrb[64].mxu1 }
 0x3f9   : > { %v4560_v36 = vadd.f32 %v4559_v50, %v4390_v21  ;;  %v4561_v33 = vpop.f32.mrb[65].mxu1 }
 0x3fa   : > { %v5911_v12 = vpop.eup %5910  ;;  %v4562_v45 = vadd.f32 %v4561_v33, %v4394_v27 }
 0x3fb   : > { %v5913_v61 = vpop.eup %5912  ;;  %v4708_v35 = vsub.f32 0.0, %v4560_v36 }
 0x3fc   : > { %v4754_v14 = vcombine.low %v5911_v12, %v5913_v61  ;;  %v4709_v46 = vsub.f32 0.0, %v4562_v45 }
 0x3fd   : > { %v4718_v4 = vmul.f32 1.442695, %v4708_v35 }
 0x3fe   : > { %v4720_v53 = vmul.f32 1.442695, %v4709_v46  ;;  %v4764_v44 = vrot.slane %v4754_v14, %v4763_v38 }
 0x3ff   : > { %5914 = vpow2.f32 %v4718_v4 }
 0x400   : > { %5916 = vpow2.f32 %v4720_v53 }
 0x409   : > { %v5915_v7 = vpop.eup %5914 }
 0x40a   : > { %v5917_v5 = vpop.eup %5916  ;;  %v4732_v13 = vadd.f32 1.0, %v5915_v7 }
 0x40b   : > { %v4733_v51 = vadd.f32 1.0, %v5917_v5 }
 0x40c   : > { %5918 = vrcp.f32 %v4732_v13 }
 0x40d   : > { %5920 = vrcp.f32 %v4733_v51 }
 0x416   : > { %v5919_v41 = vpop.eup %5918 }
 0x417   : > { %v5921_v32 = vpop.eup %5920 }
 0x418   : > { %v4755_v9 = vcombine.low %v5919_v41, %v5921_v32 }
 0x41a   : > { %v4771_v25 = vrot.slane %v4755_v9, %v4763_v38 }
 0x41c   : > { %v4786_v37 = vcombine.low %v4764_v44, %v4771_v25 }
 0x41e   : > { %v4794_v21 = vrot.slane %v4786_v37, %v4763_v38 }
 0x448   : > { %v4630_v16 = vpop.f32.mrb[66].mxu0 }
 0x449   : > { %v4631_v42 = vadd.f32 %v4630_v16, %v4398_v49  ;;  %v4632_v52 = vpop.f32.mrb[67].mxu0 }
 0x44a   : > { %v4633_v47 = vadd.f32 %v4632_v52, %v4402_v40 }
 0x44b   : > { %v4710_v3 = vsub.f32 0.0, %v4631_v42 }
 0x44c   : > { %v4711_v28 = vsub.f32 0.0, %v4633_v47 }
 0x44d   : > { %v4722_v34 = vmul.f32 1.442695, %v4710_v3 }
 0x44e   : > { %v4724_v10 = vmul.f32 1.442695, %v4711_v28 }
 0x44f   : > { %5922 = vpow2.f32 %v4722_v34 }
 0x450   : > { %5924 = vpow2.f32 %v4724_v10 }
 0x459   : > { %v5923_v54 = vpop.eup %5922 }
 0x45a   : > { %v5925_v18 = vpop.eup %5924  ;;  %v4734_v60 = vadd.f32 1.0, %v5923_v54 }
 0x45b   : > { %v4735_v63 = vadd.f32 1.0, %v5925_v18 }
 0x45c   : > { %5926 = vrcp.f32 %v4734_v60 }
 0x45d   : > { %5928 = vrcp.f32 %v4735_v63  ;;  %v4701_v48 = vpop.f32.mrb[66].mxu1 }
 0x45e   : > { %v4702_v31 = vadd.f32 %v4701_v48, %v4406_v56  ;;  %v4703_v11 = vpop.f32.mrb[67].mxu1 }
 0x45f   : > { %v4704_v0 = vadd.f32 %v4703_v11, %v4410_v1 }
 0x460   : > { %v4712_v24 = vsub.f32 0.0, %v4702_v31 }
 0x461   : > { %v4713_v8 = vsub.f32 0.0, %v4704_v0 }
 0x462   : > { %v4726_v39 = vmul.f32 1.442695, %v4712_v24 }
 0x463   : > { %v4728_v19 = vmul.f32 1.442695, %v4713_v8 }
 0x464   : > { %5930 = vpow2.f32 %v4726_v39 }
 0x465   : > { %5932 = vpow2.f32 %v4728_v19 }
 0x466   : > { %v5927_v58 = vpop.eup %5926 }
 0x467   : > { %v5929_v22 = vpop.eup %5928 }
 0x468   : > { %v4756_v30 = vcombine.low %v5927_v58, %v5929_v22 }
 0x46a   : > { %v4778_v62 = vrot.slane %v4756_v30, %v4763_v38 }
 0x46e   : > { %v5931_v26 = vpop.eup %5930 }
 0x46f   : > { %v5933_v43 = vpop.eup %5932  ;;  %v4736_v57 = vadd.f32 1.0, %v5931_v26 }
 0x470   : > { %v4737_v23 = vadd.f32 1.0, %v5933_v43 }
 0x471   : > { %5934 = vrcp.f32 %v4736_v57 }
 0x472   : > { %5936 = vrcp.f32 %v4737_v23 }
 0x47b   : > { %v5935_v2 = vpop.eup %5934 }
 0x47c   : > { %v5937_v55 = vpop.eup %5936 }
 0x47d   : > { %v4757_v15 = vcombine.low %v5935_v2, %v5937_v55 }
 0x47f   : > { %v4785_v20 = vrot.slane %v4757_v15, %v4763_v38 }
 0x481   : > { %v4787_v6 = vcombine.low %v4778_v62, %v4785_v20 }
 0x483   : > { %v4801_v27 = vrot.slane %v4787_v6, %v4763_v38 }
 0x485   : > { %v4802_v50 = vcombine.low %v4794_v21, %v4801_v27 }
 0x487   : > { %4804 = vst [vmem:[%s342_s14] sm:$0xff] %v4802_v50 }
 0x488   : > { %5951 = shalt.err (!%p5948_p4)
}
 0x489   : > { %s5952_s23 = scalar_lea.hbm %s8011_s22, 128  ;;  %s5956_s14 = scalar_lea.hbm %s8062_s9, 256 }
 0x48a   : > { %p5953_p7 = scmp.ne.s32.totalorder %s8011_s22, %s5952_s23  ;;  %p5957_p10 = scmp.lt.u32.totalorder %s8011_s22, %s8062_s9 }
 0x48b   : > { %p5958_p11 = scmp.lt.u32.totalorder %s5956_s14, %s5952_s23  ;;  %p5960_p13 = scmp.lt.u32.totalorder %s5952_s23, %s8011_s22 }
 0x48c   : > { %p5954_p8 = pnand %p5953_p7, %p6100_p5 }
 0x48d   : > { %p5959_p12 = por %p5958_p11, %p5957_p10 }
 0x48e   : > { %p5955_p9 = pneg %p5954_p8 }
 0x48f   : > { %p5961_p0 = por %p5960_p13, %p5959_p12 }
 0x491   : > { %p5962_p1 = pnand %p5961_p0, %p5955_p9 }
 0x493   : > { %5965 = shalt.err (!%p5962_p1)
}
 0x494   : > { %5824 = dma.vmem_to_hbm [thread:$0]  (%p6100_p5), %s8013_s13, 128, %s8011_s22, %s4806_s24  }
 0x495 PF: > { %p5830_p2 = scmp.ge.s32.totalorder %s6000_s12, 2  ;;  %s4832_s25 = sand.u32 1, %s5988_s30  }
 0x496   : > { %s4833_s26 = scalar_lea.sflag [#allocation3], %s4832_s25 }
 0x497   : > { %p5827_p3 = pnand %p5830_p2, %p6104_p6 }
 0x499   : > { %5983 = dma.done.wait (!%p5827_p3), %s4833_s26, 128  }
 0x49a   : > { %5985 = vsyncadd (!%p5827_p3), %s4833_s26, 4294967168  ;;  %p19_p4 = scmp.ge.s32.totalorder %s6087_s15, 4   ;;  %s8081_s30 = smov %s5992_s10 }
 0x49b   : > { %s8082_s10 = smov %s5996_s11  ;;  %s8083_s11 = smov %s6098_s18 }
 0x49c   : > { %s8084_s12 = smov %s6087_s15  ;;  %21 = sbr.rel (!%p19_p4) target bundleno = 3 (0x3), region = 96 }
 0x4a3   :  { %4838 = vsyncpa [#allocation3], 1 }
 0x4a4   :  { %4840 = vsyncpa [#allocation3 + $0x1], 1 }

</bundles_post_ra>
